<compile_context>
chip_gen: v6e
topology: v6e:2x2x1
jax: 0.10.0
libtpu: 0.0.40
codegen_flags: <defaults>
</compile_context>

<pallas_src>
import jax
import jax.numpy as jnp
from jax.experimental import pallas as pl
from jax.experimental.pallas import tpu as pltpu


# ------------------------------ fused kernel --------------------------------

def _cnn_block_kernel(x_ref,
                      r1_ref, m1_ref, b1_ref,
                      r2_ref, m2_ref, b2_ref,
                      r3_ref, m3_ref, b3_ref,
                      o_ref):
    cdt = m1_ref.dtype  # MXU compute dtype (bf16)

    def conv(a, r_ref, m_ref, b_ref, relu):
        # a:  (H, W*Cin)           channels-last packed activation (cdt)
        # r:  (kh, Ho, H)          one-hot output-row selectors
        # m:  (kh, W*Cin, Wo*Cout) structured conv weights
        # b:  (1, Wo*Cout)         bias tiled over Wo (f32)
        kh = m_ref.shape[0]
        ho = r_ref.shape[1]
        ncol = m_ref.shape[2]
        acc = jnp.zeros((ho, ncol), jnp.float32)
        for ki in range(kh):  # static unroll: 2 MXU matmuls per kernel row
            rows = jnp.dot(r_ref[ki], a, preferred_element_type=jnp.float32)
            acc = acc + jnp.dot(rows.astype(cdt), m_ref[ki],
                                preferred_element_type=jnp.float32)
        y = acc + b_ref[...]                 # f32 epilogue (v5e-friendly)
        if relu:
            y = jnp.maximum(y, 0.0)
        return y

    a0 = x_ref[0]                                                   # (84, 84)
    a1 = conv(a0, r1_ref, m1_ref, b1_ref, relu=True).astype(cdt)    # (20, 320)
    a2 = conv(a1, r2_ref, m2_ref, b2_ref, relu=True).astype(cdt)    # (9, 288)
    y3 = conv(a2, r3_ref, m3_ref, b3_ref, relu=False)               # (2, 128)
    o_ref[0] = y3.astype(o_ref.dtype)


# ----------------- conv -> structured-matmul operand building ----------------

def _conv_as_structured_matmuls(w, b, stride, H, W, dtype):
    """Re-express a PyTorch Conv2d (OIHW weights, VALID padding, given stride)
    acting on an activation stored as (H, W*Cin) so that
        y(Ho, Wo*Cout) = sum_ki (R[ki] @ A) @ M[ki] + brow.
    """
    Cout, Cin, kh, kw = w.shape
    Ho = (H - kh) // stride + 1
    Wo = (W - kw) // stride + 1

    # R[ki, ho, h] = 1  iff  h == stride*ho + ki   (output-row gather).
    ki = jnp.arange(kh)[:, None, None]
    ho = jnp.arange(Ho)[None, :, None]
    hh = jnp.arange(H)[None, None, :]
    R = (hh == stride * ho + ki).astype(dtype)                       # (kh, Ho, H)

    # M[ki, w'*Cin + c, wo*Cout + co] = w[co, c, ki, w' - stride*wo] (0 outside).
    kj = jnp.arange(kw)[:, None, None]
    wp = jnp.arange(W)[None, :, None]
    wo = jnp.arange(Wo)[None, None, :]
    sel = (wp == stride * wo + kj).astype(w.dtype)                   # (kw, W, Wo)
    M = jnp.einsum('jxw,ocij->ixcwo', sel, w)                        # (kh, W, Cin, Wo, Cout)
    M = M.reshape(kh, W * Cin, Wo * Cout).astype(dtype)

    brow = jnp.tile(b, Wo).reshape(1, Wo * Cout).astype(jnp.float32)
    return R, M, brow, (Ho, Wo, Cout)


# -------------------------------- forward -----------------------------------

def cnn_block_forward(x, params, *, compute_dtype=jnp.bfloat16):
    """x: (N, 1, 84, 84) float32 NCHW -> (N, 256) float32 (PyTorch flatten order)."""
    N, C, H, W = x.shape
    assert (C, H, W) == (1, 84, 84), "CNNBlock expects (N, 1, 84, 84) inputs"

    r1, m1, b1, (h1, w1, c1) = _conv_as_structured_matmuls(
        params["w_c1"], params["b_c1"], stride=4, H=H, W=W, dtype=compute_dtype)
    r2, m2, b2, (h2, w2, c2) = _conv_as_structured_matmuls(
        params["w_c2"], params["b_c2"], stride=2, H=h1, W=w1, dtype=compute_dtype)
    r3, m3, b3, (h3, w3, c3) = _conv_as_structured_matmuls(
        params["w_c3"], params["b_c3"], stride=4, H=h2, W=w2, dtype=compute_dtype)

    x2d = x[:, 0, :, :].astype(compute_dtype)          # (N, 84, 84), Cin=1 folded

    def full(a):  # whole-array block, resident across the batch grid
        return pl.BlockSpec(a.shape, lambda n: (0,) * a.ndim)

    out = pl.pallas_call(
        _cnn_block_kernel,
        out_shape=jax.ShapeDtypeStruct((N, h3, w3 * c3), jnp.float32),
        grid=(N,),
        in_specs=[
            pl.BlockSpec((1, H, W), lambda n: (n, 0, 0)),
            full(r1), full(m1), full(b1),
            full(r2), full(m2), full(b2),
            full(r3), full(m3), full(b3),
        ],
        out_specs=pl.BlockSpec((1, h3, w3 * c3), lambda n: (n, 0, 0)),
        compiler_params=pltpu.CompilerParams(dimension_semantics=("parallel",)),
    )(x2d, r1, m1, b1, r2, m2, b2, r3, m3, b3)

    # (N, Ho, Wo*Cout) -> PyTorch reshape(N, 256) order, i.e. (c, h, w) flatten.
    out = out.reshape(N, h3, w3, c3).transpose(0, 3, 1, 2).reshape(N, h3 * w3 * c3)
    return out


# --------------------------- pure-JAX reference ------------------------------

def _reference_forward(x, params):
    def conv(z, w, b, s):
        y = jax.lax.conv_general_dilated(
            z, w, window_strides=(s, s), padding="VALID",
            dimension_numbers=("NCHW", "OIHW", "NCHW"))
        return y + b[None, :, None, None]
    y = jax.nn.relu(conv(x, params["w_c1"], params["b_c1"], 4))
    y = jax.nn.relu(conv(y, params["w_c2"], params["b_c2"], 2))
    y = conv(y, params["w_c3"], params["b_c3"], 4)
    return y.reshape(y.shape[0], -1)


# ---------------------------------- main -------------------------------------

if __name__ == "__main__":
    import numpy as np

    key = jax.random.PRNGKey(0)
    ks = jax.random.split(key, 7)

    # Deterministic synthetic parameters (shapes per nn.Module __init__).
    params = {
        "w_c1": 0.05 * jax.random.normal(ks[0], (16, 1, 8, 8), jnp.float32),
        "b_c1": 0.05 * jax.random.normal(ks[1], (16,), jnp.float32),
        "w_c2": 0.05 * jax.random.normal(ks[2], (32, 16, 4, 4), jnp.float32),
        "b_c2": 0.05 * jax.random.normal(ks[3], (32,), jnp.float32),
        "w_c3": 0.05 * jax.random.normal(ks[4], (64, 32, 3, 3), jnp.float32),
        "b_c3": 0.05 * jax.random.normal(ks[5], (64,), jnp.float32),
    }

    # batch=2; spatial must be 84x84 so the conv stack yields exactly 256 feats.
    x = jax.random.normal(ks[6], (2, 1, 84, 84), jnp.float32)

    out = jax.block_until_ready(jax.jit(cnn_block_forward)(x, params))
    assert out.shape == (2, 256) and out.dtype == jnp.float32

    # Sanity-check against an f32 XLA reference (loose tol: bf16 MXU inputs).
    ref = jax.block_until_ready(jax.jit(_reference_forward)(x, params))
    np.testing.assert_allclose(np.asarray(out), np.asarray(ref),
                               atol=5e-2, rtol=5e-2)
    print("KERNEL_OK")
</pallas_src>

<mosaic_0001>
module attributes {stable_mosaic.version = 11 : i64} {
  func.func @_cnn_block_kernel(%arg0: i32, %arg1: memref<1x84x84xbf16, #tpu.memory_space<vmem>>, %arg2: memref<8x20x84xbf16, #tpu.memory_space<vmem>>, %arg3: memref<8x84x320xbf16, #tpu.memory_space<vmem>>, %arg4: memref<1x320xf32, #tpu.memory_space<vmem>>, %arg5: memref<4x9x20xbf16, #tpu.memory_space<vmem>>, %arg6: memref<4x320x288xbf16, #tpu.memory_space<vmem>>, %arg7: memref<1x288xf32, #tpu.memory_space<vmem>>, %arg8: memref<3x2x9xbf16, #tpu.memory_space<vmem>>, %arg9: memref<3x288x128xbf16, #tpu.memory_space<vmem>>, %arg10: memref<1x128xf32, #tpu.memory_space<vmem>>, %arg11: memref<1x2x128xf32, #tpu.memory_space<vmem>>) attributes {dimension_semantics = [#tpu.dimension_semantics<parallel>], iteration_bounds = array<i64: 2>, scalar_prefetch = 0 : i64, scratch_operands = 0 : i64, tpu.core_type = #tpu.core_type<tc>, window_params = [{transform_indices = @transform_0, window_bounds = array<i64: 1, 84, 84>}, {pipeline_mode = #tpu.pipeline_mode<synchronous>, transform_indices = @transform_1, window_bounds = array<i64: 8, 20, 84>}, {pipeline_mode = #tpu.pipeline_mode<synchronous>, transform_indices = @transform_2, window_bounds = array<i64: 8, 84, 320>}, {pipeline_mode = #tpu.pipeline_mode<synchronous>, transform_indices = @transform_3, window_bounds = array<i64: 1, 320>}, {pipeline_mode = #tpu.pipeline_mode<synchronous>, transform_indices = @transform_4, window_bounds = array<i64: 4, 9, 20>}, {pipeline_mode = #tpu.pipeline_mode<synchronous>, transform_indices = @transform_5, window_bounds = array<i64: 4, 320, 288>}, {pipeline_mode = #tpu.pipeline_mode<synchronous>, transform_indices = @transform_6, window_bounds = array<i64: 1, 288>}, {pipeline_mode = #tpu.pipeline_mode<synchronous>, transform_indices = @transform_7, window_bounds = array<i64: 3, 2, 9>}, {pipeline_mode = #tpu.pipeline_mode<synchronous>, transform_indices = @transform_8, window_bounds = array<i64: 3, 288, 128>}, {pipeline_mode = #tpu.pipeline_mode<synchronous>, transform_indices = @transform_9, window_bounds = array<i64: 1, 128>}, {transform_indices = @transform_10, window_bounds = array<i64: 1, 2, 128>}]} {
    %c0 = arith.constant 0 : index
    %c0_0 = arith.constant 0 : index
    %c0_1 = arith.constant 0 : index
    %0 = vector.load %arg1[%c0, %c0_0, %c0_1] : memref<1x84x84xbf16, #tpu.memory_space<vmem>>, vector<1x84x84xbf16>
    %1 = vector.shape_cast %0 : vector<1x84x84xbf16> to vector<84x84xbf16>
    %cst = arith.constant 0.000000e+00 : f32
    %2 = vector.broadcast %cst : f32 to vector<20x320xf32>
    %c0_2 = arith.constant 0 : index
    %c0_3 = arith.constant 0 : index
    %c0_4 = arith.constant 0 : index
    %3 = vector.load %arg2[%c0_2, %c0_3, %c0_4] : memref<8x20x84xbf16, #tpu.memory_space<vmem>>, vector<1x20x84xbf16>
    %4 = vector.shape_cast %3 : vector<1x20x84xbf16> to vector<20x84xbf16>
    %cst_5 = arith.constant dense<0.000000e+00> : vector<20x84xf32>
    %5 = tpu.matmul %4, %1, %cst_5 {dimension_numbers = #tpu.dot_dimension_numbers<[1], [0], [0], [1], [0, 0, 1, 1], [], []>} : vector<20x84xbf16>, vector<84x84xbf16>, vector<20x84xf32> -> vector<20x84xf32>
    %6 = arith.truncf %5 : vector<20x84xf32> to vector<20x84xbf16>
    %c0_6 = arith.constant 0 : index
    %c0_7 = arith.constant 0 : index
    %c0_8 = arith.constant 0 : index
    %7 = vector.load %arg3[%c0_6, %c0_7, %c0_8] : memref<8x84x320xbf16, #tpu.memory_space<vmem>>, vector<1x84x320xbf16>
    %8 = vector.shape_cast %7 : vector<1x84x320xbf16> to vector<84x320xbf16>
    %cst_9 = arith.constant dense<0.000000e+00> : vector<20x320xf32>
    %9 = tpu.matmul %6, %8, %cst_9 {dimension_numbers = #tpu.dot_dimension_numbers<[1], [0], [0], [1], [0, 0, 1, 1], [], []>} : vector<20x84xbf16>, vector<84x320xbf16>, vector<20x320xf32> -> vector<20x320xf32>
    %10 = arith.addf %2, %9 : vector<20x320xf32>
    %c1 = arith.constant 1 : index
    %c0_10 = arith.constant 0 : index
    %c0_11 = arith.constant 0 : index
    %11 = vector.load %arg2[%c1, %c0_10, %c0_11] : memref<8x20x84xbf16, #tpu.memory_space<vmem>>, vector<1x20x84xbf16>
    %12 = vector.shape_cast %11 : vector<1x20x84xbf16> to vector<20x84xbf16>
    %cst_12 = arith.constant dense<0.000000e+00> : vector<20x84xf32>
    %13 = tpu.matmul %12, %1, %cst_12 {dimension_numbers = #tpu.dot_dimension_numbers<[1], [0], [0], [1], [0, 0, 1, 1], [], []>} : vector<20x84xbf16>, vector<84x84xbf16>, vector<20x84xf32> -> vector<20x84xf32>
    %14 = arith.truncf %13 : vector<20x84xf32> to vector<20x84xbf16>
    %c1_13 = arith.constant 1 : index
    %c0_14 = arith.constant 0 : index
    %c0_15 = arith.constant 0 : index
    %15 = vector.load %arg3[%c1_13, %c0_14, %c0_15] : memref<8x84x320xbf16, #tpu.memory_space<vmem>>, vector<1x84x320xbf16>
    %16 = vector.shape_cast %15 : vector<1x84x320xbf16> to vector<84x320xbf16>
    %cst_16 = arith.constant dense<0.000000e+00> : vector<20x320xf32>
    %17 = tpu.matmul %14, %16, %cst_16 {dimension_numbers = #tpu.dot_dimension_numbers<[1], [0], [0], [1], [0, 0, 1, 1], [], []>} : vector<20x84xbf16>, vector<84x320xbf16>, vector<20x320xf32> -> vector<20x320xf32>
    %18 = arith.addf %10, %17 : vector<20x320xf32>
    %c2 = arith.constant 2 : index
    %c0_17 = arith.constant 0 : index
    %c0_18 = arith.constant 0 : index
    %19 = vector.load %arg2[%c2, %c0_17, %c0_18] : memref<8x20x84xbf16, #tpu.memory_space<vmem>>, vector<1x20x84xbf16>
    %20 = vector.shape_cast %19 : vector<1x20x84xbf16> to vector<20x84xbf16>
    %cst_19 = arith.constant dense<0.000000e+00> : vector<20x84xf32>
    %21 = tpu.matmul %20, %1, %cst_19 {dimension_numbers = #tpu.dot_dimension_numbers<[1], [0], [0], [1], [0, 0, 1, 1], [], []>} : vector<20x84xbf16>, vector<84x84xbf16>, vector<20x84xf32> -> vector<20x84xf32>
    %22 = arith.truncf %21 : vector<20x84xf32> to vector<20x84xbf16>
    %c2_20 = arith.constant 2 : index
    %c0_21 = arith.constant 0 : index
    %c0_22 = arith.constant 0 : index
    %23 = vector.load %arg3[%c2_20, %c0_21, %c0_22] : memref<8x84x320xbf16, #tpu.memory_space<vmem>>, vector<1x84x320xbf16>
    %24 = vector.shape_cast %23 : vector<1x84x320xbf16> to vector<84x320xbf16>
    %cst_23 = arith.constant dense<0.000000e+00> : vector<20x320xf32>
    %25 = tpu.matmul %22, %24, %cst_23 {dimension_numbers = #tpu.dot_dimension_numbers<[1], [0], [0], [1], [0, 0, 1, 1], [], []>} : vector<20x84xbf16>, vector<84x320xbf16>, vector<20x320xf32> -> vector<20x320xf32>
    %26 = arith.addf %18, %25 : vector<20x320xf32>
    %c3 = arith.constant 3 : index
    %c0_24 = arith.constant 0 : index
    %c0_25 = arith.constant 0 : index
    %27 = vector.load %arg2[%c3, %c0_24, %c0_25] : memref<8x20x84xbf16, #tpu.memory_space<vmem>>, vector<1x20x84xbf16>
    %28 = vector.shape_cast %27 : vector<1x20x84xbf16> to vector<20x84xbf16>
    %cst_26 = arith.constant dense<0.000000e+00> : vector<20x84xf32>
    %29 = tpu.matmul %28, %1, %cst_26 {dimension_numbers = #tpu.dot_dimension_numbers<[1], [0], [0], [1], [0, 0, 1, 1], [], []>} : vector<20x84xbf16>, vector<84x84xbf16>, vector<20x84xf32> -> vector<20x84xf32>
    %30 = arith.truncf %29 : vector<20x84xf32> to vector<20x84xbf16>
    %c3_27 = arith.constant 3 : index
    %c0_28 = arith.constant 0 : index
    %c0_29 = arith.constant 0 : index
    %31 = vector.load %arg3[%c3_27, %c0_28, %c0_29] : memref<8x84x320xbf16, #tpu.memory_space<vmem>>, vector<1x84x320xbf16>
    %32 = vector.shape_cast %31 : vector<1x84x320xbf16> to vector<84x320xbf16>
    %cst_30 = arith.constant dense<0.000000e+00> : vector<20x320xf32>
    %33 = tpu.matmul %30, %32, %cst_30 {dimension_numbers = #tpu.dot_dimension_numbers<[1], [0], [0], [1], [0, 0, 1, 1], [], []>} : vector<20x84xbf16>, vector<84x320xbf16>, vector<20x320xf32> -> vector<20x320xf32>
    %34 = arith.addf %26, %33 : vector<20x320xf32>
    %c4 = arith.constant 4 : index
    %c0_31 = arith.constant 0 : index
    %c0_32 = arith.constant 0 : index
    %35 = vector.load %arg2[%c4, %c0_31, %c0_32] : memref<8x20x84xbf16, #tpu.memory_space<vmem>>, vector<1x20x84xbf16>
    %36 = vector.shape_cast %35 : vector<1x20x84xbf16> to vector<20x84xbf16>
    %cst_33 = arith.constant dense<0.000000e+00> : vector<20x84xf32>
    %37 = tpu.matmul %36, %1, %cst_33 {dimension_numbers = #tpu.dot_dimension_numbers<[1], [0], [0], [1], [0, 0, 1, 1], [], []>} : vector<20x84xbf16>, vector<84x84xbf16>, vector<20x84xf32> -> vector<20x84xf32>
    %38 = arith.truncf %37 : vector<20x84xf32> to vector<20x84xbf16>
    %c4_34 = arith.constant 4 : index
    %c0_35 = arith.constant 0 : index
    %c0_36 = arith.constant 0 : index
    %39 = vector.load %arg3[%c4_34, %c0_35, %c0_36] : memref<8x84x320xbf16, #tpu.memory_space<vmem>>, vector<1x84x320xbf16>
    %40 = vector.shape_cast %39 : vector<1x84x320xbf16> to vector<84x320xbf16>
    %cst_37 = arith.constant dense<0.000000e+00> : vector<20x320xf32>
    %41 = tpu.matmul %38, %40, %cst_37 {dimension_numbers = #tpu.dot_dimension_numbers<[1], [0], [0], [1], [0, 0, 1, 1], [], []>} : vector<20x84xbf16>, vector<84x320xbf16>, vector<20x320xf32> -> vector<20x320xf32>
    %42 = arith.addf %34, %41 : vector<20x320xf32>
    %c5 = arith.constant 5 : index
    %c0_38 = arith.constant 0 : index
    %c0_39 = arith.constant 0 : index
    %43 = vector.load %arg2[%c5, %c0_38, %c0_39] : memref<8x20x84xbf16, #tpu.memory_space<vmem>>, vector<1x20x84xbf16>
    %44 = vector.shape_cast %43 : vector<1x20x84xbf16> to vector<20x84xbf16>
    %cst_40 = arith.constant dense<0.000000e+00> : vector<20x84xf32>
    %45 = tpu.matmul %44, %1, %cst_40 {dimension_numbers = #tpu.dot_dimension_numbers<[1], [0], [0], [1], [0, 0, 1, 1], [], []>} : vector<20x84xbf16>, vector<84x84xbf16>, vector<20x84xf32> -> vector<20x84xf32>
    %46 = arith.truncf %45 : vector<20x84xf32> to vector<20x84xbf16>
    %c5_41 = arith.constant 5 : index
    %c0_42 = arith.constant 0 : index
    %c0_43 = arith.constant 0 : index
    %47 = vector.load %arg3[%c5_41, %c0_42, %c0_43] : memref<8x84x320xbf16, #tpu.memory_space<vmem>>, vector<1x84x320xbf16>
    %48 = vector.shape_cast %47 : vector<1x84x320xbf16> to vector<84x320xbf16>
    %cst_44 = arith.constant dense<0.000000e+00> : vector<20x320xf32>
    %49 = tpu.matmul %46, %48, %cst_44 {dimension_numbers = #tpu.dot_dimension_numbers<[1], [0], [0], [1], [0, 0, 1, 1], [], []>} : vector<20x84xbf16>, vector<84x320xbf16>, vector<20x320xf32> -> vector<20x320xf32>
    %50 = arith.addf %42, %49 : vector<20x320xf32>
    %c6 = arith.constant 6 : index
    %c0_45 = arith.constant 0 : index
    %c0_46 = arith.constant 0 : index
    %51 = vector.load %arg2[%c6, %c0_45, %c0_46] : memref<8x20x84xbf16, #tpu.memory_space<vmem>>, vector<1x20x84xbf16>
    %52 = vector.shape_cast %51 : vector<1x20x84xbf16> to vector<20x84xbf16>
    %cst_47 = arith.constant dense<0.000000e+00> : vector<20x84xf32>
    %53 = tpu.matmul %52, %1, %cst_47 {dimension_numbers = #tpu.dot_dimension_numbers<[1], [0], [0], [1], [0, 0, 1, 1], [], []>} : vector<20x84xbf16>, vector<84x84xbf16>, vector<20x84xf32> -> vector<20x84xf32>
    %54 = arith.truncf %53 : vector<20x84xf32> to vector<20x84xbf16>
    %c6_48 = arith.constant 6 : index
    %c0_49 = arith.constant 0 : index
    %c0_50 = arith.constant 0 : index
    %55 = vector.load %arg3[%c6_48, %c0_49, %c0_50] : memref<8x84x320xbf16, #tpu.memory_space<vmem>>, vector<1x84x320xbf16>
    %56 = vector.shape_cast %55 : vector<1x84x320xbf16> to vector<84x320xbf16>
    %cst_51 = arith.constant dense<0.000000e+00> : vector<20x320xf32>
    %57 = tpu.matmul %54, %56, %cst_51 {dimension_numbers = #tpu.dot_dimension_numbers<[1], [0], [0], [1], [0, 0, 1, 1], [], []>} : vector<20x84xbf16>, vector<84x320xbf16>, vector<20x320xf32> -> vector<20x320xf32>
    %58 = arith.addf %50, %57 : vector<20x320xf32>
    %c7 = arith.constant 7 : index
    %c0_52 = arith.constant 0 : index
    %c0_53 = arith.constant 0 : index
    %59 = vector.load %arg2[%c7, %c0_52, %c0_53] : memref<8x20x84xbf16, #tpu.memory_space<vmem>>, vector<1x20x84xbf16>
    %60 = vector.shape_cast %59 : vector<1x20x84xbf16> to vector<20x84xbf16>
    %cst_54 = arith.constant dense<0.000000e+00> : vector<20x84xf32>
    %61 = tpu.matmul %60, %1, %cst_54 {dimension_numbers = #tpu.dot_dimension_numbers<[1], [0], [0], [1], [0, 0, 1, 1], [], []>} : vector<20x84xbf16>, vector<84x84xbf16>, vector<20x84xf32> -> vector<20x84xf32>
    %62 = arith.truncf %61 : vector<20x84xf32> to vector<20x84xbf16>
    %c7_55 = arith.constant 7 : index
    %c0_56 = arith.constant 0 : index
    %c0_57 = arith.constant 0 : index
    %63 = vector.load %arg3[%c7_55, %c0_56, %c0_57] : memref<8x84x320xbf16, #tpu.memory_space<vmem>>, vector<1x84x320xbf16>
    %64 = vector.shape_cast %63 : vector<1x84x320xbf16> to vector<84x320xbf16>
    %cst_58 = arith.constant dense<0.000000e+00> : vector<20x320xf32>
    %65 = tpu.matmul %62, %64, %cst_58 {dimension_numbers = #tpu.dot_dimension_numbers<[1], [0], [0], [1], [0, 0, 1, 1], [], []>} : vector<20x84xbf16>, vector<84x320xbf16>, vector<20x320xf32> -> vector<20x320xf32>
    %66 = arith.addf %58, %65 : vector<20x320xf32>
    %c0_59 = arith.constant 0 : index
    %c0_60 = arith.constant 0 : index
    %67 = vector.load %arg4[%c0_59, %c0_60] : memref<1x320xf32, #tpu.memory_space<vmem>>, vector<1x320xf32>
    %68 = vector.broadcast %67 : vector<1x320xf32> to vector<20x320xf32>
    %69 = arith.addf %66, %68 : vector<20x320xf32>
    %cst_61 = arith.constant 0.000000e+00 : f32
    %70 = vector.broadcast %cst_61 : f32 to vector<20x320xf32>
    %71 = arith.maximumf %69, %70 : vector<20x320xf32>
    %72 = arith.truncf %71 : vector<20x320xf32> to vector<20x320xbf16>
    %cst_62 = arith.constant 0.000000e+00 : f32
    %73 = vector.broadcast %cst_62 : f32 to vector<9x288xf32>
    %c0_63 = arith.constant 0 : index
    %c0_64 = arith.constant 0 : index
    %c0_65 = arith.constant 0 : index
    %74 = vector.load %arg5[%c0_63, %c0_64, %c0_65] : memref<4x9x20xbf16, #tpu.memory_space<vmem>>, vector<1x9x20xbf16>
    %75 = vector.shape_cast %74 : vector<1x9x20xbf16> to vector<9x20xbf16>
    %cst_66 = arith.constant dense<0.000000e+00> : vector<9x320xf32>
    %76 = tpu.matmul %75, %72, %cst_66 {dimension_numbers = #tpu.dot_dimension_numbers<[1], [0], [0], [1], [0, 0, 1, 1], [], []>} : vector<9x20xbf16>, vector<20x320xbf16>, vector<9x320xf32> -> vector<9x320xf32>
    %77 = arith.truncf %76 : vector<9x320xf32> to vector<9x320xbf16>
    %c0_67 = arith.constant 0 : index
    %c0_68 = arith.constant 0 : index
    %c0_69 = arith.constant 0 : index
    %78 = vector.load %arg6[%c0_67, %c0_68, %c0_69] : memref<4x320x288xbf16, #tpu.memory_space<vmem>>, vector<1x320x288xbf16>
    %79 = vector.shape_cast %78 : vector<1x320x288xbf16> to vector<320x288xbf16>
    %cst_70 = arith.constant dense<0.000000e+00> : vector<9x288xf32>
    %80 = tpu.matmul %77, %79, %cst_70 {dimension_numbers = #tpu.dot_dimension_numbers<[1], [0], [0], [1], [0, 0, 1, 1], [], []>} : vector<9x320xbf16>, vector<320x288xbf16>, vector<9x288xf32> -> vector<9x288xf32>
    %81 = arith.addf %73, %80 : vector<9x288xf32>
    %c1_71 = arith.constant 1 : index
    %c0_72 = arith.constant 0 : index
    %c0_73 = arith.constant 0 : index
    %82 = vector.load %arg5[%c1_71, %c0_72, %c0_73] : memref<4x9x20xbf16, #tpu.memory_space<vmem>>, vector<1x9x20xbf16>
    %83 = vector.shape_cast %82 : vector<1x9x20xbf16> to vector<9x20xbf16>
    %cst_74 = arith.constant dense<0.000000e+00> : vector<9x320xf32>
    %84 = tpu.matmul %83, %72, %cst_74 {dimension_numbers = #tpu.dot_dimension_numbers<[1], [0], [0], [1], [0, 0, 1, 1], [], []>} : vector<9x20xbf16>, vector<20x320xbf16>, vector<9x320xf32> -> vector<9x320xf32>
    %85 = arith.truncf %84 : vector<9x320xf32> to vector<9x320xbf16>
    %c1_75 = arith.constant 1 : index
    %c0_76 = arith.constant 0 : index
    %c0_77 = arith.constant 0 : index
    %86 = vector.load %arg6[%c1_75, %c0_76, %c0_77] : memref<4x320x288xbf16, #tpu.memory_space<vmem>>, vector<1x320x288xbf16>
    %87 = vector.shape_cast %86 : vector<1x320x288xbf16> to vector<320x288xbf16>
    %cst_78 = arith.constant dense<0.000000e+00> : vector<9x288xf32>
    %88 = tpu.matmul %85, %87, %cst_78 {dimension_numbers = #tpu.dot_dimension_numbers<[1], [0], [0], [1], [0, 0, 1, 1], [], []>} : vector<9x320xbf16>, vector<320x288xbf16>, vector<9x288xf32> -> vector<9x288xf32>
    %89 = arith.addf %81, %88 : vector<9x288xf32>
    %c2_79 = arith.constant 2 : index
    %c0_80 = arith.constant 0 : index
    %c0_81 = arith.constant 0 : index
    %90 = vector.load %arg5[%c2_79, %c0_80, %c0_81] : memref<4x9x20xbf16, #tpu.memory_space<vmem>>, vector<1x9x20xbf16>
    %91 = vector.shape_cast %90 : vector<1x9x20xbf16> to vector<9x20xbf16>
    %cst_82 = arith.constant dense<0.000000e+00> : vector<9x320xf32>
    %92 = tpu.matmul %91, %72, %cst_82 {dimension_numbers = #tpu.dot_dimension_numbers<[1], [0], [0], [1], [0, 0, 1, 1], [], []>} : vector<9x20xbf16>, vector<20x320xbf16>, vector<9x320xf32> -> vector<9x320xf32>
    %93 = arith.truncf %92 : vector<9x320xf32> to vector<9x320xbf16>
    %c2_83 = arith.constant 2 : index
    %c0_84 = arith.constant 0 : index
    %c0_85 = arith.constant 0 : index
    %94 = vector.load %arg6[%c2_83, %c0_84, %c0_85] : memref<4x320x288xbf16, #tpu.memory_space<vmem>>, vector<1x320x288xbf16>
    %95 = vector.shape_cast %94 : vector<1x320x288xbf16> to vector<320x288xbf16>
    %cst_86 = arith.constant dense<0.000000e+00> : vector<9x288xf32>
    %96 = tpu.matmul %93, %95, %cst_86 {dimension_numbers = #tpu.dot_dimension_numbers<[1], [0], [0], [1], [0, 0, 1, 1], [], []>} : vector<9x320xbf16>, vector<320x288xbf16>, vector<9x288xf32> -> vector<9x288xf32>
    %97 = arith.addf %89, %96 : vector<9x288xf32>
    %c3_87 = arith.constant 3 : index
    %c0_88 = arith.constant 0 : index
    %c0_89 = arith.constant 0 : index
    %98 = vector.load %arg5[%c3_87, %c0_88, %c0_89] : memref<4x9x20xbf16, #tpu.memory_space<vmem>>, vector<1x9x20xbf16>
    %99 = vector.shape_cast %98 : vector<1x9x20xbf16> to vector<9x20xbf16>
    %cst_90 = arith.constant dense<0.000000e+00> : vector<9x320xf32>
    %100 = tpu.matmul %99, %72, %cst_90 {dimension_numbers = #tpu.dot_dimension_numbers<[1], [0], [0], [1], [0, 0, 1, 1], [], []>} : vector<9x20xbf16>, vector<20x320xbf16>, vector<9x320xf32> -> vector<9x320xf32>
    %101 = arith.truncf %100 : vector<9x320xf32> to vector<9x320xbf16>
    %c3_91 = arith.constant 3 : index
    %c0_92 = arith.constant 0 : index
    %c0_93 = arith.constant 0 : index
    %102 = vector.load %arg6[%c3_91, %c0_92, %c0_93] : memref<4x320x288xbf16, #tpu.memory_space<vmem>>, vector<1x320x288xbf16>
    %103 = vector.shape_cast %102 : vector<1x320x288xbf16> to vector<320x288xbf16>
    %cst_94 = arith.constant dense<0.000000e+00> : vector<9x288xf32>
    %104 = tpu.matmul %101, %103, %cst_94 {dimension_numbers = #tpu.dot_dimension_numbers<[1], [0], [0], [1], [0, 0, 1, 1], [], []>} : vector<9x320xbf16>, vector<320x288xbf16>, vector<9x288xf32> -> vector<9x288xf32>
    %105 = arith.addf %97, %104 : vector<9x288xf32>
    %c0_95 = arith.constant 0 : index
    %c0_96 = arith.constant 0 : index
    %106 = vector.load %arg7[%c0_95, %c0_96] : memref<1x288xf32, #tpu.memory_space<vmem>>, vector<1x288xf32>
    %107 = vector.broadcast %106 : vector<1x288xf32> to vector<9x288xf32>
    %108 = arith.addf %105, %107 : vector<9x288xf32>
    %cst_97 = arith.constant 0.000000e+00 : f32
    %109 = vector.broadcast %cst_97 : f32 to vector<9x288xf32>
    %110 = arith.maximumf %108, %109 : vector<9x288xf32>
    %111 = arith.truncf %110 : vector<9x288xf32> to vector<9x288xbf16>
    %cst_98 = arith.constant 0.000000e+00 : f32
    %112 = vector.broadcast %cst_98 : f32 to vector<2x128xf32>
    %c0_99 = arith.constant 0 : index
    %c0_100 = arith.constant 0 : index
    %c0_101 = arith.constant 0 : index
    %113 = vector.load %arg8[%c0_99, %c0_100, %c0_101] : memref<3x2x9xbf16, #tpu.memory_space<vmem>>, vector<1x2x9xbf16>
    %114 = vector.shape_cast %113 : vector<1x2x9xbf16> to vector<2x9xbf16>
    %cst_102 = arith.constant dense<0.000000e+00> : vector<2x288xf32>
    %115 = tpu.matmul %114, %111, %cst_102 {dimension_numbers = #tpu.dot_dimension_numbers<[1], [0], [0], [1], [0, 0, 1, 1], [], []>} : vector<2x9xbf16>, vector<9x288xbf16>, vector<2x288xf32> -> vector<2x288xf32>
    %116 = arith.truncf %115 : vector<2x288xf32> to vector<2x288xbf16>
    %c0_103 = arith.constant 0 : index
    %c0_104 = arith.constant 0 : index
    %c0_105 = arith.constant 0 : index
    %117 = vector.load %arg9[%c0_103, %c0_104, %c0_105] : memref<3x288x128xbf16, #tpu.memory_space<vmem>>, vector<1x288x128xbf16>
    %118 = vector.shape_cast %117 : vector<1x288x128xbf16> to vector<288x128xbf16>
    %cst_106 = arith.constant dense<0.000000e+00> : vector<2x128xf32>
    %119 = tpu.matmul %116, %118, %cst_106 {dimension_numbers = #tpu.dot_dimension_numbers<[1], [0], [0], [1], [0, 0, 1, 1], [], []>} : vector<2x288xbf16>, vector<288x128xbf16>, vector<2x128xf32> -> vector<2x128xf32>
    %120 = arith.addf %112, %119 : vector<2x128xf32>
    %c1_107 = arith.constant 1 : index
    %c0_108 = arith.constant 0 : index
    %c0_109 = arith.constant 0 : index
    %121 = vector.load %arg8[%c1_107, %c0_108, %c0_109] : memref<3x2x9xbf16, #tpu.memory_space<vmem>>, vector<1x2x9xbf16>
    %122 = vector.shape_cast %121 : vector<1x2x9xbf16> to vector<2x9xbf16>
    %cst_110 = arith.constant dense<0.000000e+00> : vector<2x288xf32>
    %123 = tpu.matmul %122, %111, %cst_110 {dimension_numbers = #tpu.dot_dimension_numbers<[1], [0], [0], [1], [0, 0, 1, 1], [], []>} : vector<2x9xbf16>, vector<9x288xbf16>, vector<2x288xf32> -> vector<2x288xf32>
    %124 = arith.truncf %123 : vector<2x288xf32> to vector<2x288xbf16>
    %c1_111 = arith.constant 1 : index
    %c0_112 = arith.constant 0 : index
    %c0_113 = arith.constant 0 : index
    %125 = vector.load %arg9[%c1_111, %c0_112, %c0_113] : memref<3x288x128xbf16, #tpu.memory_space<vmem>>, vector<1x288x128xbf16>
    %126 = vector.shape_cast %125 : vector<1x288x128xbf16> to vector<288x128xbf16>
    %cst_114 = arith.constant dense<0.000000e+00> : vector<2x128xf32>
    %127 = tpu.matmul %124, %126, %cst_114 {dimension_numbers = #tpu.dot_dimension_numbers<[1], [0], [0], [1], [0, 0, 1, 1], [], []>} : vector<2x288xbf16>, vector<288x128xbf16>, vector<2x128xf32> -> vector<2x128xf32>
    %128 = arith.addf %120, %127 : vector<2x128xf32>
    %c2_115 = arith.constant 2 : index
    %c0_116 = arith.constant 0 : index
    %c0_117 = arith.constant 0 : index
    %129 = vector.load %arg8[%c2_115, %c0_116, %c0_117] : memref<3x2x9xbf16, #tpu.memory_space<vmem>>, vector<1x2x9xbf16>
    %130 = vector.shape_cast %129 : vector<1x2x9xbf16> to vector<2x9xbf16>
    %cst_118 = arith.constant dense<0.000000e+00> : vector<2x288xf32>
    %131 = tpu.matmul %130, %111, %cst_118 {dimension_numbers = #tpu.dot_dimension_numbers<[1], [0], [0], [1], [0, 0, 1, 1], [], []>} : vector<2x9xbf16>, vector<9x288xbf16>, vector<2x288xf32> -> vector<2x288xf32>
    %132 = arith.truncf %131 : vector<2x288xf32> to vector<2x288xbf16>
    %c2_119 = arith.constant 2 : index
    %c0_120 = arith.constant 0 : index
    %c0_121 = arith.constant 0 : index
    %133 = vector.load %arg9[%c2_119, %c0_120, %c0_121] : memref<3x288x128xbf16, #tpu.memory_space<vmem>>, vector<1x288x128xbf16>
    %134 = vector.shape_cast %133 : vector<1x288x128xbf16> to vector<288x128xbf16>
    %cst_122 = arith.constant dense<0.000000e+00> : vector<2x128xf32>
    %135 = tpu.matmul %132, %134, %cst_122 {dimension_numbers = #tpu.dot_dimension_numbers<[1], [0], [0], [1], [0, 0, 1, 1], [], []>} : vector<2x288xbf16>, vector<288x128xbf16>, vector<2x128xf32> -> vector<2x128xf32>
    %136 = arith.addf %128, %135 : vector<2x128xf32>
    %c0_123 = arith.constant 0 : index
    %c0_124 = arith.constant 0 : index
    %137 = vector.load %arg10[%c0_123, %c0_124] : memref<1x128xf32, #tpu.memory_space<vmem>>, vector<1x128xf32>
    %138 = vector.broadcast %137 : vector<1x128xf32> to vector<2x128xf32>
    %139 = arith.addf %136, %138 : vector<2x128xf32>
    %c0_125 = arith.constant 0 : index
    %c0_126 = arith.constant 0 : index
    %c0_127 = arith.constant 0 : index
    %140 = vector.load %arg11[%c0_125, %c0_126, %c0_127] : memref<1x2x128xf32, #tpu.memory_space<vmem>>, vector<1x2x128xf32>
    %141 = vector.shape_cast %140 : vector<1x2x128xf32> to vector<2x128xf32>
    %142 = vector.shape_cast %139 : vector<2x128xf32> to vector<1x2x128xf32>
    tpu.vector_store %arg11[%c0_125, %c0_126, %c0_127], %142 {strides = array<i32>} : memref<1x2x128xf32, #tpu.memory_space<vmem>>, vector<1x2x128xf32>,
    return
  }
  func.func @transform_0(%arg0: i32) -> (i32, i32, i32) {
    %c0_i32 = arith.constant 0 : i32
    %c0_i32_0 = arith.constant 0 : i32
    %c0_i32_1 = arith.constant 0 : i32
    return %arg0, %c0_i32, %c0_i32_0 : i32, i32, i32
  }
  func.func @transform_1(%arg0: i32) -> (i32, i32, i32) {
    %c0_i32 = arith.constant 0 : i32
    %c0_i32_0 = arith.constant 0 : i32
    %c0_i32_1 = arith.constant 0 : i32
    %c0_i32_2 = arith.constant 0 : i32
    return %c0_i32, %c0_i32_0, %c0_i32_1 : i32, i32, i32
  }
  func.func @transform_2(%arg0: i32) -> (i32, i32, i32) {
    %c0_i32 = arith.constant 0 : i32
    %c0_i32_0 = arith.constant 0 : i32
    %c0_i32_1 = arith.constant 0 : i32
    %c0_i32_2 = arith.constant 0 : i32
    return %c0_i32, %c0_i32_0, %c0_i32_1 : i32, i32, i32
  }
  func.func @transform_3(%arg0: i32) -> (i32, i32) {
    %c0_i32 = arith.constant 0 : i32
    %c0_i32_0 = arith.constant 0 : i32
    %c0_i32_1 = arith.constant 0 : i32
    return %c0_i32, %c0_i32_0 : i32, i32
  }
  func.func @transform_4(%arg0: i32) -> (i32, i32, i32) {
    %c0_i32 = arith.constant 0 : i32
    %c0_i32_0 = arith.constant 0 : i32
    %c0_i32_1 = arith.constant 0 : i32
    %c0_i32_2 = arith.constant 0 : i32
    return %c0_i32, %c0_i32_0, %c0_i32_1 : i32, i32, i32
  }
  func.func @transform_5(%arg0: i32) -> (i32, i32, i32) {
    %c0_i32 = arith.constant 0 : i32
    %c0_i32_0 = arith.constant 0 : i32
    %c0_i32_1 = arith.constant 0 : i32
    %c0_i32_2 = arith.constant 0 : i32
    return %c0_i32, %c0_i32_0, %c0_i32_1 : i32, i32, i32
  }
  func.func @transform_6(%arg0: i32) -> (i32, i32) {
    %c0_i32 = arith.constant 0 : i32
    %c0_i32_0 = arith.constant 0 : i32
    %c0_i32_1 = arith.constant 0 : i32
    return %c0_i32, %c0_i32_0 : i32, i32
  }
  func.func @transform_7(%arg0: i32) -> (i32, i32, i32) {
    %c0_i32 = arith.constant 0 : i32
    %c0_i32_0 = arith.constant 0 : i32
    %c0_i32_1 = arith.constant 0 : i32
    %c0_i32_2 = arith.constant 0 : i32
    return %c0_i32, %c0_i32_0, %c0_i32_1 : i32, i32, i32
  }
  func.func @transform_8(%arg0: i32) -> (i32, i32, i32) {
    %c0_i32 = arith.constant 0 : i32
    %c0_i32_0 = arith.constant 0 : i32
    %c0_i32_1 = arith.constant 0 : i32
    %c0_i32_2 = arith.constant 0 : i32
    return %c0_i32, %c0_i32_0, %c0_i32_1 : i32, i32, i32
  }
  func.func @transform_9(%arg0: i32) -> (i32, i32) {
    %c0_i32 = arith.constant 0 : i32
    %c0_i32_0 = arith.constant 0 : i32
    %c0_i32_1 = arith.constant 0 : i32
    return %c0_i32, %c0_i32_0 : i32, i32
  }
  func.func @transform_10(%arg0: i32) -> (i32, i32, i32) {
    %c0_i32 = arith.constant 0 : i32
    %c0_i32_0 = arith.constant 0 : i32
    %c0_i32_1 = arith.constant 0 : i32
    return %arg0, %c0_i32, %c0_i32_0 : i32, i32, i32
  }
}

</mosaic_0001>

<bundles_post_ra>
// kernel: tile.18
= control target key start
LH: loop header
LB: loop body
LE: loop exit
PB: predicated region body
PF: predicated region fallthrough
CT: control target
= control target key end

     0   :  { %s34_s0 = inlined_call_operand.vmem [shape: f32[16], index: 0, kind: input, shape index: {}]   ;;  %s35_s1 = inlined_call_operand.vmem [shape: f32[20,16], index: 1, kind: output, shape index: {}]  }
   0x1   :  { %v4_v0 = vld [vmem:[%s34_s0] ss:$0 sm:$0xff] }
   0x2   :  { %5 = vst [vmem:[%s35_s1] sm:$0xff] %v4_v0  ;;  %10 = vst [vmem:[%s35_s1 + $0x8] sm:$0xff] %v4_v0 }
   0x3   :  { %11 = vst [vmem:[%s35_s1 + $0x10] sm:$0xff] %v4_v0 }

// kernel: tile.19
= control target key start
LH: loop header
LB: loop body
LE: loop exit
PB: predicated region body
PF: predicated region fallthrough
CT: control target
= control target key end

     0   :  { %s6_s6 = smov 3  ;;  %s20_s9 = smov 3  ;;  %vm3_vm0 = vcmask 130048   ;;  %vm10_vm1 = vcmask 1048448   ;;  %vm17_vm2 = vcmask 917248   ;;  %vm24_vm3 = vcmask 786048   ;;  %s139_s0 = inlined_call_operand.vmem [shape: f32[20,16], index: 0, kind: input, shape index: {}]   ;;  %s140_s1 = inlined_call_operand.vmem [shape: f32[1,320], index: 1, kind: output, shape index: {}]  }
   0x1   :  { %v73_v0 = vld [vmem:[%s139_s0 + $0x7] ss:$8 sm:%s6_s6]   ;;  %s89_s10 = smov 112   ;;  %v75_v1 = vld [vmem:[%s139_s0 + $0x5] ss:$8 sm:%s20_s9]   ;;  %s13_s13 = smov 3 }
   0x2   :  { %8 = vrot.lane.b32.xlu0 %v73_v0, %s89_s10  ;;  %s90_s14 = smov 80   ;;  %v74_v2 = vld [vmem:[%s139_s0 + $0x6] ss:$8 sm:%s13_s13]   ;;  %s27_s17 = smov 3  ;;  %vm31_vm4 = vcmask 654848   ;;  %vm37_vm5 = vcmask 523648  }
   0x3   :  { %22 = vrot.lane.b32.xlu1 %v75_v1, %s90_s14  ;;  %v76_v3 = vld [vmem:[%s139_s0 + $0x4] ss:$8 sm:%s27_s17]   ;;  %s91_s20 = smov 96   ;;  %v2_v4 = vld [vmem:[%s139_s0] ss:$8 sm:$0x7]  }
   0x4   :  { %s92_s23 = smov 64   ;;  %v77_v5 = vld [vmem:[%s139_s0 + $0x3] ss:$8 sm:$0x7]   ;;  %s93_s28 = smov 48   ;;  %vm43_vm6 = vcmask 392448  }
   0x5   :  { %4 = vst.msk [vmem:[#allocation0] ss:$8 sm:$0x7] %vm3_vm0, %v2_v4   ;;  %v78_v6 = vld [vmem:[%s139_s0 + $0x2] ss:$8 sm:$0x7]  }
   0x6   :  { %15 = vrot.lane.b32.xlu0 %v74_v2, %s91_s20  ;;  %s94_s29 = smov 32   ;;  %v79_v7 = vld [vmem:[%s139_s0 + $0x1] ss:$8 sm:$0x7]   ;;  %s95_s0 = smov 16   ;;  %vm49_vm7 = vcmask 261248  }
   0x7   :  { %29 = vrot.lane.b32.xlu1 %v76_v3, %s92_s23 }
   0xa   :  { %35 = vrot.lane.b32.xlu0 %v77_v5, %s93_s28 }
   0xb   :  { %41 = vrot.lane.b32.xlu1 %v78_v6, %s94_s29 }
   0xe   :  { %47 = vrot.lane.b32.xlu0 %v79_v7, %s95_s0 }
  0x74   :  { %v9_v8 = vpop.permute.xlu0 %8  }
  0x75   :  { %11 = vst.msk [vmem:[#allocation0] ss:$8 sm:$0x3] %vm10_vm1, %v9_v8   ;;  %v23_v9 = vpop.permute.xlu1 %22  }
  0x78   :  { %v16_v10 = vpop.permute.xlu0 %15  }
  0x79   :  { %18 = vst.msk [vmem:[#allocation0] ss:$8 sm:$0x3] %vm17_vm2, %v16_v10   ;;  %v30_v11 = vpop.permute.xlu1 %29  }
  0x7a   :  { %25 = vst.msk [vmem:[#allocation0] ss:$8 sm:$0x3] %vm24_vm3, %v23_v9  }
  0x7b   :  { %32 = vst.msk [vmem:[#allocation0] ss:$8 sm:$0x3] %vm31_vm4, %v30_v11  }
  0x7c   :  { %v36_v12 = vpop.permute.xlu0 %35  }
  0x7d   :  { %38 = vst.msk [vmem:[#allocation0] ss:$8 sm:$0x7] %vm37_vm5, %v36_v12   ;;  %v42_v13 = vpop.permute.xlu1 %41  }
  0x7e   :  { %44 = vst.msk [vmem:[#allocation0] ss:$8 sm:$0x7] %vm43_vm6, %v42_v13  }
  0x80   :  { %v48_v14 = vpop.permute.xlu0 %47  }
  0x81   :  { %50 = vst.msk [vmem:[#allocation0] ss:$8 sm:$0x7] %vm49_vm7, %v48_v14  }
  0x88   :  { %v55_v15 = vld [vmem:[#allocation0] sm:$0x1]  ;;  %v60_v16 = vld [vmem:[#allocation0 + $0x8] sm:$0x1]  ;;  %v66_v17 = vld [vmem:[#allocation0 + $0x10] sm:$0x1] }
  0x89   :  { %58 = vst [vmem:[%s140_s1] sm:$0x1] %v55_v15  ;;  %80 = vst [vmem:[%s140_s1 + $0x1] sm:$0x1] %v60_v16 }
  0x8a   :  { %81 = vst [vmem:[%s140_s1 + $0x2] sm:$0x1] %v66_v17 }

// kernel: tile.23
= control target key start
LH: loop header
LB: loop body
LE: loop exit
PB: predicated region body
PF: predicated region fallthrough
CT: control target
= control target key end

     0   :  { %s28_s0 = inlined_call_operand.vmem [shape: f32[32], index: 0, kind: input, shape index: {}]   ;;  %s29_s1 = inlined_call_operand.vmem [shape: f32[9,32], index: 1, kind: output, shape index: {}]  }
   0x1   :  { %v4_v0 = vld [vmem:[%s28_s0] ss:$0 sm:$0xff] }
   0x2   :  { %5 = vst [vmem:[%s29_s1] sm:$0xff] %v4_v0  ;;  %8 = vst [vmem:[%s29_s1 + $0x8] sm:$0xff] %v4_v0 }

// kernel: tile.24
= control target key start
LH: loop header
LB: loop body
LE: loop exit
PB: predicated region body
PF: predicated region fallthrough
CT: control target
= control target key end

     0   :  { %s6_s6 = smov 3  ;;  %s13_s11 = smov 3  ;;  %vm3_vm0 = vcmask 261120   ;;  %vm10_vm1 = vcmask 1048320   ;;  %vm17_vm2 = vcmask 785920   ;;  %vm24_vm3 = vcmask 523520   ;;  %s90_s0 = inlined_call_operand.vmem [shape: f32[9,32], index: 0, kind: input, shape index: {}]   ;;  %s91_s1 = inlined_call_operand.vmem [shape: f32[1,288], index: 1, kind: output, shape index: {}]  }
   0x1   :  { %v2_v0 = vld [vmem:[%s90_s0] ss:$4 sm:$0x7]   ;;  %v48_v1 = vld [vmem:[%s90_s0 + $0x3] ss:$4 sm:%s6_s6]   ;;  %s56_s12 = smov 96  }
   0x2   :  { %8 = vrot.lane.b32.xlu0 %v48_v1, %s56_s12  ;;  %s20_s13 = smov 3  ;;  %4 = vst.msk [vmem:[#allocation0] ss:$8 sm:$0x7] %vm3_vm0, %v2_v0   ;;  %v49_v2 = vld [vmem:[%s90_s0 + $0x2] ss:$4 sm:%s13_s11]  }
   0x3   :  { %v50_v3 = vld [vmem:[%s90_s0 + $0x1] ss:$4 sm:%s20_s13]   ;;  %s57_s0 = smov 32   ;;  %s58_s18 = smov 64  }
   0x4   :  { %22 = vrot.lane.b32.xlu1 %v50_v3, %s57_s0 }
   0x6   :  { %15 = vrot.lane.b32.xlu0 %v49_v2, %s58_s18 }
   0x9   :  { %v41_v4 = vld [vmem:[#allocation0 + $0x10] sm:$0x1] }
   0xa   :  { %52 = vst [vmem:[%s91_s1 + $0x2] sm:$0x1] %v41_v4 }
  0x74   :  { %v9_v5 = vpop.permute.xlu0 %8  }
  0x75   :  { %11 = vst.msk [vmem:[#allocation0] ss:$8 sm:$0x3] %vm10_vm1, %v9_v5  }
  0x76   :  { %v23_v6 = vpop.permute.xlu1 %22  }
  0x78   :  { %v16_v7 = vpop.permute.xlu0 %15  }
  0x79   :  { %18 = vst.msk [vmem:[#allocation0] ss:$8 sm:$0x3] %vm17_vm2, %v16_v7  }
  0x7a   :  { %25 = vst.msk [vmem:[#allocation0] ss:$8 sm:$0x3] %vm24_vm3, %v23_v6  }
  0x81   :  { %v30_v8 = vld [vmem:[#allocation0] sm:$0x1]  ;;  %v35_v9 = vld [vmem:[#allocation0 + $0x8] sm:$0x1] }
  0x82   :  { %33 = vst [vmem:[%s91_s1] sm:$0x1] %v30_v8  ;;  %51 = vst [vmem:[%s91_s1 + $0x1] sm:$0x1] %v35_v9 }

// kernel: tile.28
= control target key start
LH: loop header
LB: loop body
LE: loop exit
PB: predicated region body
PF: predicated region fallthrough
CT: control target
= control target key end

     0   :  { %s22_s0 = inlined_call_operand.vmem [shape: f32[64], index: 0, kind: input, shape index: {}]   ;;  %s23_s1 = inlined_call_operand.vmem [shape: f32[2,64], index: 1, kind: output, shape index: {}]  }
   0x1   :  { %v4_v0 = vld [vmem:[%s22_s0] ss:$0 sm:$0xff] }
   0x2   :  { %5 = vst [vmem:[%s23_s1] sm:$0x3] %v4_v0 }

// kernel: tile.29
= control target key start
LH: loop header
LB: loop body
LE: loop exit
PB: predicated region body
PF: predicated region fallthrough
CT: control target
= control target key end

     0   :  { %vm8_vm0 = vcmask 523264   ;;  %vm14_vm1 = vcmask 1048064   ;;  %s42_s0 = inlined_call_operand.vmem [shape: f32[2,64], index: 0, kind: input, shape index: {}]   ;;  %s43_s1 = inlined_call_operand.vmem [shape: f32[1,128], index: 1, kind: output, shape index: {}]  }
   0x1   :  { %v5_v0 = vld [vmem:[%s42_s0] sm:$0x3]  ;;  %s25_s0 = smov 64  }
   0x2   :  { %6 = vst [vmem:[#allocation1] sm:$0x3] %v5_v0 }
   0x9   :  { %v11_v1 = vld [vmem:[#allocation1 + $0x1] sm:$0x1]   ;;  %v7_v2 = vld [vmem:[#allocation1] sm:$0x1]  }
   0xa   :  { %12 = vrot.lane.b32.xlu0 %v11_v1, %s25_s0  ;;  %9 = vst.msk [vmem:[#allocation0] sm:$0x1] %vm8_vm0, %v7_v2  }
  0x7c   :  { %v13_v3 = vpop.permute.xlu0 %12  }
  0x7d   :  { %15 = vst.msk [vmem:[#allocation0] sm:$0x1] %vm14_vm1, %v13_v3  }
  0x84   :  { %v20_v4 = vld [vmem:[#allocation0] sm:$0x1] }
  0x85   :  { %23 = vst [vmem:[%s43_s1] sm:$0x1] %v20_v4 }

// kernel: cnn_block_forward.1
= control target key start
LH: loop header
LB: loop body
LE: loop exit
PB: predicated region body
PF: predicated region fallthrough
CT: control target
= control target key end

     0   :  { %s9052_s13 = smov 0   ;;  %s11041_s0 = inlined_call_operand.vmem [shape: bf16[2,84,84], index: 0, kind: input, shape index: {}]   ;;  %s11042_s1 = inlined_call_operand.vmem [shape: bf16[8,20,84], index: 1, kind: input, shape index: {}]   ;;  %s11043_s2 = inlined_call_operand.vmem [shape: bf16[8,84,320], index: 2, kind: input, shape index: {}]   ;;  %s11044_s3 = inlined_call_operand.vmem [shape: f32[1,320], index: 3, kind: input, shape index: {}]   ;;  %s11045_s4 = inlined_call_operand.vmem [shape: bf16[4,9,20], index: 4, kind: input, shape index: {}]   ;;  %s11046_s5 = inlined_call_operand.vmem [shape: bf16[4,320,288], index: 5, kind: input, shape index: {}]   ;;  %s11047_s6 = inlined_call_operand.vmem [shape: f32[1,288], index: 6, kind: input, shape index: {}]   ;;  %s11048_s7 = inlined_call_operand.vmem [shape: bf16[3,2,9], index: 7, kind: input, shape index: {}]   ;;  %s11049_s8 = inlined_call_operand.vmem [shape: bf16[3,288,128], index: 8, kind: input, shape index: {}]   ;;  %s11050_s9 = inlined_call_operand.vmem [shape: f32[1,128], index: 9, kind: input, shape index: {}]   ;;  %s11051_s10 = inlined_call_operand.vmem [shape: f32[2,2,128], index: 10, kind: output, shape index: {}]  }
   0x1 LB: > { %s6605_s14 = sadd.s32 4294967295, %s8991_s13   ;;  %p6609_p0 = scmp.ge.s32.totalorder %s8991_s13, 1  ;;  %s8991_s13 = sphi %s9052_s13, %s20_s13  }
   0x2   : > { %p312_p1 = scmp.lt.s32.totalorder %s8991_s13, 3 }
   0x4   : > { %p313_p2 = pnand %p6609_p0, %p312_p1 }
   0x5   : > { %p349_p3 = scmp.lt.s32.totalorder (!%p313_p2), %s6605_s14, 1 }
   0x6   : > { %316 = sbr.rel (%p313_p2) target bundleno = 3521 (0xdc1), region = 60 }
   0xb   : > { %vm414_vm0 = vcmask 687104   ;;  %v8401_v0 = vld [vmem:[%s11042_s1 + $0xc] sm:$0xff]   ;;  %s11053_s14 = smov (!%p349_p3, %s6605_s14), 1  ;;  %v8403_v1 = vld [vmem:[%s11042_s1] sm:$0xff]   ;;  %vm421_vm1 = vcmask 1041408   ;;  %v8993_v34 = vmov 0  }
   0xc   : > { %8016 = vmatprep.mubr.msk.bf16.mxu1 %vm414_vm0, %v8401_v0  ;;  %s8382_s19 = smul.u32 44, %s11053_s14  ;;  %8000 = vmatprep.mubr.msk.bf16.mxu0 %vm414_vm0, %v8403_v1  ;;  %v6649_v8 = vld [vmem:[%s11043_s2 + $0xfc] sm:$0x33]  ;;  %v8407_v11 = vld [vmem:[%s11043_s2 + $0x104] ss:$0 sps:$4 sm:$0x33]  }
   0xd   : > { %v6666_v10 = vcombine.low %v6649_v8, %v6649_v8  ;;  %v8402_v12 = vld [vmem:[%s11042_s1 + $0x14] ss:$0 sps:$4 sm:$0x33]   ;;  %v8404_v13 = vld [vmem:[%s11042_s1 + $0x8] ss:$0 sps:$4 sm:$0x33]   ;;  %v6667_v14 = vcombine.high %v6649_v8, %v6649_v8 }
   0xe   : > { %s9074_s22 = scalar_lea.vmem %s11041_s0, %s8382_s19  ;;  %v8410_v16 = vld [vmem:[%s11043_s2 + $0xe8] ss:$12 sps:$4 sm:$0xff]   ;;  %v8411_v17 = vld [vmem:[%s11043_s2 + $0xec] ss:$12 sps:$4 sm:$0xff]   ;;  %v689_v18 = vsel %vm421_vm1, %v8407_v11, 0  ;;  %vm2852_vm2 = vcmask 162816  }
   0xf   : > { %v8399_v2 = vld [vmem:[%s9074_s22 + $0x20] sm:$0xff]   ;;  %v8400_v3 = vld [vmem:[%s9074_s22 + $0x28] ss:$0 sps:$4 sm:$0x33]   ;;  %v8398_v5 = vld [vmem:[%s9074_s22 + $0x18] sm:$0xff]   ;;  %v683_v15 = vsel %vm421_vm1, %v6666_v10, 0 }
  0x10   : > { %8367 = vmatprep.subr.msk.bf16.mxu1 %vm421_vm1, %v8400_v3  ;;  %v9080_v4 = vsel %vm421_vm1, %v8400_v3, 0  ;;  %8366 = vmatprep.subr.msk.bf16.mxu0 %vm421_vm1, %v8400_v3  ;;  %v8397_v6 = vld [vmem:[%s9074_s22 + $0x10] sm:$0xff]   ;;  %v8396_v7 = vld [vmem:[%s9074_s22 + $0x8] sm:$0xff]   ;;  %v8395_v9 = vld [vmem:[%s9074_s22] sm:$0xff]   ;;  %vm8995_vm3 = vmmov 0   ;;  %vm3531_vm4 = vcmask 523264  }
  0x11   : > { %8005 = vmatpush3.bf16.msra.mxu1 %v9080_v4  ;;  %7989 = vmatpush3.bf16.msra.mxu0 %v9080_v4  ;;  %v8408_v19 = vld [vmem:[%s11043_s2 + $0xe4] ss:$12 sps:$4 sm:$0xff]   ;;  %v8415_v21 = vld [vmem:[%s11043_s2 + $0xd4] ss:$12 sps:$4 sm:$0xff]   ;;  %v8412_v22 = vld [vmem:[%s11043_s2 + $0xcc] ss:$12 sps:$4 sm:$0xff]  }
  0x12   : > { %8006 = vmatprep.subr.bf16.mxu1 %v8399_v2  ;;  %7990 = vmatprep.subr.bf16.mxu0 %v8399_v2  ;;  %v8414_v20 = vld [vmem:[%s11043_s2 + $0xd0] ss:$12 sps:$4 sm:$0xff]   ;;  %v8418_v23 = vld [vmem:[%s11043_s2 + $0xb8] ss:$12 sps:$4 sm:$0xff]   ;;  %v8416_v25 = vld [vmem:[%s11043_s2 + $0xb4] ss:$12 sps:$4 sm:$0xff]  }
  0x13   : > { %v8419_v24 = vld [vmem:[%s11043_s2 + $0xbc] ss:$12 sps:$4 sm:$0xff]   ;;  %v8422_v26 = vld [vmem:[%s11043_s2 + $0xa0] ss:$12 sps:$4 sm:$0xff]   ;;  %v8423_v28 = vld [vmem:[%s11043_s2 + $0xa4] ss:$12 sps:$4 sm:$0xff]  }
  0x14   : > { %v8420_v27 = vld [vmem:[%s11043_s2 + $0x9c] ss:$12 sps:$4 sm:$0xff]   ;;  %v8424_v30 = vld [vmem:[%s11043_s2 + $0x84] ss:$12 sps:$4 sm:$0xff]   ;;  %v8427_v31 = vld [vmem:[%s11043_s2 + $0x8c] ss:$12 sps:$4 sm:$0xff]  }
  0x15   : > { %8007 = vmatpush3.bf16.msra.mxu1 %v8399_v2  ;;  %7991 = vmatpush3.bf16.msra.mxu0 %v8399_v2  ;;  %v8426_v29 = vld [vmem:[%s11043_s2 + $0x88] ss:$12 sps:$4 sm:$0xff]   ;;  %v495_v32 = vld [vmem:[%s11043_s2 + $0x78] sm:$0x33]  ;;  %v8433_v47 = vld [vmem:[%s11043_s2 + $0x64] ss:$12 sps:$4 sm:$0xff]  }
  0x16   : > { %8008 = vmatprep.subr.bf16.mxu1 %v8398_v5  ;;  %7992 = vmatprep.subr.bf16.mxu0 %v8398_v5  ;;  %v6690_v33 = vcombine.high %v495_v32, %v495_v32  ;;  %v8430_v35 = vld [vmem:[%s11043_s2 + $0x80] ss:$0 sps:$4 sm:$0x33]   ;;  %v6689_v40 = vcombine.low %v495_v32, %v495_v32  ;;  %v8434_v50 = vld [vmem:[%s11043_s2 + $0x68] ss:$12 sps:$4 sm:$0xff]   ;;  %vm5583_vm5 = vcmask 1043456  }
  0x17   : > { %v891_v49 = vsel %vm421_vm1, %v8430_v35, 0  ;;  %v8431_v52 = vld [vmem:[%s11043_s2 + $0x60] ss:$12 sps:$4 sm:$0xff]   ;;  %v8438_v54 = vld [vmem:[%s11043_s2 + $0x50] ss:$12 sps:$4 sm:$0xff]   ;;  %vm5584_vm6 = vcmask 1044480  }
  0x18   : > { %v885_v46 = vsel %vm421_vm1, %v6689_v40, 0  ;;  %v8437_v53 = vld [vmem:[%s11043_s2 + $0x4c] ss:$12 sps:$4 sm:$0xff]   ;;  %v8435_v55 = vld [vmem:[%s11043_s2 + $0x48] ss:$12 sps:$4 sm:$0xff]   ;;  %v9224_v3 = vld [vmem:[%s9074_s22 + $0x20] sm:$0xff]  }
  0x19   : > { %8009 = vmatpush3.bf16.msra.mxu1 %v8398_v5  ;;  %7993 = vmatpush3.bf16.msra.mxu0 %v8398_v5  ;;  %v8441_v56 = vld [vmem:[%s11043_s2 + $0x34] ss:$12 sps:$4 sm:$0xff]   ;;  %v8442_v57 = vld [vmem:[%s11043_s2 + $0x38] ss:$12 sps:$4 sm:$0xff]   ;;  %v8439_v58 = vld [vmem:[%s11043_s2 + $0x30] ss:$12 sps:$4 sm:$0xff]  }
  0x1a   : > { %8010 = vmatprep.subr.bf16.mxu1 %v8397_v6  ;;  %7994 = vmatprep.subr.bf16.mxu0 %v8397_v6  ;;  %v8445_v59 = vld [vmem:[%s11043_s2 + $0x1c] ss:$12 sps:$4 sm:$0xff]   ;;  %v8446_v60 = vld [vmem:[%s11043_s2 + $0x20] ss:$12 sps:$4 sm:$0xff]   ;;  %v8443_v61 = vld [vmem:[%s11043_s2 + $0x18] ss:$12 sps:$4 sm:$0xff]  }
  0x1b   : > { %v8449_v62 = vld [vmem:[%s11043_s2 + $0x4] ss:$12 sps:$4 sm:$0xff]   ;;  %v8450_v63 = vld [vmem:[%s11043_s2 + $0x8] ss:$12 sps:$4 sm:$0xff]   ;;  %v8447_v0 = vld [vmem:[%s11043_s2] ss:$12 sps:$4 sm:$0xff]  }
  0x1c   : > { %v9216_v1 = vld [vmem:[%s9074_s22 + $0x28] ss:$0 sps:$4 sm:$0x33]   ;;  %v8451_v5 = vld [vmem:[%s11042_s1 + $0x18] sm:$0xff]   ;;  %vm5579_vm7 = vcmask 72704   ;;  %vm5950_vm8 = vcmask 261120  }
  0x1d   : > { %8011 = vmatpush3.bf16.msra.mxu1 %v8397_v6  ;;  %7995 = vmatpush3.bf16.msra.mxu0 %v8397_v6  ;;  %v9234_v6 = vld [vmem:[%s9074_s22 + $0x18] sm:$0xff]   ;;  %v9246_v8 = vld [vmem:[%s9074_s22 + $0x8] sm:$0xff]   ;;  %v8452_v10 = vld [vmem:[%s11042_s1 + $0x20] ss:$0 sps:$4 sm:$0x33]  }
  0x1e   : > { %8012 = vmatprep.subr.bf16.mxu1 %v8396_v7  ;;  %7996 = vmatprep.subr.bf16.mxu0 %v8396_v7 }
  0x21   : > { %8013 = vmatpush3.bf16.msra.mxu1 %v8396_v7  ;;  %7997 = vmatpush3.bf16.msra.mxu0 %v8396_v7  ;;  %v9241_v7 = vld [vmem:[%s9074_s22 + $0x10] sm:$0xff]  }
  0x22   : > { %8014 = vmatprep.subr.bf16.mxu1 %v8395_v9  ;;  %7998 = vmatprep.subr.bf16.mxu0 %v8395_v9 }
  0x25   : > { %8015 = vmatpush3.bf16.msra.mxu1 %v8395_v9  ;;  %7999 = vmatpush3.bf16.msra.mxu0 %v8395_v9  ;;  %v9251_v9 = vld [vmem:[%s9074_s22] sm:$0xff]   ;;  %s6611_s22 = sshll.u32 %s11053_s14, 1 }
  0x26   : > { %6669 = vmatprep.subr.msk.bf16.mxu0 %vm421_vm1, %v6667_v14  ;;  %8368 = vmatprep.subr.msk.bf16.mxu1 %vm421_vm1, %v8407_v11  ;;  %v6724_v11 = vld [vmem:[%s11043_s2 + $0x180] sm:$0x33]  ;;  %s357_s19 = scalar_lea.vmem %s11051_s10, %s6611_s22 }
  0x28   : > { %8017 = vmatmul.mubr.msk.bf16.vlgmr.msra.gmra.mxu1 %vm414_vm0, %v8402_v12  ;;  %8001 = vmatmul.mubr.msk.bf16.vlgmr.msra.gmra.mxu0 %vm414_vm0, %v8404_v13  ;;  %v6742_v12 = vcombine.high %v6724_v11, %v6724_v11  ;;  %v6741_v13 = vcombine.low %v6724_v11, %v6724_v11 }
  0x29   : > { %696 = vmatpush1.bf16.msra.mxu0 %v683_v15  ;;  %8021 = vmatpush3.bf16.msra.mxu1 %v689_v18  ;;  %v8455_v15 = vld [vmem:[%s11043_s2 + $0x188] ss:$0 sps:$4 sm:$0x33]  }
  0x2a   : > { %697 = vmatprep.subr.bf16.mxu0 %v8410_v16  ;;  %8022 = vmatprep.subr.bf16.mxu1 %v8411_v17  ;;  %v1178_v14 = vsel %vm421_vm1, %v6741_v13, 0  ;;  %v1184_v16 = vsel %vm421_vm1, %v8455_v15, 0  ;;  %v8456_v18 = vld [vmem:[%s11043_s2 + $0x168] ss:$12 sps:$4 sm:$0xff]  }
  0x2b   : > { %723 = vmatprep.mubr.bf16.mxu0 %v8993_v34  ;;  %v8477_v13 = vld [vmem:[%s11042_s1 + $0x2c] ss:$0 sps:$4 sm:$0x33]  }
  0x2d   : > { %698 = vmatpush1.bf16.msra.mxu0 %v8408_v19  ;;  %8023 = vmatpush3.bf16.msra.mxu1 %v8411_v17  ;;  %v8458_v17 = vld [vmem:[%s11043_s2 + $0x16c] ss:$12 sps:$4 sm:$0xff]   ;;  %v8459_v19 = vld [vmem:[%s11043_s2 + $0x170] ss:$12 sps:$4 sm:$0xff]  }
  0x2e   : > { %699 = vmatprep.subr.bf16.mxu0 %v8414_v20  ;;  %8024 = vmatprep.subr.bf16.mxu1 %v8415_v21  ;;  %v8460_v20 = vld [vmem:[%s11043_s2 + $0x150] ss:$12 sps:$4 sm:$0xff]  }
  0x31   : > { %700 = vmatpush1.bf16.msra.mxu0 %v8412_v22  ;;  %8025 = vmatpush3.bf16.msra.mxu1 %v8415_v21  ;;  %v8462_v21 = vld [vmem:[%s11043_s2 + $0x154] ss:$12 sps:$4 sm:$0xff]   ;;  %v8463_v22 = vld [vmem:[%s11043_s2 + $0x158] ss:$12 sps:$4 sm:$0xff]  }
  0x32   : > { %701 = vmatprep.subr.bf16.mxu0 %v8418_v23  ;;  %8026 = vmatprep.subr.bf16.mxu1 %v8419_v24  ;;  %v8466_v23 = vld [vmem:[%s11043_s2 + $0x13c] ss:$12 sps:$4 sm:$0xff]  }
  0x35   : > { %702 = vmatpush1.bf16.msra.mxu0 %v8416_v25  ;;  %8027 = vmatpush3.bf16.msra.mxu1 %v8419_v24  ;;  %v8467_v24 = vld [vmem:[%s11043_s2 + $0x140] ss:$12 sps:$4 sm:$0xff]   ;;  %v8464_v25 = vld [vmem:[%s11043_s2 + $0x138] ss:$12 sps:$4 sm:$0xff]  }
  0x36   : > { %703 = vmatprep.subr.bf16.mxu0 %v8422_v26  ;;  %8028 = vmatprep.subr.bf16.mxu1 %v8423_v28  ;;  %v8470_v26 = vld [vmem:[%s11043_s2 + $0x124] ss:$12 sps:$4 sm:$0xff]  }
  0x39   : > { %704 = vmatpush1.bf16.msra.mxu0 %v8420_v27  ;;  %8029 = vmatpush3.bf16.msra.mxu1 %v8423_v28  ;;  %v8468_v27 = vld [vmem:[%s11043_s2 + $0x120] ss:$12 sps:$4 sm:$0xff]   ;;  %v8471_v28 = vld [vmem:[%s11043_s2 + $0x128] ss:$12 sps:$4 sm:$0xff]  }
  0x3a   : > { %705 = vmatprep.subr.bf16.mxu0 %v8426_v29  ;;  %8030 = vmatprep.subr.bf16.mxu1 %v8427_v31  ;;  %v8474_v29 = vld [vmem:[%s11043_s2 + $0x10c] ss:$12 sps:$4 sm:$0xff]  }
  0x3d   : > { %706 = vmatpush1.bf16.msra.mxu0 %v8424_v30  ;;  %8031 = vmatpush3.bf16.msra.mxu1 %v8427_v31  ;;  %v8472_v30 = vld [vmem:[%s11043_s2 + $0x108] ss:$12 sps:$4 sm:$0xff]   ;;  %v8475_v31 = vld [vmem:[%s11043_s2 + $0x110] ss:$12 sps:$4 sm:$0xff]  }
  0x3e   : > { %6692 = vmatprep.subr.msk.bf16.mxu0 %vm421_vm1, %v6690_v33  ;;  %8369 = vmatprep.subr.msk.bf16.mxu1 %vm421_vm1, %v8430_v35 }
  0xe8   : > { %v8018_v36 = vpop.f32.mrf.mxu1  ;;  %v8002_v37 = vpop.f32.mrf.mxu0 }
  0xe9   : > { %v564_v48 = vpack.c.bf16 %v8018_v36, %v8018_v36  ;;  %v474_v2 = vpack.c.bf16 %v8002_v37, %v8002_v37 }
  0xea   : > { %v549_v38 = vpop.f32.mrf.mxu1  ;;  %v459_v39 = vpop.f32.mrf.mxu0 }
  0xec   : > { %v8019_v41 = vpop.f32.mrf.mxu1  ;;  %v8003_v42 = vpop.f32.mrf.mxu0 }
  0xee   : > { %v552_v43 = vpop.f32.mrf.mxu1  ;;  %v462_v44 = vpop.f32.mrf.mxu0 }
  0xef   : > { %v563_v45 = vpack.c.bf16 %v552_v43, %v549_v38  ;;  %v473_v51 = vpack.c.bf16 %v462_v44, %v459_v39 }
  0xf1   : > { %6670 = vmatmul.mubr.msk.bf16.vlgmr.msra.gmra.mxu0 %vm414_vm0, %v563_v45  ;;  %8032 = vmatprep.mubr.msk.bf16.mxu1 %vm414_vm0, %v563_v45 }
  0xf2   : > { %898 = vmatpush1.bf16.msra.mxu0 %v885_v46  ;;  %8033 = vmatmul.mubr.msk.bf16.vlgmr.msra.gmra.mxu1 %vm414_vm0, %v564_v48 }
  0xf3   : > { %8037 = vmatpush3.bf16.msra.mxu1 %v891_v49  ;;  %899 = vmatprep.subr.bf16.mxu0 %v8433_v47 }
  0xf4   : > { %8038 = vmatprep.subr.bf16.mxu1 %v8434_v50  ;;  %733 = vmatprep.mubr.bf16.mxu0 %v8993_v34 }
  0xf5   : > { %8048 = vmatprep.mubr.msk.bf16.mxu1 %vm414_vm0, %v473_v51 }
  0xf6   : > { %900 = vmatpush1.bf16.msra.mxu0 %v8431_v52 }
  0xf7   : > { %8039 = vmatpush3.bf16.msra.mxu1 %v8434_v50  ;;  %901 = vmatprep.subr.bf16.mxu0 %v8437_v53 }
  0xf8   : > { %8040 = vmatprep.subr.bf16.mxu1 %v8438_v54 }
  0xf9   : > { %6671 = vmatmul.mubr.msk.bf16.gmra.mxu0 %vm414_vm0, %v564_v48 }
  0xfa   : > { %902 = vmatpush1.bf16.msra.mxu0 %v8435_v55  ;;  %925 = vmatprep.mubr.bf16.mxu0 %v8993_v34 }
  0xfb   : > { %8041 = vmatpush3.bf16.msra.mxu1 %v8438_v54  ;;  %903 = vmatprep.subr.bf16.mxu0 %v8441_v56 }
  0xfc   : > { %8042 = vmatprep.subr.bf16.mxu1 %v8442_v57 }
  0xfe   : > { %904 = vmatpush1.bf16.msra.mxu0 %v8439_v58 }
  0xff   : > { %8043 = vmatpush3.bf16.msra.mxu1 %v8442_v57  ;;  %905 = vmatprep.subr.bf16.mxu0 %v8445_v59 }
 0x100   : > { %8044 = vmatprep.subr.bf16.mxu1 %v8446_v60 }
 0x102   : > { %906 = vmatpush1.bf16.msra.mxu0 %v8443_v61 }
 0x103   : > { %8045 = vmatpush3.bf16.msra.mxu1 %v8446_v60  ;;  %907 = vmatprep.subr.bf16.mxu0 %v8449_v62 }
 0x104   : > { %8046 = vmatprep.subr.bf16.mxu1 %v8450_v63 }
 0x106   : > { %908 = vmatpush1.bf16.msra.mxu0 %v8447_v0 }
 0x107   : > { %8047 = vmatpush3.bf16.msra.mxu1 %v8450_v63  ;;  %8370 = vmatprep.subr.msk.bf16.mxu0 %vm421_vm1, %v9216_v1 }
 0x108   : > { %6744 = vmatprep.subr.msk.bf16.mxu1 %vm421_vm1, %v6742_v12  ;;  %v8476_v12 = vld [vmem:[%s11042_s1 + $0x24] sm:$0xff]  }
 0x109   : > { %6693 = vmatmul.mubr.msk.bf16.vlgmr.msra.gmra.mxu0 %vm414_vm0, %v473_v51 }
 0x10a   : > { %8049 = vmatmul.mubr.msk.bf16.vlgmr.msra.gmra.mxu1 %vm414_vm0, %v474_v2  ;;  %8053 = vmatpush3.bf16.msra.mxu0 %v9080_v4 }
 0x10b   : > { %8054 = vmatprep.subr.bf16.mxu0 %v9224_v3  ;;  %935 = vmatprep.mubr.bf16.mxu0 %v8993_v34 }
 0x10c   : > { %1218 = vmatprep.mubr.bf16.mxu1 %v8993_v34  ;;  %1191 = vmatpush1.bf16.msra.mxu1 %v1178_v14  ;;  %v6776_v14 = vld [vmem:[%s11043_s2 + $0x204] sm:$0x33] }
 0x10d   : > { %1192 = vmatprep.subr.bf16.mxu1 %v8458_v17 }
 0x10e   : > { %8055 = vmatpush3.bf16.msra.mxu0 %v9224_v3 }
 0x10f   : > { %8056 = vmatprep.subr.bf16.mxu0 %v9234_v6 }
 0x110   : > { %1193 = vmatpush1.bf16.msra.mxu1 %v8456_v18  ;;  %v8480_v18 = vld [vmem:[%s11043_s2 + $0x20c] ss:$0 sps:$4 sm:$0x33]  }
 0x111   : > { %6694 = vmatmul.mubr.msk.bf16.gmra.mxu0 %vm414_vm0, %v474_v2  ;;  %1194 = vmatprep.subr.bf16.mxu1 %v8462_v21  ;;  %v8481_v21 = vld [vmem:[%s11043_s2 + $0x1ec] ss:$12 sps:$4 sm:$0xff]  }
 0x112   : > { %8057 = vmatpush3.bf16.msra.mxu0 %v9234_v6  ;;  %8064 = vmatprep.mubr.msk.bf16.mxu0 %vm414_vm0, %v8451_v5 }
 0x113   : > { %8058 = vmatprep.subr.bf16.mxu0 %v9241_v7 }
 0x114   : > { %1195 = vmatpush1.bf16.msra.mxu1 %v8460_v20  ;;  %v8483_v20 = vld [vmem:[%s11043_s2 + $0x1f0] ss:$12 sps:$4 sm:$0xff]  }
 0x115   : > { %1196 = vmatprep.subr.bf16.mxu1 %v8466_v23  ;;  %v8485_v23 = vld [vmem:[%s11043_s2 + $0x1d4] ss:$12 sps:$4 sm:$0xff]  }
 0x116   : > { %8059 = vmatpush3.bf16.msra.mxu0 %v9241_v7 }
 0x117   : > { %8060 = vmatprep.subr.bf16.mxu0 %v9246_v8 }
 0x118   : > { %1197 = vmatpush1.bf16.msra.mxu1 %v8464_v25  ;;  %v8488_v25 = vld [vmem:[%s11043_s2 + $0x1dc] ss:$12 sps:$4 sm:$0xff]  }
 0x119   : > { %1198 = vmatprep.subr.bf16.mxu1 %v8470_v26  ;;  %v8491_v26 = vld [vmem:[%s11043_s2 + $0x1c0] ss:$12 sps:$4 sm:$0xff]  }
 0x11a   : > { %8061 = vmatpush3.bf16.msra.mxu0 %v9246_v8 }
 0x11b   : > { %8062 = vmatprep.subr.bf16.mxu0 %v9251_v9 }
 0x11c   : > { %1199 = vmatpush1.bf16.msra.mxu1 %v8468_v27  ;;  %v8492_v27 = vld [vmem:[%s11043_s2 + $0x1c4] ss:$12 sps:$4 sm:$0xff]  }
 0x11d   : > { %1200 = vmatprep.subr.bf16.mxu1 %v8474_v29  ;;  %v8495_v29 = vld [vmem:[%s11043_s2 + $0x1a8] ss:$12 sps:$4 sm:$0xff]  }
 0x11e   : > { %8063 = vmatpush3.bf16.msra.mxu0 %v9251_v9 }
 0x11f   : > { %8371 = vmatprep.subr.msk.bf16.mxu0 %vm421_vm1, %v8455_v15  ;;  %v6794_v15 = vcombine.high %v6776_v14, %v6776_v14 }
 0x120   : > { %1201 = vmatpush1.bf16.msra.mxu1 %v8472_v30  ;;  %v8493_v30 = vld [vmem:[%s11043_s2 + $0x1a4] ss:$12 sps:$4 sm:$0xff]  }
 0x121   : > { %8065 = vmatmul.mubr.msk.bf16.vlgmr.msra.gmra.mxu0 %vm414_vm0, %v8452_v10  ;;  %8372 = vmatprep.subr.msk.bf16.mxu1 %vm421_vm1, %v9216_v1 }
 0x122   : > { %8069 = vmatpush3.bf16.msra.mxu0 %v1184_v16  ;;  %v6793_v16 = vcombine.low %v6776_v14, %v6776_v14 }
 0x123   : > { %8070 = vmatprep.subr.bf16.mxu0 %v8459_v19 }
 0x124   : > { %v1480_v17 = vsel %vm421_vm1, %v6793_v16, 0  ;;  %v8506_v16 = vld [vmem:[%s11043_s2 + $0x270] ss:$12 sps:$4 sm:$0xff]  }
 0x126   : > { %8071 = vmatpush3.bf16.msra.mxu0 %v8459_v19  ;;  %v1486_v19 = vsel %vm421_vm1, %v8480_v18, 0 }
 0x127   : > { %8072 = vmatprep.subr.bf16.mxu0 %v8463_v22 }
 0x12a   : > { %8073 = vmatpush3.bf16.msra.mxu0 %v8463_v22  ;;  %v8484_v22 = vld [vmem:[%s11043_s2 + $0x1f4] ss:$12 sps:$4 sm:$0xff]  }
 0x12b   : > { %8074 = vmatprep.subr.bf16.mxu0 %v8467_v24 }
 0x12e   : > { %8075 = vmatpush3.bf16.msra.mxu0 %v8467_v24  ;;  %v8487_v24 = vld [vmem:[%s11043_s2 + $0x1d8] ss:$12 sps:$4 sm:$0xff]  }
 0x12f   : > { %8076 = vmatprep.subr.bf16.mxu0 %v8471_v28 }
 0x132   : > { %8077 = vmatpush3.bf16.msra.mxu0 %v8471_v28  ;;  %v8489_v28 = vld [vmem:[%s11043_s2 + $0x1bc] ss:$12 sps:$4 sm:$0xff]  }
 0x133   : > { %8078 = vmatprep.subr.bf16.mxu0 %v8475_v31 }
 0x136   : > { %8079 = vmatpush3.bf16.msra.mxu0 %v8475_v31  ;;  %v8496_v31 = vld [vmem:[%s11043_s2 + $0x1ac] ss:$12 sps:$4 sm:$0xff]  }
 0x137   : > { %6796 = vmatprep.subr.msk.bf16.mxu0 %vm421_vm1, %v6794_v15  ;;  %v8508_v15 = vld [vmem:[%s11043_s2 + $0x274] ss:$12 sps:$4 sm:$0xff]  }
 0x1b1   : > { %v725_v32 = vpop.f32.mrf.mxu0 }
 0x1b2   : > { %v8034_v33 = vpop.f32.mrf.mxu1 }
 0x1b3   : > { %v727_v35 = vpop.f32.mrf.mxu0 }
 0x1b4   : > { %v776_v36 = vpop.f32.mrf.mxu1 }
 0x1b5   : > { %v729_v37 = vpop.f32.mrf.mxu0 }
 0x1b6   : > { %v8035_v38 = vpop.f32.mrf.mxu1 }
 0x1b7   : > { %v9316_v39 = vpop.f32.mrf.mxu0 }
 0x1b8   : > { %v9318_v44 = vpop.f32.mrf.mxu1 }
 0x1b9   : > { %v735_v40 = vpop.f32.mrf.mxu0 }
 0x1bb   : > { %v737_v41 = vpop.f32.mrf.mxu0 }
 0x1bd   : > { %v739_v42 = vpop.f32.mrf.mxu0 }
 0x1bf   : > { %v740_v43 = vpop.f32.mrf.mxu0 }
 0x1c9   : > { %v927_v45 = vpop.f32.mrf.mxu0 }
 0x1ca   : > { %v9320_v46 = vadd.f32 %v927_v45, %v725_v32  ;;  %v8050_v47 = vpop.f32.mrf.mxu1  ;;  %v8499_v32 = vld [vmem:[%s11043_s2 + $0x190] ss:$12 sps:$4 sm:$0xff]  }
 0x1cb   : > { %v9322_v48 = vadd.f32 %v8050_v47, %v8034_v33  ;;  %v929_v49 = vpop.f32.mrf.mxu0  ;;  %v8497_v33 = vld [vmem:[%s11043_s2 + $0x18c] ss:$12 sps:$4 sm:$0xff]  }
 0x1cc   : > { %v9324_v50 = vadd.f32 %v929_v49, %v727_v35  ;;  %v978_v51 = vpop.f32.mrf.mxu1  ;;  %v8500_v35 = vld [vmem:[%s11043_s2 + $0x194] ss:$12 sps:$4 sm:$0xff]  }
 0x1cd   : > { %v9326_v52 = vadd.f32 %v978_v51, %v776_v36  ;;  %v931_v53 = vpop.f32.mrf.mxu0 }
 0x1ce   : > { %v9328_v54 = vadd.f32 %v931_v53, %v729_v37  ;;  %v8051_v55 = vpop.f32.mrf.mxu1 }
 0x1cf   : > { %v9330_v56 = vpop.f32.mrf.mxu0 }
 0x1d0   : > { %v9418_v36 = vpop.f32.mrf.mxu1 }
 0x1d1   : > { %v937_v57 = vpop.f32.mrf.mxu0 }
 0x1d2   : > { %v9332_v58 = vadd.f32 %v937_v57, %v735_v40 }
 0x1d3   : > { %v939_v59 = vpop.f32.mrf.mxu0 }
 0x1d4   : > { %v9334_v60 = vadd.f32 %v939_v59, %v737_v41 }
 0x1d5   : > { %v941_v61 = vpop.f32.mrf.mxu0 }
 0x1d7   : > { %v942_v62 = vpop.f32.mrf.mxu0 }
 0x1e1   : > { %v8066_v63 = vpop.f32.mrf.mxu0 }
 0x1e2   : > { %v1059_v11 = vpack.c.bf16 %v8066_v63, %v8066_v63 }
 0x1e3   : > { %v1044_v0 = vpop.f32.mrf.mxu0 }
 0x1e5   : > { %v8067_v2 = vpop.f32.mrf.mxu0 }
 0x1e7   : > { %v1047_v5 = vpop.f32.mrf.mxu0 }
 0x1e8   : > { %v1058_v10 = vpack.c.bf16 %v1047_v5, %v1044_v0  ;;  %v6828_v5 = vld [vmem:[%s11043_s2 + $0x288] sm:$0x33] }
 0x1ea   : > { %6745 = vmatmul.mubr.msk.bf16.vlgmr.msra.gmra.mxu1 %vm414_vm0, %v1058_v10  ;;  %8080 = vmatprep.mubr.msk.bf16.mxu0 %vm414_vm0, %v1058_v10  ;;  %v6846_v10 = vcombine.high %v6828_v5, %v6828_v5 }
 0x1eb   : > { %8085 = vmatpush3.bf16.msra.mxu1 %v9080_v4  ;;  %8081 = vmatmul.mubr.msk.bf16.vlgmr.msra.gmra.mxu0 %vm414_vm0, %v1059_v11 }
 0x1ec   : > { %8086 = vmatprep.subr.bf16.mxu1 %v9224_v3  ;;  %1228 = vmatprep.mubr.bf16.mxu1 %v8993_v34 }
 0x1ed   : > { %1520 = vmatprep.mubr.bf16.mxu0 %v8993_v34  ;;  %1493 = vmatpush1.bf16.msra.mxu0 %v1480_v17  ;;  %v8509_v17 = vld [vmem:[%s11043_s2 + $0x278] ss:$12 sps:$4 sm:$0xff]  }
 0x1ee   : > { %1494 = vmatprep.subr.bf16.mxu0 %v8483_v20  ;;  %v8513_v20 = vld [vmem:[%s11043_s2 + $0x260] ss:$12 sps:$4 sm:$0xff]  }
 0x1ef   : > { %8087 = vmatpush3.bf16.msra.mxu1 %v9224_v3 }
 0x1f0   : > { %8088 = vmatprep.subr.bf16.mxu1 %v9234_v6 }
 0x1f1   : > { %1495 = vmatpush1.bf16.msra.mxu0 %v8481_v21  ;;  %v8516_v21 = vld [vmem:[%s11043_s2 + $0x244] ss:$12 sps:$4 sm:$0xff]  }
 0x1f2   : > { %6746 = vmatmul.mubr.msk.bf16.gmra.mxu1 %vm414_vm0, %v1059_v11  ;;  %1496 = vmatprep.subr.bf16.mxu0 %v8487_v24  ;;  %v6845_v11 = vcombine.low %v6828_v5, %v6828_v5  ;;  %v8520_v24 = vld [vmem:[%s11043_s2 + $0x22c] ss:$12 sps:$4 sm:$0xff]  }
 0x1f3   : > { %8089 = vmatpush3.bf16.msra.mxu1 %v9234_v6  ;;  %8096 = vmatprep.mubr.msk.bf16.mxu1 %vm414_vm0, %v8476_v12 }
 0x1f4   : > { %8090 = vmatprep.subr.bf16.mxu1 %v9241_v7  ;;  %v1782_v12 = vsel %vm421_vm1, %v6845_v11, 0 }
 0x1f5   : > { %1497 = vmatpush1.bf16.msra.mxu0 %v8485_v23  ;;  %v8514_v23 = vld [vmem:[%s11043_s2 + $0x240] ss:$12 sps:$4 sm:$0xff]  }
 0x1f6   : > { %1498 = vmatprep.subr.bf16.mxu0 %v8491_v26  ;;  %v8521_v26 = vld [vmem:[%s11043_s2 + $0x230] ss:$12 sps:$4 sm:$0xff]  }
 0x1f7   : > { %8091 = vmatpush3.bf16.msra.mxu1 %v9241_v7 }
 0x1f8   : > { %8092 = vmatprep.subr.bf16.mxu1 %v9246_v8 }
 0x1f9   : > { %1499 = vmatpush1.bf16.msra.mxu0 %v8489_v28  ;;  %v8522_v28 = vld [vmem:[%s11043_s2 + $0x210] ss:$12 sps:$4 sm:$0xff]  }
 0x1fa   : > { %1500 = vmatprep.subr.bf16.mxu0 %v8495_v29  ;;  %v8525_v29 = vld [vmem:[%s11043_s2 + $0x218] ss:$12 sps:$4 sm:$0xff]  }
 0x1fb   : > { %8093 = vmatpush3.bf16.msra.mxu1 %v9246_v8 }
 0x1fc   : > { %8094 = vmatprep.subr.bf16.mxu1 %v9251_v9 }
 0x1fd   : > { %1501 = vmatpush1.bf16.msra.mxu0 %v8493_v30 }
 0x1fe   : > { %1502 = vmatprep.subr.bf16.mxu0 %v8499_v32 }
 0x1ff   : > { %8095 = vmatpush3.bf16.msra.mxu1 %v9251_v9 }
 0x200   : > { %8373 = vmatprep.subr.msk.bf16.mxu1 %vm421_vm1, %v8480_v18  ;;  %v8510_v18 = vld [vmem:[%s11043_s2 + $0x258] ss:$12 sps:$4 sm:$0xff]  }
 0x201   : > { %1503 = vmatpush1.bf16.msra.mxu0 %v8497_v33 }
 0x202   : > { %8097 = vmatmul.mubr.msk.bf16.vlgmr.msra.gmra.mxu1 %vm414_vm0, %v8477_v13  ;;  %8374 = vmatprep.subr.msk.bf16.mxu0 %vm421_vm1, %v9216_v1  ;;  %v8505_v13 = vld [vmem:[%s11043_s2 + $0x290] ss:$0 sps:$4 sm:$0x33]  }
 0x203   : > { %8101 = vmatpush3.bf16.msra.mxu1 %v1486_v19  ;;  %v1788_v14 = vsel %vm421_vm1, %v8505_v13, 0  ;;  %v8512_v19 = vld [vmem:[%s11043_s2 + $0x25c] ss:$12 sps:$4 sm:$0xff]  }
 0x204   : > { %8102 = vmatprep.subr.bf16.mxu1 %v8484_v22 }
 0x207   : > { %8103 = vmatpush3.bf16.msra.mxu1 %v8484_v22  ;;  %v8517_v22 = vld [vmem:[%s11043_s2 + $0x248] ss:$12 sps:$4 sm:$0xff]  }
 0x208   : > { %8104 = vmatprep.subr.bf16.mxu1 %v8488_v25 }
 0x20b   : > { %8105 = vmatpush3.bf16.msra.mxu1 %v8488_v25  ;;  %v8518_v25 = vld [vmem:[%s11043_s2 + $0x228] ss:$12 sps:$4 sm:$0xff]  }
 0x20c   : > { %8106 = vmatprep.subr.bf16.mxu1 %v8492_v27 }
 0x20f   : > { %8107 = vmatpush3.bf16.msra.mxu1 %v8492_v27  ;;  %v8524_v27 = vld [vmem:[%s11043_s2 + $0x214] ss:$12 sps:$4 sm:$0xff]  }
 0x210   : > { %8108 = vmatprep.subr.bf16.mxu1 %v8496_v31 }
 0x213   : > { %8109 = vmatpush3.bf16.msra.mxu1 %v8496_v31 }
 0x214   : > { %8110 = vmatprep.subr.bf16.mxu1 %v8500_v35 }
 0x217   : > { %8111 = vmatpush3.bf16.msra.mxu1 %v8500_v35 }
 0x218   : > { %6848 = vmatprep.subr.msk.bf16.mxu1 %vm421_vm1, %v6846_v10  ;;  %v8530_v10 = vld [vmem:[%s11043_s2 + $0x314] ss:$0 sps:$4 sm:$0x33]  }
 0x219   : > { %v2090_v11 = vsel %vm421_vm1, %v8530_v10, 0 }
 0x2aa   : > { %v1220_v37 = vpop.f32.mrf.mxu1 }
 0x2ab   : > { %v9421_v38 = vadd.f32 %v1220_v37, %v9320_v46  ;;  %v8082_v40 = vpop.f32.mrf.mxu0 }
 0x2ac   : > { %v9424_v41 = vadd.f32 %v8082_v40, %v9322_v48  ;;  %v1222_v42 = vpop.f32.mrf.mxu1 }
 0x2ad   : > { %v9427_v43 = vadd.f32 %v1222_v42, %v9324_v50  ;;  %v1271_v45 = vpop.f32.mrf.mxu0 }
 0x2ae   : > { %v9430_v47 = vadd.f32 %v1271_v45, %v9326_v52  ;;  %v1224_v49 = vpop.f32.mrf.mxu1 }
 0x2af   : > { %v9433_v51 = vadd.f32 %v1224_v49, %v9328_v54  ;;  %v8083_v53 = vpop.f32.mrf.mxu0 }
 0x2b0   : > { %v9435_v55 = vpop.f32.mrf.mxu1 }
 0x2b1   : > { %v9525_v30 = vpop.f32.mrf.mxu0 }
 0x2b2   : > { %v1230_v46 = vpop.f32.mrf.mxu1 }
 0x2b3   : > { %v9438_v57 = vadd.f32 %v1230_v46, %v9332_v58  ;;  %v8501_v58 = vld [vmem:[%s11042_s1 + $0x30] sm:$0xff]  }
 0x2b4   : > { %v1232_v48 = vpop.f32.mrf.mxu1 }
 0x2b5   : > { %v9441_v59 = vadd.f32 %v1232_v48, %v9334_v60  ;;  %v8502_v60 = vld [vmem:[%s11042_s1 + $0x38] ss:$0 sps:$4 sm:$0x33]  }
 0x2b6   : > { %v1234_v50 = vpop.f32.mrf.mxu1 }
 0x2b8   : > { %v1235_v61 = vpop.f32.mrf.mxu1 }
 0x2c2   : > { %v8098_v62 = vpop.f32.mrf.mxu1 }
 0x2c3   : > { %v1361_v54 = vpack.c.bf16 %v8098_v62, %v8098_v62 }
 0x2c4   : > { %v1346_v52 = vpop.f32.mrf.mxu1 }
 0x2c6   : > { %v8099_v63 = vpop.f32.mrf.mxu1 }
 0x2c8   : > { %v1349_v0 = vpop.f32.mrf.mxu1 }
 0x2c9   : > { %v1360_v2 = vpack.c.bf16 %v1349_v0, %v1346_v52 }
 0x2cb   : > { %6797 = vmatmul.mubr.msk.bf16.vlgmr.msra.gmra.mxu0 %vm414_vm0, %v1360_v2  ;;  %8112 = vmatprep.mubr.msk.bf16.mxu1 %vm414_vm0, %v1360_v2 }
 0x2cc   : > { %8117 = vmatpush3.bf16.msra.mxu0 %v9080_v4  ;;  %8113 = vmatmul.mubr.msk.bf16.vlgmr.msra.gmra.mxu1 %vm414_vm0, %v1361_v54 }
 0x2cd   : > { %8118 = vmatprep.subr.bf16.mxu0 %v9224_v3  ;;  %1530 = vmatprep.mubr.bf16.mxu0 %v8993_v34 }
 0x2ce   : > { %1822 = vmatprep.mubr.bf16.mxu1 %v8993_v34  ;;  %1795 = vmatpush1.bf16.msra.mxu1 %v1782_v12  ;;  %v8533_v12 = vld [vmem:[%s11043_s2 + $0x2f8] ss:$12 sps:$4 sm:$0xff]  }
 0x2cf   : > { %1796 = vmatprep.subr.bf16.mxu1 %v8508_v15  ;;  %v8535_v15 = vld [vmem:[%s11043_s2 + $0x2dc] ss:$12 sps:$4 sm:$0xff]  }
 0x2d0   : > { %8119 = vmatpush3.bf16.msra.mxu0 %v9224_v3 }
 0x2d1   : > { %8120 = vmatprep.subr.bf16.mxu0 %v9234_v6 }
 0x2d2   : > { %1797 = vmatpush1.bf16.msra.mxu1 %v8506_v16  ;;  %v8537_v16 = vld [vmem:[%s11043_s2 + $0x2e0] ss:$12 sps:$4 sm:$0xff]  }
 0x2d3   : > { %6798 = vmatmul.mubr.msk.bf16.gmra.mxu0 %vm414_vm0, %v1361_v54  ;;  %1798 = vmatprep.subr.bf16.mxu1 %v8512_v19  ;;  %v6880_v54 = vld [vmem:[%s11043_s2 + $0x30c] sm:$0x33] }
 0x2d4   : > { %8121 = vmatpush3.bf16.msra.mxu0 %v9234_v6  ;;  %8128 = vmatprep.mubr.msk.bf16.mxu0 %vm414_vm0, %v8501_v58  ;;  %v6898_v58 = vcombine.high %v6880_v54, %v6880_v54  ;;  %v8542_v19 = vld [vmem:[%s11043_s2 + $0x2cc] ss:$12 sps:$4 sm:$0xff]  }
 0x2d5   : > { %8122 = vmatprep.subr.bf16.mxu0 %v9241_v7 }
 0x2d6   : > { %1799 = vmatpush1.bf16.msra.mxu1 %v8510_v18  ;;  %v8541_v18 = vld [vmem:[%s11043_s2 + $0x2c8] ss:$12 sps:$4 sm:$0xff]  }
 0x2d7   : > { %1800 = vmatprep.subr.bf16.mxu1 %v8516_v21  ;;  %v8545_v21 = vld [vmem:[%s11043_s2 + $0x2b0] ss:$12 sps:$4 sm:$0xff]  }
 0x2d8   : > { %8123 = vmatpush3.bf16.msra.mxu0 %v9241_v7 }
 0x2d9   : > { %8124 = vmatprep.subr.bf16.mxu0 %v9246_v8 }
 0x2da   : > { %1801 = vmatpush1.bf16.msra.mxu1 %v8514_v23  ;;  %v8546_v23 = vld [vmem:[%s11043_s2 + $0x2b4] ss:$12 sps:$4 sm:$0xff]  }
 0x2db   : > { %1802 = vmatprep.subr.bf16.mxu1 %v8520_v24  ;;  %v8549_v24 = vld [vmem:[%s11043_s2 + $0x298] ss:$12 sps:$4 sm:$0xff]  }
 0x2dc   : > { %8125 = vmatpush3.bf16.msra.mxu0 %v9246_v8 }
 0x2dd   : > { %8126 = vmatprep.subr.bf16.mxu0 %v9251_v9 }
 0x2de   : > { %1803 = vmatpush1.bf16.msra.mxu1 %v8518_v25  ;;  %v8547_v25 = vld [vmem:[%s11043_s2 + $0x294] ss:$12 sps:$4 sm:$0xff]  }
 0x2df   : > { %1804 = vmatprep.subr.bf16.mxu1 %v8524_v27 }
 0x2e0   : > { %8127 = vmatpush3.bf16.msra.mxu0 %v9251_v9 }
 0x2e1   : > { %8375 = vmatprep.subr.msk.bf16.mxu0 %vm421_vm1, %v8505_v13  ;;  %v8531_v13 = vld [vmem:[%s11043_s2 + $0x2f4] ss:$12 sps:$4 sm:$0xff]  }
 0x2e2   : > { %1805 = vmatpush1.bf16.msra.mxu1 %v8522_v28 }
 0x2e3   : > { %8129 = vmatmul.mubr.msk.bf16.vlgmr.msra.gmra.mxu0 %vm414_vm0, %v8502_v60  ;;  %8376 = vmatprep.subr.msk.bf16.mxu1 %vm421_vm1, %v9216_v1  ;;  %v6897_v60 = vcombine.low %v6880_v54, %v6880_v54 }
 0x2e4   : > { %8133 = vmatpush3.bf16.msra.mxu0 %v1788_v14  ;;  %v8534_v14 = vld [vmem:[%s11043_s2 + $0x2fc] ss:$12 sps:$4 sm:$0xff]  }
 0x2e5   : > { %8134 = vmatprep.subr.bf16.mxu0 %v8509_v17  ;;  %v2084_v5 = vsel %vm421_vm1, %v6897_v60, 0 }
 0x2e8   : > { %8135 = vmatpush3.bf16.msra.mxu0 %v8509_v17  ;;  %v8538_v17 = vld [vmem:[%s11043_s2 + $0x2e4] ss:$12 sps:$4 sm:$0xff]  }
 0x2e9   : > { %8136 = vmatprep.subr.bf16.mxu0 %v8513_v20 }
 0x2ec   : > { %8137 = vmatpush3.bf16.msra.mxu0 %v8513_v20  ;;  %v8539_v20 = vld [vmem:[%s11043_s2 + $0x2c4] ss:$12 sps:$4 sm:$0xff]  }
 0x2ed   : > { %8138 = vmatprep.subr.bf16.mxu0 %v8517_v22 }
 0x2f0   : > { %8139 = vmatpush3.bf16.msra.mxu0 %v8517_v22  ;;  %v8543_v22 = vld [vmem:[%s11043_s2 + $0x2ac] ss:$12 sps:$4 sm:$0xff]  }
 0x2f1   : > { %8140 = vmatprep.subr.bf16.mxu0 %v8521_v26 }
 0x2f4   : > { %8141 = vmatpush3.bf16.msra.mxu0 %v8521_v26  ;;  %v8550_v26 = vld [vmem:[%s11043_s2 + $0x29c] ss:$12 sps:$4 sm:$0xff]  }
 0x2f5   : > { %8142 = vmatprep.subr.bf16.mxu0 %v8525_v29 }
 0x2f8   : > { %8143 = vmatpush3.bf16.msra.mxu0 %v8525_v29  ;;  %v934_v29 = vadd.f32 %v9330_v56, %v9316_v39 }
 0x2f9   : > { %6900 = vmatprep.subr.msk.bf16.mxu0 %vm421_vm1, %v6898_v58 }
 0x38b   : > { %v1522_v31 = vpop.f32.mrf.mxu0 }
 0x38c   : > { %v9528_v32 = vadd.f32 %v1522_v31, %v9421_v38  ;;  %v8114_v33 = vpop.f32.mrf.mxu1 }
 0x38d   : > { %v9531_v35 = vadd.f32 %v8114_v33, %v9424_v41  ;;  %v1524_v37 = vpop.f32.mrf.mxu0 }
 0x38e   : > { %v9534_v40 = vadd.f32 %v1524_v37, %v9427_v43  ;;  %v1573_v42 = vpop.f32.mrf.mxu1 }
 0x38f   : > { %v9537_v45 = vadd.f32 %v1573_v42, %v9430_v47  ;;  %v1526_v49 = vpop.f32.mrf.mxu0 }
 0x390   : > { %v9540_v53 = vadd.f32 %v1526_v49, %v9433_v51  ;;  %v8115_v46 = vpop.f32.mrf.mxu1  ;;  %v1289_v49 = vadd.f32 %v9435_v55, %v934_v29 }
 0x391   : > { %v9542_v48 = vpop.f32.mrf.mxu0 }
 0x392   : > { %v9632_v27 = vpop.f32.mrf.mxu1  ;;  %v1591_v39 = vadd.f32 %v9542_v48, %v1289_v49 }
 0x393   : > { %v1532_v38 = vpop.f32.mrf.mxu0 }
 0x394   : > { %v9545_v50 = vadd.f32 %v1532_v38, %v9438_v57  ;;  %v8526_v57 = vld [vmem:[%s11042_s1 + $0x3c] sm:$0xff]  }
 0x395   : > { %v1534_v41 = vpop.f32.mrf.mxu0 }
 0x396   : > { %v9548_v61 = vadd.f32 %v1534_v41, %v9441_v59  ;;  %v8527_v59 = vld [vmem:[%s11042_s1 + $0x44] ss:$0 sps:$4 sm:$0x33]  }
 0x397   : > { %v1536_v43 = vpop.f32.mrf.mxu0 }
 0x399   : > { %v1537_v62 = vpop.f32.mrf.mxu0 }
 0x3a3   : > { %v8130_v52 = vpop.f32.mrf.mxu0 }
 0x3a4   : > { %v1663_v51 = vpack.c.bf16 %v8130_v52, %v8130_v52 }
 0x3a5   : > { %v1648_v47 = vpop.f32.mrf.mxu0 }
 0x3a7   : > { %v8131_v63 = vpop.f32.mrf.mxu0 }
 0x3a9   : > { %v1651_v0 = vpop.f32.mrf.mxu0 }
 0x3aa   : > { %v1662_v2 = vpack.c.bf16 %v1651_v0, %v1648_v47 }
 0x3ac   : > { %6849 = vmatmul.mubr.msk.bf16.vlgmr.msra.gmra.mxu1 %vm414_vm0, %v1662_v2  ;;  %8144 = vmatprep.mubr.msk.bf16.mxu0 %vm414_vm0, %v1662_v2 }
 0x3ad   : > { %8149 = vmatpush3.bf16.msra.mxu1 %v9080_v4  ;;  %8145 = vmatmul.mubr.msk.bf16.vlgmr.msra.gmra.mxu0 %vm414_vm0, %v1663_v51 }
 0x3ae   : > { %8150 = vmatprep.subr.bf16.mxu1 %v9224_v3  ;;  %1832 = vmatprep.mubr.bf16.mxu1 %v8993_v34 }
 0x3af   : > { %2124 = vmatprep.mubr.bf16.mxu0 %v8993_v34  ;;  %2097 = vmatpush1.bf16.msra.mxu0 %v2084_v5  ;;  %v8555_v5 = vld [vmem:[%s11043_s2 + $0x398] ss:$0 sps:$4 sm:$0x33]  }
 0x3b0   : > { %2098 = vmatprep.subr.bf16.mxu0 %v8533_v12  ;;  %v8556_v12 = vld [vmem:[%s11043_s2 + $0x378] ss:$12 sps:$4 sm:$0xff]  }
 0x3b1   : > { %8151 = vmatpush3.bf16.msra.mxu1 %v9224_v3 }
 0x3b2   : > { %8152 = vmatprep.subr.bf16.mxu1 %v9234_v6 }
 0x3b3   : > { %2099 = vmatpush1.bf16.msra.mxu0 %v8531_v13  ;;  %v8559_v13 = vld [vmem:[%s11043_s2 + $0x380] ss:$12 sps:$4 sm:$0xff]  }
 0x3b4   : > { %6850 = vmatmul.mubr.msk.bf16.gmra.mxu1 %vm414_vm0, %v1663_v51  ;;  %2100 = vmatprep.subr.bf16.mxu0 %v8537_v16  ;;  %v8563_v16 = vld [vmem:[%s11043_s2 + $0x368] ss:$12 sps:$4 sm:$0xff]  }
 0x3b5   : > { %8153 = vmatpush3.bf16.msra.mxu1 %v9234_v6  ;;  %8160 = vmatprep.mubr.msk.bf16.mxu1 %vm414_vm0, %v8526_v57 }
 0x3b6   : > { %8154 = vmatprep.subr.bf16.mxu1 %v9241_v7 }
 0x3b7   : > { %2101 = vmatpush1.bf16.msra.mxu0 %v8535_v15  ;;  %v8562_v15 = vld [vmem:[%s11043_s2 + $0x364] ss:$12 sps:$4 sm:$0xff]  }
 0x3b8   : > { %2102 = vmatprep.subr.bf16.mxu0 %v8541_v18  ;;  %v8567_v18 = vld [vmem:[%s11043_s2 + $0x350] ss:$12 sps:$4 sm:$0xff]  }
 0x3b9   : > { %8155 = vmatpush3.bf16.msra.mxu1 %v9241_v7 }
 0x3ba   : > { %8156 = vmatprep.subr.bf16.mxu1 %v9246_v8 }
 0x3bb   : > { %2103 = vmatpush1.bf16.msra.mxu0 %v8539_v20  ;;  %v8570_v20 = vld [vmem:[%s11043_s2 + $0x334] ss:$12 sps:$4 sm:$0xff]  }
 0x3bc   : > { %2104 = vmatprep.subr.bf16.mxu0 %v8545_v21  ;;  %v8568_v21 = vld [vmem:[%s11043_s2 + $0x330] ss:$12 sps:$4 sm:$0xff]  }
 0x3bd   : > { %8157 = vmatpush3.bf16.msra.mxu1 %v9246_v8 }
 0x3be   : > { %8158 = vmatprep.subr.bf16.mxu1 %v9251_v9 }
 0x3bf   : > { %2105 = vmatpush1.bf16.msra.mxu0 %v8543_v22  ;;  %v8571_v22 = vld [vmem:[%s11043_s2 + $0x338] ss:$12 sps:$4 sm:$0xff]  }
 0x3c0   : > { %2106 = vmatprep.subr.bf16.mxu0 %v8549_v24  ;;  %v8572_v24 = vld [vmem:[%s11043_s2 + $0x318] ss:$12 sps:$4 sm:$0xff]  }
 0x3c1   : > { %8159 = vmatpush3.bf16.msra.mxu1 %v9251_v9 }
 0x3c2   : > { %8377 = vmatprep.subr.msk.bf16.mxu1 %vm421_vm1, %v8530_v10  ;;  %v2392_v10 = vsel %vm421_vm1, %v8555_v5, 0 }
 0x3c3   : > { %2107 = vmatpush1.bf16.msra.mxu0 %v8547_v25  ;;  %v8575_v25 = vld [vmem:[%s11043_s2 + $0x320] ss:$12 sps:$4 sm:$0xff]  }
 0x3c4   : > { %8161 = vmatmul.mubr.msk.bf16.vlgmr.msra.gmra.mxu1 %vm414_vm0, %v8527_v59  ;;  %8378 = vmatprep.subr.msk.bf16.mxu0 %vm421_vm1, %v9216_v1  ;;  %v6932_v59 = vld [vmem:[%s11043_s2 + $0x390] sm:$0x33] }
 0x3c5   : > { %8165 = vmatpush3.bf16.msra.mxu1 %v2090_v11  ;;  %v6950_v54 = vcombine.high %v6932_v59, %v6932_v59  ;;  %v6949_v58 = vcombine.low %v6932_v59, %v6932_v59  ;;  %v8558_v11 = vld [vmem:[%s11043_s2 + $0x37c] ss:$12 sps:$4 sm:$0xff]  }
 0x3c6   : > { %8166 = vmatprep.subr.bf16.mxu1 %v8534_v14  ;;  %v8587_v59 = vld [vmem:[%s11043_s2 + $0x3e8] ss:$12 sps:$4 sm:$0xff]  }
 0x3c7   : > { %v2386_v60 = vsel %vm421_vm1, %v6949_v58, 0  ;;  %v8591_v58 = vld [vmem:[%s11043_s2 + $0x3d0] ss:$12 sps:$4 sm:$0xff]  }
 0x3c9   : > { %8167 = vmatpush3.bf16.msra.mxu1 %v8534_v14  ;;  %v8560_v14 = vld [vmem:[%s11043_s2 + $0x360] ss:$12 sps:$4 sm:$0xff]  }
 0x3ca   : > { %8168 = vmatprep.subr.bf16.mxu1 %v8538_v17 }
 0x3cd   : > { %8169 = vmatpush3.bf16.msra.mxu1 %v8538_v17  ;;  %v8566_v17 = vld [vmem:[%s11043_s2 + $0x34c] ss:$12 sps:$4 sm:$0xff]  }
 0x3ce   : > { %8170 = vmatprep.subr.bf16.mxu1 %v8542_v19 }
 0x3d1   : > { %8171 = vmatpush3.bf16.msra.mxu1 %v8542_v19  ;;  %v8564_v19 = vld [vmem:[%s11043_s2 + $0x348] ss:$12 sps:$4 sm:$0xff]  }
 0x3d2   : > { %8172 = vmatprep.subr.bf16.mxu1 %v8546_v23 }
 0x3d5   : > { %8173 = vmatpush3.bf16.msra.mxu1 %v8546_v23  ;;  %v8574_v23 = vld [vmem:[%s11043_s2 + $0x31c] ss:$12 sps:$4 sm:$0xff]  }
 0x3d6   : > { %8174 = vmatprep.subr.bf16.mxu1 %v8550_v26 }
 0x3d9   : > { %8175 = vmatpush3.bf16.msra.mxu1 %v8550_v26 }
 0x3da   : > { %6952 = vmatprep.subr.msk.bf16.mxu1 %vm421_vm1, %v6950_v54  ;;  %v8588_v54 = vld [vmem:[%s11043_s2 + $0x3ec] ss:$12 sps:$4 sm:$0xff]  }
 0x46c   : > { %v1824_v28 = vpop.f32.mrf.mxu1 }
 0x46d   : > { %v9637_v31 = vadd.f32 %v1824_v28, %v9528_v32  ;;  %v8146_v33 = vpop.f32.mrf.mxu0 }
 0x46e   : > { %v9640_v37 = vadd.f32 %v8146_v33, %v9531_v35  ;;  %v1826_v42 = vpop.f32.mrf.mxu1 }
 0x46f   : > { %v9644_v46 = vadd.f32 %v1826_v42, %v9534_v40  ;;  %v1875_v38 = vpop.f32.mrf.mxu0 }
 0x470   : > { %v9647_v41 = vadd.f32 %v1875_v38, %v9537_v45  ;;  %v1828_v43 = vpop.f32.mrf.mxu1 }
 0x471   : > { %v9651_v56 = vadd.f32 %v1828_v43, %v9540_v53  ;;  %v8147_v32 = vpop.f32.mrf.mxu0 }
 0x472   : > { %v1830_v62 = vpop.f32.mrf.mxu1 }
 0x473   : > { %v9653_v35 = vadd.f32 %v1830_v62, %v1591_v39  ;;  %v9743_v26 = vpop.f32.mrf.mxu0 }
 0x474   : > { %v1834_v52 = vpop.f32.mrf.mxu1 }
 0x475   : > { %v9656_v55 = vadd.f32 %v1834_v52, %v9545_v50  ;;  %v8551_v50 = vld [vmem:[%s11042_s1 + $0x48] sm:$0xff]  }
 0x476   : > { %v1836_v40 = vpop.f32.mrf.mxu1 }
 0x477   : > { %v9659_v47 = vadd.f32 %v1836_v40, %v9548_v61  ;;  %v8552_v61 = vld [vmem:[%s11042_s1 + $0x50] ss:$0 sps:$4 sm:$0x33]  }
 0x478   : > { %v1838_v45 = vpop.f32.mrf.mxu1 }
 0x47a   : > { %v1839_v63 = vpop.f32.mrf.mxu1 }
 0x484   : > { %v8162_v0 = vpop.f32.mrf.mxu1 }
 0x485   : > { %v1965_v57 = vpack.c.bf16 %v8162_v0, %v8162_v0 }
 0x486   : > { %v1950_v2 = vpop.f32.mrf.mxu1 }
 0x488   : > { %v8163_v48 = vpop.f32.mrf.mxu1 }
 0x48a   : > { %v1953_v51 = vpop.f32.mrf.mxu1 }
 0x48b   : > { %v1964_v53 = vpack.c.bf16 %v1953_v51, %v1950_v2 }
 0x48d   : > { %6901 = vmatmul.mubr.msk.bf16.vlgmr.msra.gmra.mxu0 %vm414_vm0, %v1964_v53  ;;  %8176 = vmatprep.mubr.msk.bf16.mxu1 %vm414_vm0, %v1964_v53  ;;  %v8583_v53 = vld [vmem:[%s11043_s2 + $0x400] ss:$12 sps:$4 sm:$0xff]  }
 0x48e   : > { %8181 = vmatpush3.bf16.msra.mxu0 %v9080_v4  ;;  %8177 = vmatmul.mubr.msk.bf16.vlgmr.msra.gmra.mxu1 %vm414_vm0, %v1965_v57 }
 0x48f   : > { %8182 = vmatprep.subr.bf16.mxu0 %v9224_v3  ;;  %2134 = vmatprep.mubr.bf16.mxu0 %v8993_v34 }
 0x490   : > { %2426 = vmatprep.mubr.bf16.mxu1 %v8993_v34  ;;  %2399 = vmatpush1.bf16.msra.mxu1 %v2386_v60  ;;  %v8592_v60 = vld [vmem:[%s11043_s2 + $0x3d4] ss:$12 sps:$4 sm:$0xff]  }
 0x491   : > { %2400 = vmatprep.subr.bf16.mxu1 %v8558_v11  ;;  %v8593_v11 = vld [vmem:[%s11043_s2 + $0x3b4] ss:$12 sps:$4 sm:$0xff]  }
 0x492   : > { %8183 = vmatpush3.bf16.msra.mxu0 %v9224_v3 }
 0x493   : > { %8184 = vmatprep.subr.bf16.mxu0 %v9234_v6 }
 0x494   : > { %2401 = vmatpush1.bf16.msra.mxu1 %v8556_v12  ;;  %v8596_v12 = vld [vmem:[%s11043_s2 + $0x3bc] ss:$12 sps:$4 sm:$0xff]  }
 0x495   : > { %6902 = vmatmul.mubr.msk.bf16.gmra.mxu0 %vm414_vm0, %v1965_v57  ;;  %2402 = vmatprep.subr.bf16.mxu1 %v8562_v15  ;;  %v8581_v57 = vld [vmem:[%s11043_s2 + $0x3fc] ss:$12 sps:$4 sm:$0xff]   ;;  %v8600_v15 = vld [vmem:[%s11043_s2 + $0x3a4] ss:$12 sps:$4 sm:$0xff]  }
 0x496   : > { %8185 = vmatpush3.bf16.msra.mxu0 %v9234_v6  ;;  %8192 = vmatprep.mubr.msk.bf16.mxu0 %vm414_vm0, %v8551_v50  ;;  %v8584_v50 = vld [vmem:[%s11043_s2 + $0x404] ss:$12 sps:$4 sm:$0xff]  }
 0x497   : > { %8186 = vmatprep.subr.bf16.mxu0 %v9241_v7 }
 0x498   : > { %2403 = vmatpush1.bf16.msra.mxu1 %v8560_v14  ;;  %v8597_v14 = vld [vmem:[%s11043_s2 + $0x39c] ss:$12 sps:$4 sm:$0xff]  }
 0x499   : > { %2404 = vmatprep.subr.bf16.mxu1 %v8566_v17 }
 0x49a   : > { %8187 = vmatpush3.bf16.msra.mxu0 %v9241_v7 }
 0x49b   : > { %8188 = vmatprep.subr.bf16.mxu0 %v9246_v8 }
 0x49c   : > { %2405 = vmatpush1.bf16.msra.mxu1 %v8564_v19 }
 0x49d   : > { %2406 = vmatprep.subr.bf16.mxu1 %v8570_v20 }
 0x49e   : > { %8189 = vmatpush3.bf16.msra.mxu0 %v9246_v8 }
 0x49f   : > { %8190 = vmatprep.subr.bf16.mxu0 %v9251_v9 }
 0x4a0   : > { %2407 = vmatpush1.bf16.msra.mxu1 %v8568_v21 }
 0x4a1   : > { %2408 = vmatprep.subr.bf16.mxu1 %v8574_v23 }
 0x4a2   : > { %8191 = vmatpush3.bf16.msra.mxu0 %v9251_v9 }
 0x4a3   : > { %8379 = vmatprep.subr.msk.bf16.mxu0 %vm421_vm1, %v8555_v5  ;;  %v8589_v5 = vld [vmem:[%s11043_s2 + $0x3cc] ss:$12 sps:$4 sm:$0xff]  }
 0x4a4   : > { %2409 = vmatpush1.bf16.msra.mxu1 %v8572_v24 }
 0x4a5   : > { %8193 = vmatmul.mubr.msk.bf16.vlgmr.msra.gmra.mxu0 %vm414_vm0, %v8552_v61  ;;  %8380 = vmatprep.subr.msk.bf16.mxu1 %vm421_vm1, %v9216_v1  ;;  %v8585_v61 = vld [vmem:[%s11043_s2 + $0x3e4] ss:$12 sps:$4 sm:$0xff]  }
 0x4a6   : > { %8197 = vmatpush3.bf16.msra.mxu0 %v2392_v10  ;;  %v8595_v10 = vld [vmem:[%s11043_s2 + $0x3b8] ss:$12 sps:$4 sm:$0xff]  }
 0x4a7   : > { %8198 = vmatprep.subr.bf16.mxu0 %v8559_v13 }
 0x4aa   : > { %8199 = vmatpush3.bf16.msra.mxu0 %v8559_v13  ;;  %v8599_v13 = vld [vmem:[%s11043_s2 + $0x3a0] ss:$12 sps:$4 sm:$0xff]  }
 0x4ab   : > { %8200 = vmatprep.subr.bf16.mxu0 %v8563_v16 }
 0x4ae   : > { %8201 = vmatpush3.bf16.msra.mxu0 %v8563_v16 }
 0x4af   : > { %8202 = vmatprep.subr.bf16.mxu0 %v8567_v18 }
 0x4b2   : > { %8203 = vmatpush3.bf16.msra.mxu0 %v8567_v18 }
 0x4b3   : > { %8204 = vmatprep.subr.bf16.mxu0 %v8571_v22 }
 0x4b6   : > { %8205 = vmatpush3.bf16.msra.mxu0 %v8571_v22 }
 0x4b7   : > { %8206 = vmatprep.subr.bf16.mxu0 %v8575_v25 }
 0x4ba   : > { %8207 = vmatpush3.bf16.msra.mxu0 %v8575_v25 }
 0x54d   : > { %v2126_v28 = vpop.f32.mrf.mxu0 }
 0x54e   : > { %v9746_v29 = vadd.f32 %v2126_v28, %v9637_v31  ;;  %v8178_v33 = vpop.f32.mrf.mxu1 }
 0x54f   : > { %v9749_v42 = vadd.f32 %v8178_v33, %v9640_v37  ;;  %v2128_v49 = vpop.f32.mrf.mxu0 }
 0x550   : > { %v9752_v38 = vadd.f32 %v2128_v49, %v9644_v46  ;;  %v2177_v43 = vpop.f32.mrf.mxu1 }
 0x551   : > { %v9755_v39 = vadd.f32 %v2177_v43, %v9647_v41  ;;  %v2130_v1 = vpop.f32.mrf.mxu0 }
 0x552   : > { %v9758_v32 = vadd.f32 %v2130_v1, %v9651_v56  ;;  %v8179_v62 = vpop.f32.mrf.mxu1 }
 0x553   : > { %v9760_v52 = vpop.f32.mrf.mxu0 }
 0x554   : > { %v2180_v16 = vpop.f32.mrf.mxu1  ;;  %v2195_v28 = vadd.f32 %v9760_v52, %v9653_v35  ;;  %v2806_v35 = vlaneseq  ;;  %v982_v52 = vadd.f32 %v9418_v36, %v9318_v44 }
 0x555   : > { %v2136_v31 = vpop.f32.mrf.mxu0 }
 0x556   : > { %v9763_v40 = vadd.f32 %v2136_v31, %v9656_v55  ;;  %v8576_v55 = vld [vmem:[%s11042_s1 + $0x54] sm:$0xff]  }
 0x557   : > { %v2138_v37 = vpop.f32.mrf.mxu0 }
 0x558   : > { %v9766_v45 = vadd.f32 %v2138_v37, %v9659_v47 }
 0x559   : > { %v2140_v46 = vpop.f32.mrf.mxu0 }
 0x55b   : > { %v2141_v63 = vpop.f32.mrf.mxu0 }
 0x565   : > { %v8194_v0 = vpop.f32.mrf.mxu0 }
 0x566   : > { %v2267_v56 = vpack.c.bf16 %v8194_v0, %v8194_v0 }
 0x567   : > { %v2252_v41 = vpop.f32.mrf.mxu0 }
 0x569   : > { %v8195_v2 = vpop.f32.mrf.mxu0 }
 0x56b   : > { %v2255_v48 = vpop.f32.mrf.mxu0 }
 0x56c   : > { %v2266_v51 = vpack.c.bf16 %v2255_v48, %v2252_v41 }
 0x56e   : > { %6953 = vmatmul.mubr.msk.bf16.vlgmr.msra.gmra.mxu1 %vm414_vm0, %v2266_v51  ;;  %8208 = vmatprep.mubr.msk.bf16.mxu0 %vm414_vm0, %v2266_v51  ;;  %v2804_v51 = vld [vmem:[%s11044_s3] sm:$0x7] }
 0x56f   : > { %8213 = vmatpush3.bf16.msra.mxu1 %v9080_v4  ;;  %8209 = vmatmul.mubr.msk.bf16.vlgmr.msra.gmra.mxu0 %vm414_vm0, %v2267_v56  ;;  %v8577_v4 = vld [vmem:[%s11042_s1 + $0x5c] ss:$0 sps:$4 sm:$0x33]  }
 0x570   : > { %8214 = vmatprep.subr.bf16.mxu1 %v9224_v3  ;;  %2436 = vmatprep.mubr.bf16.mxu1 %v8993_v34 }
 0x571   : > { %2728 = vmatprep.mubr.bf16.mxu0 %v8993_v34 }
 0x573   : > { %8215 = vmatpush3.bf16.msra.mxu1 %v9224_v3  ;;  %v6984_v3 = vld [vmem:[%s11043_s2 + $0x414] sm:$0x33] }
 0x574   : > { %8216 = vmatprep.subr.bf16.mxu1 %v9234_v6 }
 0x576   : > { %6954 = vmatmul.mubr.msk.bf16.gmra.mxu1 %vm414_vm0, %v2267_v56 }
 0x577   : > { %8217 = vmatpush3.bf16.msra.mxu1 %v9234_v6  ;;  %8224 = vmatprep.mubr.msk.bf16.mxu1 %vm414_vm0, %v8576_v55  ;;  %v7002_v6 = vcombine.high %v6984_v3, %v6984_v3 }
 0x578   : > { %8218 = vmatprep.subr.bf16.mxu1 %v9241_v7 }
 0x579   : > { %7004 = vmatprep.subr.msk.bf16.mxu0 %vm421_vm1, %v7002_v6 }
 0x57b   : > { %8219 = vmatpush3.bf16.msra.mxu1 %v9241_v7  ;;  %v7001_v7 = vcombine.low %v6984_v3, %v6984_v3 }
 0x57c   : > { %8220 = vmatprep.subr.bf16.mxu1 %v9246_v8 }
 0x57d   : > { %v2688_v47 = vsel %vm421_vm1, %v7001_v7, 0 }
 0x57e   : > { %2701 = vmatpush1.bf16.msra.mxu0 %v2688_v47 }
 0x57f   : > { %8221 = vmatpush3.bf16.msra.mxu1 %v9246_v8  ;;  %v8580_v8 = vld [vmem:[%s11043_s2 + $0x41c] ss:$0 sps:$4 sm:$0x33]   ;;  %2702 = vmatprep.subr.bf16.mxu0 %v8583_v53 }
 0x580   : > { %8222 = vmatprep.subr.bf16.mxu1 %v9251_v9 }
 0x582   : > { %2703 = vmatpush1.bf16.msra.mxu0 %v8581_v57 }
 0x583   : > { %8223 = vmatpush3.bf16.msra.mxu1 %v9251_v9  ;;  %v2694_v9 = vsel %vm421_vm1, %v8580_v8, 0  ;;  %2704 = vmatprep.subr.bf16.mxu0 %v8587_v59 }
 0x584   : > { %8381 = vmatprep.subr.msk.bf16.mxu1 %vm421_vm1, %v8580_v8 }
 0x586   : > { %8225 = vmatmul.mubr.msk.bf16.vlgmr.msra.gmra.mxu1 %vm414_vm0, %v8577_v4  ;;  %2705 = vmatpush1.bf16.msra.mxu0 %v8585_v61 }
 0x587   : > { %8229 = vmatpush3.bf16.msra.mxu1 %v2694_v9  ;;  %2706 = vmatprep.subr.bf16.mxu0 %v8591_v58 }
 0x588   : > { %8230 = vmatprep.subr.bf16.mxu1 %v8584_v50 }
 0x58a   : > { %2707 = vmatpush1.bf16.msra.mxu0 %v8589_v5 }
 0x58b   : > { %8231 = vmatpush3.bf16.msra.mxu1 %v8584_v50  ;;  %2708 = vmatprep.subr.bf16.mxu0 %v8595_v10 }
 0x58c   : > { %8232 = vmatprep.subr.bf16.mxu1 %v8588_v54 }
 0x58e   : > { %2709 = vmatpush1.bf16.msra.mxu0 %v8593_v11 }
 0x58f   : > { %8233 = vmatpush3.bf16.msra.mxu1 %v8588_v54  ;;  %2710 = vmatprep.subr.bf16.mxu0 %v8599_v13 }
 0x590   : > { %8234 = vmatprep.subr.bf16.mxu1 %v8592_v60 }
 0x592   : > { %2711 = vmatpush1.bf16.msra.mxu0 %v8597_v14 }
 0x593   : > { %8235 = vmatpush3.bf16.msra.mxu1 %v8592_v60 }
 0x594   : > { %8236 = vmatprep.subr.bf16.mxu1 %v8596_v12 }
 0x597   : > { %8237 = vmatpush3.bf16.msra.mxu1 %v8596_v12 }
 0x598   : > { %8238 = vmatprep.subr.bf16.mxu1 %v8600_v15 }
 0x59b   : > { %8239 = vmatpush3.bf16.msra.mxu1 %v8600_v15 }
 0x62e   : > { %v2428_v17 = vpop.f32.mrf.mxu1 }
 0x62f   : > { %v2493_v18 = vadd.f32 %v2428_v17, %v9746_v29  ;;  %v8210_v19 = vpop.f32.mrf.mxu0 }
 0x630   : > { %v9850_v20 = vadd.f32 %v8210_v19, %v9749_v42  ;;  %v2430_v21 = vpop.f32.mrf.mxu1 }
 0x631   : > { %v2494_v22 = vadd.f32 %v2430_v21, %v9752_v38  ;;  %v2479_v23 = vpop.f32.mrf.mxu0 }
 0x632   : > { %v2495_v24 = vadd.f32 %v2479_v23, %v9755_v39  ;;  %v2432_v25 = vpop.f32.mrf.mxu1 }
 0x633   : > { %v2496_v33 = vadd.f32 %v2432_v25, %v9758_v32  ;;  %v8211_v49 = vpop.f32.mrf.mxu0  ;;  %v9866_v32 = vshrl.u32 %v2806_v35, 7  ;;  %v8601_v35 = vld [vmem:[%s11045_s4] sm:$0x1f]  }
 0x634   : > { %v2434_v43 = vpop.f32.mrf.mxu1 }
 0x635   : > { %v2497_v1 = vadd.f32 %v2434_v43, %v2195_v28  ;;  %v2482_v48 = vpop.f32.mrf.mxu0  ;;  %v2812_v56 = vsub.s32 1, %v9866_v32  ;;  %v2816_v36 = vsub.s32 2, %v9866_v32 }
 0x636   : > { %v2438_v29 = vpop.f32.mrf.mxu1 }
 0x637   : > { %v2499_v62 = vadd.f32 %v2438_v29, %v9763_v40  ;;  %v2808_v40 = vsub.s32 0, %v9866_v32  ;;  %v2813_v8 = vrot.slane %v2804_v51, %v2812_v56  ;;  %v2817_v58 = vrot.slane %v2804_v51, %v2816_v36  ;;  %v8935_v32 = vld [vmem:[%s11049_s8 + $0xe0] sm:$0xff]  }
 0x638   : > { %v2440_v42 = vpop.f32.mrf.mxu1 }
 0x639   : > { %v2500_v31 = vadd.f32 %v2440_v42, %v9766_v45  ;;  %v1290_v45 = vadd.f32 %v9525_v30, %v982_v52  ;;  %v2809_v6 = vrot.slane %v2804_v51, %v2808_v40  ;;  %v8602_v52 = vld [vmem:[%s11045_s4 + $0x8] sm:$0x1f]   ;;  %v8608_v51 = vld [vmem:[%s11046_s5 + $0x274] ss:$12 sps:$4 sm:$0xff]  }
 0x63a   : > { %v2442_v37 = vpop.f32.mrf.mxu1 }
 0x63b   : > { %v1592_v55 = vadd.f32 %v9632_v27, %v1290_v45  ;;  %v8994_v45 = vmov 0.0  }
 0x63c   : > { %v2443_v38 = vpop.f32.mrf.mxu1 }
 0x63d   : > { %v1894_v44 = vadd.f32 %v9743_v26, %v1592_v55 }
 0x63f   : > { %v2196_v53 = vadd.f32 %v2180_v16, %v1894_v44  ;;  %v8612_v44 = vld [vmem:[%s11046_s5 + $0x240] ss:$12 sps:$4 sm:$0xff]  }
 0x641   : > { %v2498_v54 = vadd.f32 %v2482_v48, %v2196_v53  ;;  %v8603_v48 = vld [vmem:[%s11046_s5 + $0x288] ss:$12 sps:$4 sm:$0xff]  }
 0x642   : > { %v8623_v53 = vld [vmem:[%s11046_s5 + $0x1fc] ss:$12 sps:$4 sm:$0xff]  }
 0x646   : > { %v8226_v46 = vpop.f32.mrf.mxu1 }
 0x647   : > { %v2569_v2 = vpack.c.bf16 %v8226_v46, %v8226_v46 }
 0x648   : > { %v2554_v63 = vpop.f32.mrf.mxu1 }
 0x64a   : > { %v8227_v39 = vpop.f32.mrf.mxu1 }
 0x64c   : > { %v2557_v0 = vpop.f32.mrf.mxu1 }
 0x64d   : > { %v2568_v41 = vpack.c.bf16 %v2557_v0, %v2554_v63 }
 0x64f   : > { %7005 = vmatmul.mubr.msk.bf16.vlgmr.msra.gmra.mxu0 %vm414_vm0, %v2568_v41  ;;  %8240 = vmatprep.mubr.msk.bf16.mxu1 %vm414_vm0, %v2568_v41  ;;  %v8605_v41 = vld [vmem:[%s11046_s5 + $0x28c] ss:$12 sps:$4 sm:$0xff]  }
 0x650   : > { %8241 = vmatmul.mubr.msk.bf16.vlgmr.msra.gmra.mxu1 %vm414_vm0, %v2569_v2  ;;  %2738 = vmatprep.mubr.bf16.mxu0 %v8993_v34 }
 0x651   : > { %3075 = vmatprep.mubr.bf16.mxu1 %v8993_v34 }
 0x657   : > { %7006 = vmatmul.mubr.msk.bf16.gmra.mxu0 %vm414_vm0, %v2569_v2 }
 0x658   : > { %2897 = vmatprep.mubr.bf16.mxu0 %v8993_v34 }
 0x70f   : > { %v2730_v4 = vpop.f32.mrf.mxu0 }
 0x710   : > { %v2795_v3 = vadd.f32 %v2730_v4, %v2493_v18  ;;  %v8242_v7 = vpop.f32.mrf.mxu1  ;;  %v8606_v4 = vld [vmem:[%s11046_s5 + $0x270] ss:$12 sps:$4 sm:$0xff]  }
 0x711   : > { %v2732_v30 = vpop.f32.mrf.mxu0  ;;  %v2803_v19 = vadd.f32 %v8242_v7, %v9850_v20  ;;  %v8614_v7 = vld [vmem:[%s11046_s5 + $0x244] ss:$12 sps:$4 sm:$0xff]  }
 0x712   : > { %v2796_v47 = vadd.f32 %v2732_v30, %v2494_v22  ;;  %v2781_v9 = vpop.f32.mrf.mxu1  ;;  %v2821_v27 = vadd.f32 %v2809_v6, %v2795_v3  ;;  %v8611_v3 = vld [vmem:[%s11046_s5 + $0x25c] ss:$12 sps:$4 sm:$0xff]   ;;  %v8617_v30 = vld [vmem:[%s11046_s5 + $0x22c] ss:$12 sps:$4 sm:$0xff]  }
 0x713   : > { %v2797_v57 = vadd.f32 %v2781_v9, %v2495_v24  ;;  %v2734_v50 = vpop.f32.mrf.mxu0  ;;  %v2829_v46 = vadd.f32 %v2817_v58, %v2803_v19  ;;  %v8618_v9 = vld [vmem:[%s11046_s5 + $0x210] ss:$12 sps:$4 sm:$0xff]   ;;  %v8653_v19 = vld [vmem:[%s11046_s5 + $0x3ac] ss:$12 sps:$4 sm:$0xff]  }
 0x714   : > { %v2798_v61 = vadd.f32 %v2734_v50, %v2496_v33  ;;  %v8243_v59 = vpop.f32.mrf.mxu1  ;;  %v2822_v60 = vadd.f32 %v2813_v8, %v2796_v47  ;;  %v2830_v15 = vmax.f32 %v2821_v27, 0.0  ;;  %v8620_v47 = vld [vmem:[%s11046_s5 + $0x214] ss:$12 sps:$4 sm:$0xff]   ;;  %v8626_v50 = vld [vmem:[%s11046_s5 + $0x1e4] ss:$12 sps:$4 sm:$0xff]  }
 0x715   : > { %v2736_v26 = vpop.f32.mrf.mxu0  ;;  %v2823_v12 = vadd.f32 %v2817_v58, %v2797_v57  ;;  %v2838_v0 = vmax.f32 %v2829_v46, 0.0  ;;  %v8621_v57 = vld [vmem:[%s11046_s5 + $0x1f8] ss:$12 sps:$4 sm:$0xff]   ;;  %v8624_v27 = vld [vmem:[%s11046_s5 + $0x1e0] ss:$12 sps:$4 sm:$0xff]  }
 0x716   : > { %v2824_v5 = vadd.f32 %v2809_v6, %v2798_v61  ;;  %v2799_v10 = vadd.f32 %v2736_v26, %v2497_v1  ;;  %v2784_v11 = vpop.f32.mrf.mxu1  ;;  %v2831_v21 = vmax.f32 %v2822_v60, 0.0  ;;  %v8629_v61 = vld [vmem:[%s11046_s5 + $0x34c] ss:$12 sps:$4 sm:$0xff]   ;;  %v8627_v59 = vld [vmem:[%s11046_s5 + $0x348] ss:$12 sps:$4 sm:$0xff]  }
 0x717   : > { %v2800_v13 = vadd.f32 %v2784_v11, %v2498_v54  ;;  %v2740_v14 = vpop.f32.mrf.mxu0  ;;  %v2832_v49 = vmax.f32 %v2823_v12, 0.0  ;;  %v2844_v2 = vpack.c.bf16 %v2838_v0, %v2838_v0  ;;  %v8632_v54 = vld [vmem:[%s11046_s5 + $0x334] ss:$12 sps:$4 sm:$0xff]   ;;  %v8635_v60 = vld [vmem:[%s11046_s5 + $0x31c] ss:$12 sps:$4 sm:$0xff]  }
 0x718   : > { %v2833_v17 = vmax.f32 %v2824_v5, 0.0  ;;  %v2825_v16 = vadd.f32 %v2813_v8, %v2799_v10  ;;  %v2801_v18 = vadd.f32 %v2740_v14, %v2499_v62  ;;  %v8633_v26 = vld [vmem:[%s11046_s5 + $0x318] ss:$12 sps:$4 sm:$0xff]   ;;  %v8636_v10 = vld [vmem:[%s11046_s5 + $0x300] ss:$12 sps:$4 sm:$0xff]  }
 0x719   : > { %v2826_v22 = vadd.f32 %v2817_v58, %v2800_v13  ;;  %v2742_v23 = vpop.f32.mrf.mxu0  ;;  %v9926_v55 = vsel %vm421_vm1, %v2844_v2, 0  ;;  %v8630_v58 = vld [vmem:[%s11046_s5 + $0x330] ss:$12 sps:$4 sm:$0xff]   ;;  %v8641_v11 = vld [vmem:[%s11046_s5 + $0x2ec] ss:$12 sps:$4 sm:$0xff]  }
 0x71a   : > { %v9886_v24 = vpack.c.bf16 %v2833_v17, %v2830_v15  ;;  %v2834_v25 = vmax.f32 %v2825_v16, 0.0  ;;  %v2827_v28 = vadd.f32 %v2809_v6, %v2801_v18  ;;  %v2802_v33 = vadd.f32 %v2742_v23, %v2500_v31  ;;  %v8609_v6 = vld [vmem:[%s11046_s5 + $0x258] ss:$12 sps:$4 sm:$0xff]   ;;  %v8639_v12 = vld [vmem:[%s11046_s5 + $0x2e8] ss:$12 sps:$4 sm:$0xff]  }
 0x71b   : > { %v2835_v43 = vmax.f32 %v2826_v22, 0.0  ;;  %v2744_v1 = vpop.f32.mrf.mxu0  ;;  %v8638_v5 = vld [vmem:[%s11046_s5 + $0x304] ss:$12 sps:$4 sm:$0xff]   ;;  %v8644_v13 = vld [vmem:[%s11046_s5 + $0x2d4] ss:$12 sps:$4 sm:$0xff]  }
 0x71c   : > { %v9888_v29 = vpack.c.bf16 %v2834_v25, %v2831_v21  ;;  %v2836_v42 = vmax.f32 %v2827_v28, 0.0  ;;  %v2828_v37 = vadd.f32 %v2813_v8, %v2802_v33  ;;  %v8615_v8 = vld [vmem:[%s11046_s5 + $0x228] ss:$12 sps:$4 sm:$0xff]   ;;  %v8642_v14 = vld [vmem:[%s11046_s5 + $0x2d0] ss:$12 sps:$4 sm:$0xff]  }
 0x71d   : > { %v9890_v38 = vpack.c.bf16 %v2835_v43, %v2832_v49  ;;  %v2745_v62 = vpop.f32.mrf.mxu0  ;;  %v8647_v15 = vld [vmem:[%s11046_s5 + $0x2bc] ss:$12 sps:$4 sm:$0xff]   ;;  %v8645_v17 = vld [vmem:[%s11046_s5 + $0x2b8] ss:$12 sps:$4 sm:$0xff]   ;;  %v8648_v18 = vld [vmem:[%s11046_s5 + $0x2a0] ss:$12 sps:$4 sm:$0xff]  }
 0x71e   : > { %v2842_v20 = vpack.c.bf16 %v2836_v42, %v2836_v42  ;;  %v2837_v63 = vmax.f32 %v2828_v37, 0.0  ;;  %v8650_v16 = vld [vmem:[%s11046_s5 + $0x2a4] ss:$12 sps:$4 sm:$0xff]   ;;  %v8651_v21 = vld [vmem:[%s11046_s5 + $0x3a8] ss:$12 sps:$4 sm:$0xff]  }
 0x71f   : > { %v8656_v22 = vld [vmem:[%s11046_s5 + $0xac] ss:$12 sps:$4 sm:$0xff]   ;;  %v8659_v23 = vld [vmem:[%s11046_s5 + $0x394] ss:$12 sps:$4 sm:$0xff]   ;;  %v8657_v25 = vld [vmem:[%s11046_s5 + $0x390] ss:$12 sps:$4 sm:$0xff]  }
 0x720   : > { %v9892_v39 = vpack.c.bf16 %v2837_v63, %v2837_v63  ;;  %v9899_v31 = vsel %vm421_vm1, %v2842_v20, 0  ;;  %v8665_v28 = vld [vmem:[%s11046_s5 + $0x37c] ss:$12 sps:$4 sm:$0xff]   ;;  %v8663_v33 = vld [vmem:[%s11046_s5 + $0x378] ss:$12 sps:$4 sm:$0xff]  }
 0x721   : > { %v8671_v49 = vld [vmem:[%s11046_s5 + $0x364] ss:$12 sps:$4 sm:$0xff]   ;;  %v8669_v43 = vld [vmem:[%s11046_s5 + $0x360] ss:$12 sps:$4 sm:$0xff]  }
 0x722   : > { %7010 = vmatprep.subr.msk.bf16.mxu0 %vm421_vm1, %v9892_v39  ;;  %7016 = vmatprep.subr.msk.bf16.mxu1 %vm421_vm1, %v9892_v39  ;;  %v8675_v1 = vld [vmem:[%s11046_s5 + $0x350] ss:$12 sps:$4 sm:$0xff]  }
 0x723   : > { %2878 = vmatpush1.bf16.msra.mxu0 %v9899_v31  ;;  %3056 = vmatpush1.bf16.msra.mxu1 %v9899_v31 }
 0x724   : > { %2879 = vmatprep.subr.bf16.mxu0 %v9888_v29  ;;  %3057 = vmatprep.subr.bf16.mxu1 %v9888_v29 }
 0x727   : > { %2880 = vmatpush1.bf16.msra.mxu0 %v9886_v24  ;;  %3058 = vmatpush1.bf16.msra.mxu1 %v9886_v24 }
 0x728   : > { %8244 = vmatprep.subr.bf16.mxu0 %v8994_v45  ;;  %3535 = vmatprep.subr.bf16.mxu1 %v8605_v41 }
 0x72a   : > { %7011 = vmatmul.mubr.msk.bf16.vlgmr.msra.gmra.mxu0 %vm2852_vm2, %v8601_v35  ;;  %7017 = vmatmul.mubr.msk.bf16.vlgmr.msra.gmra.mxu1 %vm2852_vm2, %v8602_v52 }
 0x72b   : > { %8245 = vmatpush3.bf16.msra.mxu0 %v9926_v55  ;;  %8248 = vmatprep.mubr.msk.bf16.mxu0 %vm8995_vm3, %v8994_v45 }
 0x72c   : > { %8246 = vmatprep.subr.bf16.mxu0 %v8994_v45  ;;  %3536 = vmatpush1.bf16.msra.mxu1 %v8603_v48  ;;  %v8654_v48 = vld [vmem:[%s11046_s5 + $0xa8] ss:$12 sps:$4 sm:$0xff]  }
 0x72d   : > { %3537 = vmatprep.subr.bf16.mxu1 %v8608_v51 }
 0x72f   : > { %8247 = vmatpush3.bf16.msra.mxu0 %v9890_v38 }
 0x730   : > { %8252 = vmatprep.subr.bf16.mxu0 %v8994_v45  ;;  %3538 = vmatpush1.bf16.msra.mxu1 %v8606_v4  ;;  %v8662_v4 = vld [vmem:[%s11046_s5 + $0x94] ss:$12 sps:$4 sm:$0xff]  }
 0x731   : > { %3539 = vmatprep.subr.bf16.mxu1 %v8611_v3 }
 0x732   : > { %8249 = vmatmul.mubr.msk.bf16.vlgmr.msra.gmra.mxu0 %vm2852_vm2, %v8601_v35 }
 0x733   : > { %8253 = vmatpush3.bf16.msra.mxu0 %v9926_v55  ;;  %8256 = vmatprep.mubr.msk.bf16.mxu0 %vm8995_vm3, %v8994_v45 }
 0x734   : > { %8254 = vmatprep.subr.bf16.mxu0 %v8994_v45  ;;  %3540 = vmatpush1.bf16.msra.mxu1 %v8609_v6 }
 0x735   : > { %3541 = vmatprep.subr.bf16.mxu1 %v8614_v7  ;;  %v8660_v7 = vld [vmem:[%s11046_s5 + $0x90] ss:$12 sps:$4 sm:$0xff]  }
 0x737   : > { %8255 = vmatpush3.bf16.msra.mxu0 %v9890_v38 }
 0x738   : > { %3542 = vmatpush1.bf16.msra.mxu1 %v8612_v44  ;;  %3586 = vmatprep.subr.bf16.mxu0 %v8653_v19  ;;  %v8694_v19 = vld [vmem:[%s11046_s5 + $0x4] ss:$12 sps:$4 sm:$0xff]  }
 0x739   : > { %3543 = vmatprep.subr.bf16.mxu1 %v8617_v30  ;;  %v8668_v30 = vld [vmem:[%s11046_s5 + $0x7c] ss:$12 sps:$4 sm:$0xff]  }
 0x73a   : > { %8257 = vmatmul.mubr.msk.bf16.vlgmr.msra.gmra.mxu0 %vm2852_vm2, %v8602_v52 }
 0x73b   : > { %3610 = vmatprep.mubr.bf16.mxu0 %v8993_v34  ;;  %3587 = vmatpush1.bf16.msra.mxu0 %v8651_v21  ;;  %v8695_v21 = vld [vmem:[%s11046_s5 + $0x2f0] ss:$12 sps:$4 sm:$0xff]  }
 0x73c   : > { %3544 = vmatpush1.bf16.msra.mxu1 %v8615_v8  ;;  %3588 = vmatprep.subr.bf16.mxu0 %v8659_v23  ;;  %v8696_v23 = vld [vmem:[%s11046_s5 + $0x230] ss:$12 sps:$4 sm:$0xff]  }
 0x73d   : > { %3545 = vmatprep.subr.bf16.mxu1 %v8620_v47 }
 0x73f   : > { %3589 = vmatpush1.bf16.msra.mxu0 %v8657_v25  ;;  %v8699_v25 = vld [vmem:[%s11046_s5 + $0x16c] ss:$12 sps:$4 sm:$0xff]  }
 0x740   : > { %3546 = vmatpush1.bf16.msra.mxu1 %v8618_v9  ;;  %3590 = vmatprep.subr.bf16.mxu0 %v8665_v28  ;;  %v8666_v9 = vld [vmem:[%s11046_s5 + $0x78] ss:$12 sps:$4 sm:$0xff]  }
 0x741   : > { %3547 = vmatprep.subr.bf16.mxu1 %v8623_v53  ;;  %v8700_v28 = vld [vmem:[%s11046_s5 + $0x2d8] ss:$12 sps:$4 sm:$0xff]  }
 0x743   : > { %3591 = vmatpush1.bf16.msra.mxu0 %v8663_v33  ;;  %v8697_v33 = vld [vmem:[%s11046_s5 + $0x168] ss:$12 sps:$4 sm:$0xff]  }
 0x744   : > { %3548 = vmatpush1.bf16.msra.mxu1 %v8621_v57  ;;  %3592 = vmatprep.subr.bf16.mxu0 %v8671_v49  ;;  %v8674_v57 = vld [vmem:[%s11046_s5 + $0x64] ss:$12 sps:$4 sm:$0xff]  }
 0x745   : > { %3549 = vmatprep.subr.bf16.mxu1 %v8626_v50  ;;  %v8701_v49 = vld [vmem:[%s11046_s5 + $0x218] ss:$12 sps:$4 sm:$0xff]  }
 0x747   : > { %3593 = vmatpush1.bf16.msra.mxu0 %v8669_v43  ;;  %v8704_v43 = vld [vmem:[%s11046_s5 + $0x154] ss:$12 sps:$4 sm:$0xff]  }
 0x748   : > { %3550 = vmatpush1.bf16.msra.mxu1 %v8624_v27  ;;  %7793 = vmatprep.subr.bf16.mxu0 %v8675_v1  ;;  %v8672_v27 = vld [vmem:[%s11046_s5 + $0x60] ss:$12 sps:$4 sm:$0xff]  }
 0x749   : > { %3551 = vmatprep.subr.bf16.mxu1 %v8629_v61  ;;  %v8705_v1 = vld [vmem:[%s11046_s5 + $0x2c0] ss:$12 sps:$4 sm:$0xff]  }
 0x74c   : > { %3552 = vmatpush2.bf16.msra.mxu1 %v8627_v59  ;;  %v8676_v59 = vld [vmem:[%s11046_s5 + $0x290] ss:$12 sps:$4 sm:$0xff]  }
 0x74d   : > { %3553 = vmatprep.subr.bf16.mxu1 %v8632_v54  ;;  %v8679_v54 = vld [vmem:[%s11046_s5 + $0x4c] ss:$12 sps:$4 sm:$0xff]  }
 0x750   : > { %3554 = vmatpush2.bf16.msra.mxu1 %v8630_v58 }
 0x751   : > { %3555 = vmatprep.subr.bf16.mxu1 %v8635_v60  ;;  %v8680_v60 = vld [vmem:[%s11046_s5 + $0x338] ss:$12 sps:$4 sm:$0xff]  }
 0x754   : > { %3556 = vmatpush2.bf16.msra.mxu1 %v8633_v26 }
 0x755   : > { %3557 = vmatprep.subr.bf16.mxu1 %v8638_v5  ;;  %v8677_v5 = vld [vmem:[%s11046_s5 + $0x48] ss:$12 sps:$4 sm:$0xff]  }
 0x758   : > { %3558 = vmatpush2.bf16.msra.mxu1 %v8636_v10  ;;  %v8681_v10 = vld [vmem:[%s11046_s5 + $0x278] ss:$12 sps:$4 sm:$0xff]  }
 0x759   : > { %3559 = vmatprep.subr.bf16.mxu1 %v8641_v11  ;;  %v8684_v11 = vld [vmem:[%s11046_s5 + $0x34] ss:$12 sps:$4 sm:$0xff]  }
 0x75c   : > { %3560 = vmatpush2.bf16.msra.mxu1 %v8639_v12  ;;  %v8685_v12 = vld [vmem:[%s11046_s5 + $0x320] ss:$12 sps:$4 sm:$0xff]  }
 0x75d   : > { %3561 = vmatprep.subr.bf16.mxu1 %v8644_v13  ;;  %v8682_v13 = vld [vmem:[%s11046_s5 + $0x30] ss:$12 sps:$4 sm:$0xff]  }
 0x760   : > { %3562 = vmatpush2.bf16.msra.mxu1 %v8642_v14  ;;  %v8686_v14 = vld [vmem:[%s11046_s5 + $0x260] ss:$12 sps:$4 sm:$0xff]  }
 0x761   : > { %3563 = vmatprep.subr.bf16.mxu1 %v8647_v15  ;;  %v8689_v15 = vld [vmem:[%s11046_s5 + $0x1c] ss:$12 sps:$4 sm:$0xff]  }
 0x764   : > { %3564 = vmatpush2.bf16.msra.mxu1 %v8645_v17  ;;  %v8690_v17 = vld [vmem:[%s11046_s5 + $0x308] ss:$12 sps:$4 sm:$0xff]  }
 0x765   : > { %3565 = vmatprep.subr.bf16.mxu1 %v8650_v16  ;;  %v8687_v16 = vld [vmem:[%s11046_s5 + $0x18] ss:$12 sps:$4 sm:$0xff]  }
 0x768   : > { %3566 = vmatpush2.bf16.msra.mxu1 %v8648_v18  ;;  %v8691_v18 = vld [vmem:[%s11046_s5 + $0x248] ss:$12 sps:$4 sm:$0xff]  }
 0x769   : > { %4026 = vmatprep.subr.bf16.mxu1 %v8656_v22  ;;  %v8692_v22 = vld [vmem:[%s11046_s5] ss:$12 sps:$4 sm:$0xff]  }
 0x7ea   : > { %v2899_v42 = vpop.f32.mrf.mxu0  ;;  %v3077_v37 = vpop.f32.mrf.mxu1 }
 0x7ec   : > { %v2901_v62 = vpop.f32.mrf.mxu0  ;;  %v3079_v46 = vpop.f32.mrf.mxu1 }
 0x7ee   : > { %v2903_v20 = vpop.f32.mrf.mxu0  ;;  %v3081_v63 = vpop.f32.mrf.mxu1 }
 0x7ef   : > { %v10059_v0 = vpack.c.bf16 %v2903_v20, %v2899_v42  ;;  %v10061_v41 = vpack.c.bf16 %v3081_v63, %v3077_v37  ;;  %v8702_v42 = vld [vmem:[%s11046_s5 + $0x150] ss:$12 sps:$4 sm:$0xff]   ;;  %v8706_v37 = vld [vmem:[%s11046_s5 + $0x200] ss:$12 sps:$4 sm:$0xff]   ;;  %v8707_v20 = vld [vmem:[%s11046_s5 + $0x138] ss:$12 sps:$4 sm:$0xff]  }
 0x7f0   : > { %v2905_v2 = vpop.f32.mrf.mxu0  ;;  %v3083_v35 = vpop.f32.mrf.mxu1  ;;  %v8711_v63 = vld [vmem:[%s11046_s5 + $0x1e8] ss:$12 sps:$4 sm:$0xff]  }
 0x7f1   : > { %v3128_v52 = vpack.c.bf16 %v3083_v35, %v3079_v46  ;;  %v10069_v3 = vpack.c.bf16 %v2905_v2, %v2901_v62  ;;  %v8709_v62 = vld [vmem:[%s11046_s5 + $0x13c] ss:$12 sps:$4 sm:$0xff]   ;;  %v8714_v2 = vld [vmem:[%s11046_s5 + $0x124] ss:$12 sps:$4 sm:$0xff]   ;;  %v8712_v35 = vld [vmem:[%s11046_s5 + $0x120] ss:$12 sps:$4 sm:$0xff]  }
 0x7f2   : > { %v2942_v51 = vpop.f32.mrf.mxu0  ;;  %v8710_v46 = vld [vmem:[%s11046_s5 + $0x2a8] ss:$12 sps:$4 sm:$0xff]  }
 0x7f3   : > { %3567 = vmatprep.mubr.bf16.mxu1 %v3128_v52 }
 0x7f4   : > { %v8250_v6 = vpop.f32.mrf.mxu0  ;;  %3568 = vmatmul.mubr.bf16.vlgmr.msra.gmra.mxu1 %v10061_v41 }
 0x7f5   : > { %4027 = vmatpush1.bf16.msra.mxu1 %v8654_v48  ;;  %4058 = vmatprep.mubr.bf16.mxu1 %v10069_v3  ;;  %v8718_v48 = vld [vmem:[%s11046_s5 + $0x10c] ss:$12 sps:$4 sm:$0xff]   ;;  %v8722_v6 = vld [vmem:[%s11046_s5 + $0xf4] ss:$12 sps:$4 sm:$0xff]  }
 0x7f6   : > { %v2945_v44 = vpop.f32.mrf.mxu0  ;;  %4028 = vmatprep.subr.bf16.mxu1 %v8662_v4  ;;  %v8719_v4 = vld [vmem:[%s11046_s5 + $0x398] ss:$12 sps:$4 sm:$0xff]  }
 0x7f7   : > { %v10079_v8 = vpack.c.bf16 %v2945_v44, %v2942_v51  ;;  %v8716_v51 = vld [vmem:[%s11046_s5 + $0x108] ss:$12 sps:$4 sm:$0xff]  }
 0x7f8   : > { %v8251_v47 = vpop.f32.mrf.mxu0  ;;  %v8726_v44 = vld [vmem:[%s11046_s5 + $0xdc] ss:$12 sps:$4 sm:$0xff]  }
 0x7f9   : > { %4029 = vmatpush1.bf16.msra.mxu1 %v8660_v7  ;;  %v8723_v7 = vld [vmem:[%s11046_s5 + $0x380] ss:$12 sps:$4 sm:$0xff]   ;;  %v8727_v47 = vld [vmem:[%s11046_s5 + $0x368] ss:$12 sps:$4 sm:$0xff]  }
 0x7fa   : > { %v3120_v53 = vpop.f32.mrf.mxu0  ;;  %4030 = vmatprep.subr.bf16.mxu1 %v8668_v30  ;;  %v8724_v30 = vld [vmem:[%s11046_s5 + $0xd8] ss:$12 sps:$4 sm:$0xff]  }
 0x7fc   : > { %v8258_v50 = vpop.f32.mrf.mxu0 }
 0x7fd   : > { %4031 = vmatpush1.bf16.msra.mxu1 %v8666_v9  ;;  %v8730_v9 = vld [vmem:[%s11046_s5 + $0xc4] ss:$12 sps:$4 sm:$0xff]   ;;  %v8731_v50 = vld [vmem:[%s11046_s5 + $0x1c8] ss:$12 sps:$4 sm:$0xff]  }
 0x7fe   : > { %v3123_v61 = vpop.f32.mrf.mxu0  ;;  %4032 = vmatprep.subr.bf16.mxu1 %v8674_v57  ;;  %v8728_v57 = vld [vmem:[%s11046_s5 + $0xc0] ss:$12 sps:$4 sm:$0xff]  }
 0x7ff   : > { %v10096_v58 = vpack.c.bf16 %v3123_v61, %v3120_v53  ;;  %v8733_v53 = vld [vmem:[%s11046_s5 + $0x1cc] ss:$12 sps:$4 sm:$0xff]   ;;  %v8734_v61 = vld [vmem:[%s11046_s5 + $0x1b0] ss:$12 sps:$4 sm:$0xff]  }
 0x800   : > { %v8259_v26 = vpop.f32.mrf.mxu0 }
 0x801   : > { %4033 = vmatpush1.bf16.msra.mxu1 %v8672_v27  ;;  %7159 = vmatmul.mubr.msk.bf16.vlgmr.msra.gmra.mxu0 %vm3531_vm4, %v10096_v58  ;;  %v8736_v27 = vld [vmem:[%s11046_s5 + $0x1b4] ss:$12 sps:$4 sm:$0xff]  }
 0x802   : > { %7794 = vmatpush3.bf16.msra.mxu0 %v8676_v59  ;;  %4034 = vmatprep.subr.bf16.mxu1 %v8679_v54  ;;  %v8739_v59 = vld [vmem:[%s11046_s5 + $0x19c] ss:$12 sps:$4 sm:$0xff]   ;;  %v8737_v54 = vld [vmem:[%s11046_s5 + $0x198] ss:$12 sps:$4 sm:$0xff]   ;;  %v10266_v26 = vld [vmem:[%s11045_s4 + $0x10] sm:$0x1f]  }
 0x803   : > { %7795 = vmatprep.subr.bf16.mxu0 %v8680_v60  ;;  %3653 = vmatprep.mubr.bf16.mxu0 %v3128_v52  ;;  %v8715_v52 = vld [vmem:[%s11046_s5 + $0x3b0] ss:$12 sps:$4 sm:$0xff]  }
 0x804   : > { %v8746_v60 = vld [vmem:[%s11046_s5 + $0x184] ss:$12 sps:$4 sm:$0xff]  }
 0x805   : > { %4035 = vmatpush1.bf16.msra.mxu1 %v8677_v5  ;;  %v8741_v5 = vld [vmem:[%s11046_s5 + $0x468] ss:$12 sps:$4 sm:$0xff]  }
 0x806   : > { %7796 = vmatpush3.bf16.msra.mxu0 %v8681_v10  ;;  %4036 = vmatprep.subr.bf16.mxu1 %v8684_v11  ;;  %v8744_v10 = vld [vmem:[%s11046_s5 + $0x180] ss:$12 sps:$4 sm:$0xff]  }
 0x807   : > { %7797 = vmatprep.subr.bf16.mxu0 %v8685_v12  ;;  %v8749_v11 = vld [vmem:[%s11046_s5 + $0x454] ss:$12 sps:$4 sm:$0xff]   ;;  %v8750_v12 = vld [vmem:[%s11046_s5 + $0x170] ss:$12 sps:$4 sm:$0xff]  }
 0x809   : > { %4037 = vmatpush1.bf16.msra.mxu1 %v8682_v13  ;;  %v8747_v13 = vld [vmem:[%s11046_s5 + $0x450] ss:$12 sps:$4 sm:$0xff]  }
 0x80a   : > { %7798 = vmatpush3.bf16.msra.mxu0 %v8686_v14  ;;  %4038 = vmatprep.subr.bf16.mxu1 %v8689_v15  ;;  %v8751_v14 = vld [vmem:[%s11046_s5 + $0xb0] ss:$12 sps:$4 sm:$0xff]  }
 0x80b   : > { %7799 = vmatprep.subr.bf16.mxu0 %v8690_v17  ;;  %v8754_v15 = vld [vmem:[%s11046_s5 + $0x43c] ss:$12 sps:$4 sm:$0xff]   ;;  %v8755_v17 = vld [vmem:[%s11046_s5 + $0x158] ss:$12 sps:$4 sm:$0xff]  }
 0x80d   : > { %4039 = vmatpush1.bf16.msra.mxu1 %v8687_v16  ;;  %v8752_v16 = vld [vmem:[%s11046_s5 + $0x438] ss:$12 sps:$4 sm:$0xff]  }
 0x80e   : > { %7800 = vmatpush3.bf16.msra.mxu0 %v8691_v18  ;;  %4040 = vmatprep.subr.bf16.mxu1 %v8694_v19  ;;  %v8756_v18 = vld [vmem:[%s11046_s5 + $0x98] ss:$12 sps:$4 sm:$0xff]  }
 0x80f   : > { %7801 = vmatprep.subr.bf16.mxu0 %v8695_v21  ;;  %v8759_v19 = vld [vmem:[%s11046_s5 + $0x424] ss:$12 sps:$4 sm:$0xff]   ;;  %v8760_v21 = vld [vmem:[%s11046_s5 + $0x140] ss:$12 sps:$4 sm:$0xff]  }
 0x811   : > { %4041 = vmatpush1.bf16.msra.mxu1 %v8692_v22  ;;  %v8757_v22 = vld [vmem:[%s11046_s5 + $0x420] ss:$12 sps:$4 sm:$0xff]  }
 0x812   : > { %7802 = vmatpush3.bf16.msra.mxu0 %v8696_v23  ;;  %4042 = vmatprep.subr.bf16.mxu1 %v8699_v25  ;;  %v8764_v23 = vld [vmem:[%s11046_s5 + $0x40c] ss:$12 sps:$4 sm:$0xff]   ;;  %v8765_v25 = vld [vmem:[%s11046_s5 + $0x128] ss:$12 sps:$4 sm:$0xff]  }
 0x813   : > { %7803 = vmatprep.subr.bf16.mxu0 %v8700_v28  ;;  %v8762_v28 = vld [vmem:[%s11046_s5 + $0x408] ss:$12 sps:$4 sm:$0xff]  }
 0x815   : > { %4043 = vmatpush2.bf16.msra.mxu1 %v8697_v33  ;;  %v8766_v33 = vld [vmem:[%s11046_s5 + $0x68] ss:$12 sps:$4 sm:$0xff]  }
 0x816   : > { %7804 = vmatpush3.bf16.msra.mxu0 %v8701_v49  ;;  %4044 = vmatprep.subr.bf16.mxu1 %v8704_v43  ;;  %v8769_v49 = vld [vmem:[%s11046_s5 + $0x3f4] ss:$12 sps:$4 sm:$0xff]   ;;  %v8770_v43 = vld [vmem:[%s11046_s5 + $0x110] ss:$12 sps:$4 sm:$0xff]  }
 0x817   : > { %7805 = vmatprep.subr.bf16.mxu0 %v8705_v1  ;;  %v8767_v1 = vld [vmem:[%s11046_s5 + $0x3f0] ss:$12 sps:$4 sm:$0xff]  }
 0x819   : > { %4045 = vmatpush2.bf16.msra.mxu1 %v8702_v42  ;;  %v8771_v42 = vld [vmem:[%s11046_s5 + $0x50] ss:$12 sps:$4 sm:$0xff]  }
 0x81a   : > { %7806 = vmatpush3.bf16.msra.mxu0 %v8706_v37  ;;  %4046 = vmatprep.subr.bf16.mxu1 %v8709_v62  ;;  %v8774_v37 = vld [vmem:[%s11046_s5 + $0x3dc] ss:$12 sps:$4 sm:$0xff]   ;;  %v8775_v62 = vld [vmem:[%s11046_s5 + $0xf8] ss:$12 sps:$4 sm:$0xff]  }
 0x81b   : > { %7807 = vmatprep.subr.bf16.mxu0 %v8710_v46  ;;  %v8772_v46 = vld [vmem:[%s11046_s5 + $0x3d8] ss:$12 sps:$4 sm:$0xff]  }
 0x81d   : > { %4047 = vmatpush2.bf16.msra.mxu1 %v8707_v20  ;;  %v8776_v20 = vld [vmem:[%s11046_s5 + $0x38] ss:$12 sps:$4 sm:$0xff]  }
 0x81e   : > { %7808 = vmatpush3.bf16.msra.mxu0 %v8711_v63  ;;  %4048 = vmatprep.subr.bf16.mxu1 %v8714_v2  ;;  %v8779_v63 = vld [vmem:[%s11046_s5 + $0x3c4] ss:$12 sps:$4 sm:$0xff]   ;;  %v8780_v2 = vld [vmem:[%s11046_s5 + $0xe0] ss:$12 sps:$4 sm:$0xff]  }
 0x81f   : > { %8260 = vmatprep.subr.bf16.mxu0 %v8994_v45 }
 0x821   : > { %3654 = vmatmul.mubr.bf16.vlgmr.msra.gmra.mxu0 %v10061_v41  ;;  %4049 = vmatpush2.bf16.msra.mxu1 %v8712_v35  ;;  %v8720_v41 = vld [vmem:[%s11046_s5 + $0xf0] ss:$12 sps:$4 sm:$0xff]   ;;  %v8777_v35 = vld [vmem:[%s11046_s5 + $0x3c0] ss:$12 sps:$4 sm:$0xff]  }
 0x822   : > { %8261 = vmatpush3.bf16.msra.mxu0 %v8715_v52  ;;  %4050 = vmatprep.subr.bf16.mxu1 %v8718_v48  ;;  %v8781_v52 = vld [vmem:[%s11046_s5 + $0x20] ss:$12 sps:$4 sm:$0xff]  }
 0x823   : > { %8262 = vmatprep.subr.bf16.mxu0 %v8994_v45  ;;  %8268 = vmatprep.mubr.msk.bf16.mxu0 %vm8995_vm3, %v8994_v45  ;;  %v8784_v48 = vld [vmem:[%s11046_s5 + $0x52c] ss:$12 sps:$4 sm:$0xff]  }
 0x825   : > { %4051 = vmatpush2.bf16.msra.mxu1 %v8716_v51  ;;  %v8785_v51 = vld [vmem:[%s11046_s5 + $0xc8] ss:$12 sps:$4 sm:$0xff]  }
 0x826   : > { %8263 = vmatpush3.bf16.msra.mxu0 %v8719_v4  ;;  %4052 = vmatprep.subr.bf16.mxu1 %v8722_v6  ;;  %v8782_v4 = vld [vmem:[%s11046_s5 + $0x528] ss:$12 sps:$4 sm:$0xff]  }
 0x827   : > { %8264 = vmatprep.subr.bf16.mxu0 %v8994_v45  ;;  %v8786_v6 = vld [vmem:[%s11046_s5 + $0x8] ss:$12 sps:$4 sm:$0xff]  }
 0x829   : > { %4053 = vmatpush2.bf16.msra.mxu1 %v8720_v41  ;;  %v8789_v41 = vld [vmem:[%s11046_s5 + $0x514] ss:$12 sps:$4 sm:$0xff]  }
 0x82a   : > { %8265 = vmatpush3.bf16.msra.mxu0 %v8723_v7  ;;  %4054 = vmatprep.subr.bf16.mxu1 %v8726_v44  ;;  %v8787_v7 = vld [vmem:[%s11046_s5 + $0x510] ss:$12 sps:$4 sm:$0xff]  }
 0x82b   : > { %8266 = vmatprep.subr.bf16.mxu0 %v8994_v45  ;;  %v8790_v44 = vld [vmem:[%s11046_s5 + $0x1d0] ss:$12 sps:$4 sm:$0xff]  }
 0x82d   : > { %4055 = vmatpush2.bf16.msra.mxu1 %v8724_v30  ;;  %v8793_v30 = vld [vmem:[%s11046_s5 + $0x4fc] ss:$12 sps:$4 sm:$0xff]  }
 0x82e   : > { %8267 = vmatpush3.bf16.msra.mxu0 %v8727_v47  ;;  %4056 = vmatprep.subr.bf16.mxu1 %v8730_v9  ;;  %v8791_v47 = vld [vmem:[%s11046_s5 + $0x4f8] ss:$12 sps:$4 sm:$0xff]  }
 0x82f   : > { %4077 = vmatprep.subr.bf16.mxu0 %v8733_v53  ;;  %v8794_v9 = vld [vmem:[%s11046_s5 + $0x1b8] ss:$12 sps:$4 sm:$0xff]  }
 0x830   : > { %v8797_v53 = vld [vmem:[%s11046_s5 + $0x4e4] ss:$12 sps:$4 sm:$0xff]  }
 0x831   : > { %8269 = vmatmul.mubr.msk.bf16.vlgmr.msra.gmra.mxu0 %vm3531_vm4, %v10096_v58  ;;  %4057 = vmatpush2.bf16.msra.mxu1 %v8728_v57  ;;  %v8743_v58 = vld [vmem:[%s11046_s5 + $0x46c] ss:$12 sps:$4 sm:$0xff]  }
 0x832   : > { %4078 = vmatpush1.bf16.msra.mxu0 %v8731_v50  ;;  %7226 = vmatprep.subr.msk.bf16.mxu1 %vm421_vm1, %v9892_v39  ;;  %v8798_v57 = vld [vmem:[%s11046_s5 + $0x1a0] ss:$12 sps:$4 sm:$0xff]  }
 0x833   : > { %4079 = vmatprep.subr.bf16.mxu0 %v8736_v27  ;;  %4101 = vmatprep.mubr.bf16.mxu0 %v8993_v34  ;;  %v8801_v50 = vld [vmem:[%s11046_s5 + $0x4cc] ss:$12 sps:$4 sm:$0xff]   ;;  %v8799_v27 = vld [vmem:[%s11046_s5 + $0x4c8] ss:$12 sps:$4 sm:$0xff]  }
 0x834   : > { %4059 = vmatmul.mubr.bf16.vlgmr.msra.gmra.mxu1 %v10059_v0 }
 0x835   : > { %4218 = vmatpush1.bf16.msra.mxu1 %v9899_v31  ;;  %4237 = vmatprep.mubr.bf16.mxu1 %v8993_v34 }
 0x836   : > { %4080 = vmatpush1.bf16.msra.mxu0 %v8734_v61  ;;  %4219 = vmatprep.subr.bf16.mxu1 %v9888_v29  ;;  %v8802_v61 = vld [vmem:[%s11046_s5 + $0x188] ss:$12 sps:$4 sm:$0xff]  }
 0x837   : > { %4081 = vmatprep.subr.bf16.mxu0 %v8739_v59  ;;  %v8805_v59 = vld [vmem:[%s11046_s5 + $0x4b4] ss:$12 sps:$4 sm:$0xff]  }
 0x839   : > { %4220 = vmatpush1.bf16.msra.mxu1 %v9886_v24 }
 0x83a   : > { %4082 = vmatpush1.bf16.msra.mxu0 %v8737_v54  ;;  %4696 = vmatprep.subr.bf16.mxu1 %v8743_v58  ;;  %v8803_v54 = vld [vmem:[%s11046_s5 + $0x4b0] ss:$12 sps:$4 sm:$0xff]  }
 0x83b   : > { %4083 = vmatprep.subr.bf16.mxu0 %v8746_v60  ;;  %v8808_v58 = vld [vmem:[%s11046_s5 + $0x49c] ss:$12 sps:$4 sm:$0xff]   ;;  %v8806_v60 = vld [vmem:[%s11046_s5 + $0x498] ss:$12 sps:$4 sm:$0xff]  }
 0x83c   : > { %7227 = vmatmul.mubr.msk.bf16.vlgmr.msra.gmra.mxu1 %vm2852_vm2, %v10266_v26 }
 0x83d   : > { %4697 = vmatpush1.bf16.msra.mxu1 %v8741_v5  ;;  %v8811_v5 = vld [vmem:[%s11046_s5 + $0x484] ss:$12 sps:$4 sm:$0xff]  }
 0x83e   : > { %4084 = vmatpush1.bf16.msra.mxu0 %v8744_v10  ;;  %4698 = vmatprep.subr.bf16.mxu1 %v8749_v11  ;;  %v8812_v10 = vld [vmem:[%s11046_s5 + $0x588] ss:$12 sps:$4 sm:$0xff]   ;;  %v8814_v11 = vld [vmem:[%s11046_s5 + $0x58c] ss:$12 sps:$4 sm:$0xff]  }
 0x83f   : > { %7820 = vmatprep.subr.bf16.mxu0 %v8750_v12  ;;  %v8820_v12 = vld [vmem:[%s11046_s5 + $0x55c] ss:$12 sps:$4 sm:$0xff]  }
 0x841   : > { %7221 = vmatmul.mubr.msk.bf16.vlgmr.msra.gmra.mxu0 %vm3531_vm4, %v10079_v8  ;;  %4699 = vmatpush1.bf16.msra.mxu1 %v8747_v13  ;;  %v8818_v13 = vld [vmem:[%s11046_s5 + $0x558] ss:$12 sps:$4 sm:$0xff]  }
 0x842   : > { %7821 = vmatpush3.bf16.msra.mxu0 %v8751_v14  ;;  %4144 = vmatprep.mubr.bf16.mxu0 %v10069_v3  ;;  %v8761_v3 = vld [vmem:[%s11046_s5 + $0x80] ss:$12 sps:$4 sm:$0xff]  }
 0x843   : > { %4700 = vmatprep.subr.bf16.mxu1 %v8754_v15  ;;  %7822 = vmatprep.subr.bf16.mxu0 %v8755_v17  ;;  %v8823_v15 = vld [vmem:[%s11046_s5 + $0x544] ss:$12 sps:$4 sm:$0xff]   ;;  %v8821_v17 = vld [vmem:[%s11046_s5 + $0x540] ss:$12 sps:$4 sm:$0xff]  }
 0x845   : > { %4701 = vmatpush1.bf16.msra.mxu1 %v8752_v16 }
 0x846   : > { %7823 = vmatpush3.bf16.msra.mxu0 %v8756_v18  ;;  %4702 = vmatprep.subr.bf16.mxu1 %v8759_v19  ;;  %v8824_v18 = vld [vmem:[%s11046_s5 + $0x530] ss:$12 sps:$4 sm:$0xff]  }
 0x847   : > { %7824 = vmatprep.subr.bf16.mxu0 %v8760_v21 }
 0x849   : > { %4703 = vmatpush1.bf16.msra.mxu1 %v8757_v22 }
 0x84a   : > { %7825 = vmatpush3.bf16.msra.mxu0 %v8761_v3  ;;  %4704 = vmatprep.subr.bf16.mxu1 %v8764_v23 }
 0x84b   : > { %7826 = vmatprep.subr.bf16.mxu0 %v8765_v25 }
 0x84d   : > { %4705 = vmatpush1.bf16.msra.mxu1 %v8762_v28 }
 0x84e   : > { %7827 = vmatpush3.bf16.msra.mxu0 %v8766_v33  ;;  %4706 = vmatprep.subr.bf16.mxu1 %v8769_v49 }
 0x84f   : > { %7828 = vmatprep.subr.bf16.mxu0 %v8770_v43 }
 0x851   : > { %4707 = vmatpush1.bf16.msra.mxu1 %v8767_v1 }
 0x852   : > { %7829 = vmatpush3.bf16.msra.mxu0 %v8771_v42  ;;  %4708 = vmatprep.subr.bf16.mxu1 %v8774_v37 }
 0x853   : > { %7830 = vmatprep.subr.bf16.mxu0 %v8775_v62 }
 0x855   : > { %4709 = vmatpush1.bf16.msra.mxu1 %v8772_v46 }
 0x856   : > { %7831 = vmatpush3.bf16.msra.mxu0 %v8776_v20  ;;  %4710 = vmatprep.subr.bf16.mxu1 %v8779_v63 }
 0x857   : > { %7832 = vmatprep.subr.bf16.mxu0 %v8780_v2 }
 0x859   : > { %4711 = vmatpush1.bf16.msra.mxu1 %v8777_v35 }
 0x85a   : > { %7833 = vmatpush3.bf16.msra.mxu0 %v8781_v52  ;;  %4712 = vmatprep.subr.bf16.mxu1 %v8784_v48 }
 0x85b   : > { %7834 = vmatprep.subr.bf16.mxu0 %v8785_v51 }
 0x85d   : > { %4713 = vmatpush2.bf16.msra.mxu1 %v8782_v4 }
 0x85e   : > { %7835 = vmatpush3.bf16.msra.mxu0 %v8786_v6  ;;  %4714 = vmatprep.subr.bf16.mxu1 %v8789_v41 }
 0x85f   : > { %8272 = vmatprep.subr.bf16.mxu0 %v8994_v45 }
 0x861   : > { %4145 = vmatmul.mubr.bf16.vlgmr.msra.gmra.mxu0 %v10059_v0  ;;  %4715 = vmatpush2.bf16.msra.mxu1 %v8787_v7  ;;  %v8795_v0 = vld [vmem:[%s11046_s5 + $0x4e0] ss:$12 sps:$4 sm:$0xff]  }
 0x862   : > { %8273 = vmatpush3.bf16.msra.mxu0 %v8790_v44  ;;  %4716 = vmatprep.subr.bf16.mxu1 %v8793_v30 }
 0x863   : > { %8274 = vmatprep.subr.bf16.mxu0 %v8994_v45  ;;  %8280 = vmatprep.mubr.msk.bf16.mxu0 %vm8995_vm3, %v8994_v45 }
 0x865   : > { %4717 = vmatpush2.bf16.msra.mxu1 %v8791_v47 }
 0x866   : > { %8275 = vmatpush3.bf16.msra.mxu0 %v8794_v9  ;;  %4718 = vmatprep.subr.bf16.mxu1 %v8797_v53 }
 0x867   : > { %8276 = vmatprep.subr.bf16.mxu0 %v8994_v45 }
 0x869   : > { %4719 = vmatpush2.bf16.msra.mxu1 %v8795_v0 }
 0x86a   : > { %8277 = vmatpush3.bf16.msra.mxu0 %v8798_v57  ;;  %4720 = vmatprep.subr.bf16.mxu1 %v8801_v50 }
 0x86b   : > { %8278 = vmatprep.subr.bf16.mxu0 %v8994_v45 }
 0x86d   : > { %4721 = vmatpush2.bf16.msra.mxu1 %v8799_v27 }
 0x86e   : > { %8279 = vmatpush3.bf16.msra.mxu0 %v8802_v61  ;;  %4722 = vmatprep.subr.bf16.mxu1 %v8805_v59 }
 0x86f   : > { %8284 = vmatprep.subr.bf16.mxu0 %v8994_v45 }
 0x871   : > { %8281 = vmatmul.mubr.msk.bf16.vlgmr.msra.gmra.mxu0 %vm3531_vm4, %v10079_v8  ;;  %4723 = vmatpush2.bf16.msra.mxu1 %v8803_v54  ;;  %v8809_v8 = vld [vmem:[%s11046_s5 + $0x480] ss:$12 sps:$4 sm:$0xff]  }
 0x872   : > { %8285 = vmatpush3.bf16.msra.mxu0 %v9926_v55  ;;  %4724 = vmatprep.subr.bf16.mxu1 %v8808_v58 }
 0x873   : > { %8286 = vmatprep.subr.bf16.mxu0 %v8994_v45  ;;  %8288 = vmatprep.mubr.msk.bf16.mxu0 %vm8995_vm3, %v8994_v45 }
 0x875   : > { %4725 = vmatpush2.bf16.msra.mxu1 %v8806_v60 }
 0x876   : > { %8287 = vmatpush3.bf16.msra.mxu0 %v9890_v38  ;;  %4726 = vmatprep.subr.bf16.mxu1 %v8811_v5 }
 0x877   : > { %4747 = vmatprep.subr.bf16.mxu0 %v8814_v11 }
 0x879   : > { %8289 = vmatmul.mubr.msk.bf16.vlgmr.msra.gmra.mxu0 %vm2852_vm2, %v10266_v26  ;;  %4727 = vmatpush2.bf16.msra.mxu1 %v8809_v8  ;;  %v8817_v26 = vld [vmem:[%s11046_s5 + $0x574] ss:$12 sps:$4 sm:$0xff]  }
 0x87a   : > { %7374 = vmatprep.subr.msk.bf16.mxu1 %vm421_vm1, %v9892_v39  ;;  %4771 = vmatprep.mubr.bf16.mxu0 %v8993_v34  ;;  %v8815_v39 = vld [vmem:[%s11046_s5 + $0x570] ss:$12 sps:$4 sm:$0xff]  }
 0x87b   : > { %4748 = vmatpush1.bf16.msra.mxu0 %v8812_v10 }
 0x87c   : > { %4749 = vmatprep.subr.bf16.mxu0 %v8817_v26  ;;  %v8847_v26 = vld [vmem:[%s11046_s5 + $0x64c] ss:$12 sps:$4 sm:$0xff]  }
 0x87f   : > { %4750 = vmatpush1.bf16.msra.mxu0 %v8815_v39  ;;  %v10497_v39 = vld [vmem:[%s11045_s4 + $0x18] sm:$0x1f]  }
 0x880   : > { %4751 = vmatprep.subr.bf16.mxu0 %v8820_v12 }
 0x883   : > { %4752 = vmatpush1.bf16.msra.mxu0 %v8818_v13 }
 0x884   : > { %4753 = vmatprep.subr.bf16.mxu0 %v8823_v15 }
 0x887   : > { %4754 = vmatpush1.bf16.msra.mxu0 %v8821_v17 }
 0x888   : > { %7850 = vmatprep.subr.bf16.mxu0 %v8824_v18 }
 0x8b4   : > { %v3569_v14 = vpop.f32.mrf.mxu1 }
 0x8b6   : > { %v3571_v16 = vpop.f32.mrf.mxu1 }
 0x8b8   : > { %v3573_v21 = vpop.f32.mrf.mxu1 }
 0x8ba   : > { %v3575_v28 = vpop.f32.mrf.mxu1 }
 0x8c1   : > { %v3612_v19 = vpop.f32.mrf.mxu0 }
 0x8c2   : > { %v3613_v22 = vadd.f32 %v3612_v19, %v3569_v14 }
 0x8c3   : > { %v3614_v3 = vpop.f32.mrf.mxu0 }
 0x8c4   : > { %v3615_v23 = vadd.f32 %v3614_v3, %v3571_v16 }
 0x8c5   : > { %v3616_v25 = vpop.f32.mrf.mxu0 }
 0x8c6   : > { %v3617_v33 = vadd.f32 %v3616_v25, %v3573_v21 }
 0x8c7   : > { %v3618_v49 = vpop.f32.mrf.mxu0 }
 0x8c8   : > { %v3619_v43 = vadd.f32 %v3618_v49, %v3575_v28  ;;  %v8825_v49 = vld [vmem:[%s11046_s5 + $0x470] ss:$12 sps:$4 sm:$0xff]  }
 0x8e1   : > { %v7809_v1 = vpop.f32.mrf.mxu0 }
 0x8e3   : > { %v7810_v42 = vpop.f32.mrf.mxu0 }
 0x8e4   : > { %v7811_v37 = vadd.f32 %v7810_v42, %v7809_v1  ;;  %v8826_v1 = vld [vmem:[%s11046_s5 + $0x518] ss:$12 sps:$4 sm:$0xff]  }
 0x8e5   : > { %v7812_v62 = vpop.f32.mrf.mxu0 }
 0x8e7   : > { %v7813_v46 = vpop.f32.mrf.mxu0 }
 0x8e8   : > { %v7814_v20 = vadd.f32 %v7813_v46, %v7812_v62  ;;  %v8828_v62 = vld [vmem:[%s11046_s5 + $0x500] ss:$12 sps:$4 sm:$0xff]  }
 0x8e9   : > { %v8829_v46 = vld [vmem:[%s11046_s5 + $0x440] ss:$12 sps:$4 sm:$0xff]  }
 0x8f1   : > { %v3696_v63 = vpop.f32.mrf.mxu0 }
 0x8f2   : > { %v3697_v2 = vadd.f32 %v7811_v37, %v3696_v63  ;;  %v8827_v37 = vld [vmem:[%s11046_s5 + $0x458] ss:$12 sps:$4 sm:$0xff]   ;;  %v8831_v63 = vld [vmem:[%s11046_s5 + $0x428] ss:$12 sps:$4 sm:$0xff]  }
 0x8f3   : > { %v8270_v35 = vpop.f32.mrf.mxu0 }
 0x8f4   : > { %v4060_v52 = vpop.f32.mrf.mxu1  ;;  %v8833_v35 = vld [vmem:[%s11046_s5 + $0x410] ss:$12 sps:$4 sm:$0xff]  }
 0x8f5   : > { %v4061_v48 = vadd.f32 %v4060_v52, %v3613_v22  ;;  %v3699_v51 = vpop.f32.mrf.mxu0  ;;  %v8834_v52 = vld [vmem:[%s11046_s5 + $0x4b8] ss:$12 sps:$4 sm:$0xff]  }
 0x8f6   : > { %v3700_v4 = vadd.f32 %v7814_v20, %v3699_v51  ;;  %v4062_v6 = vpop.f32.mrf.mxu1  ;;  %v8830_v20 = vld [vmem:[%s11046_s5 + $0x4e8] ss:$12 sps:$4 sm:$0xff]   ;;  %v8836_v51 = vld [vmem:[%s11046_s5 + $0x4a0] ss:$12 sps:$4 sm:$0xff]  }
 0x8f7   : > { %v4063_v41 = vadd.f32 %v4062_v6, %v3615_v23  ;;  %v8271_v7 = vpop.f32.mrf.mxu0  ;;  %v8838_v6 = vld [vmem:[%s11046_s5 + $0x488] ss:$12 sps:$4 sm:$0xff]  }
 0x8f8   : > { %v4064_v44 = vpop.f32.mrf.mxu1  ;;  %v8840_v7 = vld [vmem:[%s11046_s5 + $0x590] ss:$12 sps:$4 sm:$0xff]  }
 0x8f9   : > { %v4065_v30 = vadd.f32 %v4064_v44, %v3617_v33  ;;  %v8841_v44 = vld [vmem:[%s11046_s5 + $0x578] ss:$12 sps:$4 sm:$0xff]  }
 0x8fa   : > { %v4066_v47 = vpop.f32.mrf.mxu1 }
 0x8fb   : > { %v4067_v9 = vadd.f32 %v4066_v47, %v3619_v43  ;;  %v8843_v47 = vld [vmem:[%s11046_s5 + $0x548] ss:$12 sps:$4 sm:$0xff]  }
 0x8fc   : > { %v4239_v53 = vpop.f32.mrf.mxu1 }
 0x8fe   : > { %v4241_v0 = vpop.f32.mrf.mxu1 }
 0x900   : > { %v4243_v57 = vpop.f32.mrf.mxu1 }
 0x901   : > { %v4103_v50 = vpop.f32.mrf.mxu0  ;;  %v10477_v27 = vpack.c.bf16 %v4243_v57, %v4239_v53  ;;  %v8853_v53 = vld [vmem:[%s11046_s5 + $0x61c] ss:$12 sps:$4 sm:$0xff]   ;;  %v8856_v57 = vld [vmem:[%s11046_s5 + $0x604] ss:$12 sps:$4 sm:$0xff]  }
 0x902   : > { %v10479_v61 = vadd.f32 %v4103_v50, %v4061_v48  ;;  %v4245_v59 = vpop.f32.mrf.mxu1  ;;  %v8835_v48 = vld [vmem:[%s11046_s5 + $0x3f8] ss:$12 sps:$4 sm:$0xff]  }
 0x903   : > { %v4290_v54 = vpack.c.bf16 %v4245_v59, %v4241_v0  ;;  %v4105_v58 = vpop.f32.mrf.mxu0  ;;  %v8854_v0 = vld [vmem:[%s11046_s5 + $0x600] ss:$12 sps:$4 sm:$0xff]  }
 0x904   : > { %v10481_v60 = vadd.f32 %v4105_v58, %v4063_v41  ;;  %v8839_v41 = vld [vmem:[%s11046_s5 + $0x3c8] ss:$12 sps:$4 sm:$0xff]   ;;  %v8859_v50 = vld [vmem:[%s11046_s5 + $0x5ec] ss:$12 sps:$4 sm:$0xff]  }
 0x905   : > { %v4107_v5 = vpop.f32.mrf.mxu0  ;;  %4728 = vmatprep.mubr.bf16.mxu1 %v4290_v54  ;;  %v8862_v59 = vld [vmem:[%s11046_s5 + $0x5d4] ss:$12 sps:$4 sm:$0xff]   ;;  %v8865_v58 = vld [vmem:[%s11046_s5 + $0x5bc] ss:$12 sps:$4 sm:$0xff]  }
 0x906   : > { %v10483_v8 = vadd.f32 %v4107_v5, %v4065_v30  ;;  %4729 = vmatmul.mubr.bf16.vlgmr.msra.gmra.mxu1 %v10477_v27  ;;  %v8842_v30 = vld [vmem:[%s11046_s5 + $0x560] ss:$12 sps:$4 sm:$0xff]   ;;  %v8863_v5 = vld [vmem:[%s11046_s5 + $0x5b8] ss:$12 sps:$4 sm:$0xff]  }
 0x907   : > { %4894 = vmatpush1.bf16.msra.mxu1 %v9899_v31  ;;  %v4109_v10 = vpop.f32.mrf.mxu0  ;;  %4913 = vmatprep.mubr.bf16.mxu1 %v8993_v34  ;;  %v8845_v31 = vld [vmem:[%s11046_s5 + $0x648] ss:$12 sps:$4 sm:$0xff]  }
 0x908   : > { %v10488_v11 = vadd.f32 %v4109_v10, %v4067_v9  ;;  %4895 = vmatprep.subr.bf16.mxu1 %v9888_v29  ;;  %v8850_v9 = vld [vmem:[%s11046_s5 + $0x634] ss:$12 sps:$4 sm:$0xff]   ;;  %v8868_v10 = vld [vmem:[%s11046_s5 + $0x5a4] ss:$12 sps:$4 sm:$0xff]  }
 0x90b   : > { %4896 = vmatpush1.bf16.msra.mxu1 %v9886_v24 }
 0x90c   : > { %5372 = vmatprep.subr.bf16.mxu1 %v8847_v26  ;;  %v8866_v26 = vld [vmem:[%s11046_s5 + $0x5a0] ss:$12 sps:$4 sm:$0xff]  }
 0x90e   : > { %7375 = vmatmul.mubr.msk.bf16.vlgmr.msra.gmra.mxu1 %vm2852_vm2, %v10497_v39 }
 0x90f   : > { %5373 = vmatpush1.bf16.msra.mxu1 %v8845_v31  ;;  %v8869_v31 = vld [vmem:[%s11046_s5 + $0x708] ss:$12 sps:$4 sm:$0xff]  }
 0x910   : > { %5374 = vmatprep.subr.bf16.mxu1 %v8850_v9 }
 0x921   : > { %v7836_v29 = vpop.f32.mrf.mxu0 }
 0x923   : > { %v7837_v12 = vpop.f32.mrf.mxu0 }
 0x924   : > { %v7838_v13 = vadd.f32 %v7837_v12, %v7836_v29  ;;  %v8874_v29 = vld [vmem:[%s11046_s5 + $0x6f4] ss:$12 sps:$4 sm:$0xff]   ;;  %v8872_v12 = vld [vmem:[%s11046_s5 + $0x6f0] ss:$12 sps:$4 sm:$0xff]  }
 0x925   : > { %v7839_v14 = vpop.f32.mrf.mxu0 }
 0x926   : > { %v4147_v15 = vadd.f32 %v7838_v13, %v3697_v2  ;;  %v8832_v2 = vld [vmem:[%s11046_s5 + $0x4d0] ss:$12 sps:$4 sm:$0xff]  }
 0x927   : > { %v7840_v17 = vpop.f32.mrf.mxu0  ;;  %v8877_v13 = vld [vmem:[%s11046_s5 + $0x6dc] ss:$12 sps:$4 sm:$0xff]  }
 0x928   : > { %v7841_v16 = vadd.f32 %v7840_v17, %v7839_v14  ;;  %v8875_v14 = vld [vmem:[%s11046_s5 + $0x6d8] ss:$12 sps:$4 sm:$0xff]   ;;  %v8881_v17 = vld [vmem:[%s11046_s5 + $0x768] ss:$12 sps:$4 sm:$0xff]  }
 0x92a   : > { %v4150_v18 = vadd.f32 %v7841_v16, %v3700_v4  ;;  %v8837_v4 = vld [vmem:[%s11046_s5 + $0x3e0] ss:$12 sps:$4 sm:$0xff]  }
 0x92b   : > { %v8878_v16 = vld [vmem:[%s11046_s5 + $0x6c0] ss:$12 sps:$4 sm:$0xff]  }
 0x931   : > { %v4187_v19 = vpop.f32.mrf.mxu0 }
 0x932   : > { %v10505_v21 = vadd.f32 %v4187_v19, %v4147_v15  ;;  %v8880_v15 = vld [vmem:[%s11046_s5 + $0x6c4] ss:$12 sps:$4 sm:$0xff]   ;;  %v8886_v19 = vld [vmem:[%s11046_s5 + $0x6ac] ss:$12 sps:$4 sm:$0xff]  }
 0x933   : > { %v8282_v24 = vpop.f32.mrf.mxu0 }
 0x934   : > { %v8884_v24 = vld [vmem:[%s11046_s5 + $0x6a8] ss:$12 sps:$4 sm:$0xff]  }
 0x935   : > { %v4190_v22 = vpop.f32.mrf.mxu0 }
 0x936   : > { %v10507_v3 = vadd.f32 %v4190_v22, %v4150_v18  ;;  %v8883_v18 = vld [vmem:[%s11046_s5 + $0x76c] ss:$12 sps:$4 sm:$0xff]   ;;  %v8889_v22 = vld [vmem:[%s11046_s5 + $0x754] ss:$12 sps:$4 sm:$0xff]  }
 0x937   : > { %v8283_v23 = vpop.f32.mrf.mxu0 }
 0x938   : > { %v8887_v23 = vld [vmem:[%s11046_s5 + $0x750] ss:$12 sps:$4 sm:$0xff]  }
 0x939   : > { %v4282_v25 = vpop.f32.mrf.mxu0 }
 0x93b   : > { %v8290_v28 = vpop.f32.mrf.mxu0 }
 0x93c   : > { %v8890_v28 = vld [vmem:[%s11046_s5 + $0x690] ss:$12 sps:$4 sm:$0xff]  }
 0x93d   : > { %v4285_v33 = vpop.f32.mrf.mxu0 }
 0x93e   : > { %v4291_v43 = vpack.c.bf16 %v4285_v33, %v4282_v25  ;;  %v8892_v25 = vld [vmem:[%s11046_s5 + $0x694] ss:$12 sps:$4 sm:$0xff]   ;;  %v8895_v33 = vld [vmem:[%s11046_s5 + $0x73c] ss:$12 sps:$4 sm:$0xff]  }
 0x93f   : > { %v8291_v42 = vpop.f32.mrf.mxu0 }
 0x940   : > { %7369 = vmatmul.mubr.msk.bf16.vlgmr.msra.gmra.mxu0 %vm3531_vm4, %v4291_v43  ;;  %v8901_v42 = vld [vmem:[%s11046_s5 + $0x724] ss:$12 sps:$4 sm:$0xff]  }
 0x941   : > { %7851 = vmatpush3.bf16.msra.mxu0 %v8825_v49  ;;  %4814 = vmatprep.mubr.bf16.mxu0 %v4290_v54  ;;  %v8860_v54 = vld [vmem:[%s11046_s5 + $0x5d0] ss:$12 sps:$4 sm:$0xff]   ;;  %v8893_v49 = vld [vmem:[%s11046_s5 + $0x738] ss:$12 sps:$4 sm:$0xff]  }
 0x942   : > { %7852 = vmatprep.subr.bf16.mxu0 %v8826_v1  ;;  %v8896_v1 = vld [vmem:[%s11046_s5 + $0x678] ss:$12 sps:$4 sm:$0xff]  }
 0x945   : > { %7853 = vmatpush3.bf16.msra.mxu0 %v8827_v37  ;;  %v8899_v37 = vld [vmem:[%s11046_s5 + $0x720] ss:$12 sps:$4 sm:$0xff]  }
 0x946   : > { %7854 = vmatprep.subr.bf16.mxu0 %v8828_v62  ;;  %v8904_v62 = vld [vmem:[%s11046_s5 + $0x664] ss:$12 sps:$4 sm:$0xff]  }
 0x949   : > { %7855 = vmatpush3.bf16.msra.mxu0 %v8829_v46  ;;  %v8902_v46 = vld [vmem:[%s11046_s5 + $0x660] ss:$12 sps:$4 sm:$0xff]  }
 0x94a   : > { %7856 = vmatprep.subr.bf16.mxu0 %v8830_v20  ;;  %v8905_v20 = vld [vmem:[%s11046_s5 + $0x710] ss:$12 sps:$4 sm:$0xff]  }
 0x94d   : > { %7857 = vmatpush3.bf16.msra.mxu0 %v8831_v63 }
 0x94e   : > { %7858 = vmatprep.subr.bf16.mxu0 %v8832_v2 }
 0x951   : > { %7859 = vmatpush3.bf16.msra.mxu0 %v8833_v35 }
 0x952   : > { %7860 = vmatprep.subr.bf16.mxu0 %v8834_v52 }
 0x955   : > { %7861 = vmatpush3.bf16.msra.mxu0 %v8835_v48 }
 0x956   : > { %7862 = vmatprep.subr.bf16.mxu0 %v8836_v51 }
 0x959   : > { %7863 = vmatpush3.bf16.msra.mxu0 %v8837_v4 }
 0x95a   : > { %7864 = vmatprep.subr.bf16.mxu0 %v8838_v6 }
 0x95d   : > { %7865 = vmatpush3.bf16.msra.mxu0 %v8839_v41 }
 0x95e   : > { %8292 = vmatprep.subr.bf16.mxu0 %v8994_v45 }
 0x960   : > { %4815 = vmatmul.mubr.bf16.vlgmr.msra.gmra.mxu0 %v10477_v27  ;;  %v8857_v27 = vld [vmem:[%s11046_s5 + $0x5e8] ss:$12 sps:$4 sm:$0xff]  }
 0x961   : > { %8293 = vmatpush3.bf16.msra.mxu0 %v8840_v7  ;;  %8300 = vmatprep.mubr.msk.bf16.mxu0 %vm8995_vm3, %v8994_v45 }
 0x962   : > { %8294 = vmatprep.subr.bf16.mxu0 %v8994_v45 }
 0x965   : > { %8295 = vmatpush3.bf16.msra.mxu0 %v8841_v44 }
 0x966   : > { %8296 = vmatprep.subr.bf16.mxu0 %v8994_v45 }
 0x969   : > { %8297 = vmatpush3.bf16.msra.mxu0 %v8842_v30 }
 0x96a   : > { %8298 = vmatprep.subr.bf16.mxu0 %v8994_v45 }
 0x96d   : > { %8299 = vmatpush3.bf16.msra.mxu0 %v8843_v47 }
 0x96e   : > { %8304 = vmatprep.subr.bf16.mxu0 %v8994_v45 }
 0x970   : > { %8301 = vmatmul.mubr.msk.bf16.vlgmr.msra.gmra.mxu0 %vm3531_vm4, %v4291_v43  ;;  %v8898_v43 = vld [vmem:[%s11046_s5 + $0x67c] ss:$12 sps:$4 sm:$0xff]  }
 0x971   : > { %8305 = vmatpush3.bf16.msra.mxu0 %v9926_v55  ;;  %8308 = vmatprep.mubr.msk.bf16.mxu0 %vm8995_vm3, %v8994_v45  ;;  %v8848_v55 = vld [vmem:[%s11046_s5 + $0x630] ss:$12 sps:$4 sm:$0xff]  }
 0x972   : > { %8306 = vmatprep.subr.bf16.mxu0 %v8994_v45  ;;  %5375 = vmatpush1.bf16.msra.mxu1 %v8848_v55 }
 0x973   : > { %5376 = vmatprep.subr.bf16.mxu1 %v8853_v53 }
 0x975   : > { %8307 = vmatpush3.bf16.msra.mxu0 %v9890_v38  ;;  %v8851_v38 = vld [vmem:[%s11046_s5 + $0x618] ss:$12 sps:$4 sm:$0xff]  }
 0x976   : > { %5377 = vmatpush1.bf16.msra.mxu1 %v8851_v38  ;;  %5423 = vmatprep.subr.bf16.mxu0 %v8883_v18 }
 0x977   : > { %5378 = vmatprep.subr.bf16.mxu1 %v8856_v57 }
 0x978   : > { %8309 = vmatmul.mubr.msk.bf16.vlgmr.msra.gmra.mxu0 %vm2852_vm2, %v10497_v39  ;;  %v8871_v39 = vld [vmem:[%s11046_s5 + $0x70c] ss:$12 sps:$4 sm:$0xff]  }
 0x979   : > { %5447 = vmatprep.mubr.bf16.mxu0 %v8993_v34  ;;  %5424 = vmatpush1.bf16.msra.mxu0 %v8881_v17 }
 0x97a   : > { %5379 = vmatpush1.bf16.msra.mxu1 %v8854_v0  ;;  %5425 = vmatprep.subr.bf16.mxu0 %v8889_v22  ;;  %v8910_v22 = vld [vmem:[%s11046_s5 + $0x620] ss:$12 sps:$4 sm:$0xff]  }
 0x97b   : > { %5380 = vmatprep.subr.bf16.mxu1 %v8859_v50 }
 0x97d   : > { %5426 = vmatpush1.bf16.msra.mxu0 %v8887_v23  ;;  %v8911_v23 = vld [vmem:[%s11046_s5 + $0x6c8] ss:$12 sps:$4 sm:$0xff]  }
 0x97e   : > { %5381 = vmatpush1.bf16.msra.mxu1 %v8857_v27  ;;  %5427 = vmatprep.subr.bf16.mxu0 %v8895_v33  ;;  %v8914_v33 = vld [vmem:[%s11046_s5 + $0x5f0] ss:$12 sps:$4 sm:$0xff]  }
 0x97f   : > { %5382 = vmatprep.subr.bf16.mxu1 %v8862_v59 }
 0x981   : > { %5428 = vmatpush1.bf16.msra.mxu0 %v8893_v49  ;;  %v8915_v49 = vld [vmem:[%s11046_s5 + $0x698] ss:$12 sps:$4 sm:$0xff]  }
 0x982   : > { %5383 = vmatpush1.bf16.msra.mxu1 %v8860_v54  ;;  %5429 = vmatprep.subr.bf16.mxu0 %v8901_v42  ;;  %v8918_v42 = vld [vmem:[%s11046_s5 + $0x5c0] ss:$12 sps:$4 sm:$0xff]  }
 0x983   : > { %5384 = vmatprep.subr.bf16.mxu1 %v8865_v58 }
 0x985   : > { %5430 = vmatpush1.bf16.msra.mxu0 %v8899_v37  ;;  %v8919_v37 = vld [vmem:[%s11046_s5 + $0x668] ss:$12 sps:$4 sm:$0xff]  }
 0x986   : > { %5385 = vmatpush1.bf16.msra.mxu1 %v8863_v5  ;;  %7880 = vmatprep.subr.bf16.mxu0 %v8905_v20  ;;  %v8922_v20 = vld [vmem:[%s11046_s5 + $0x758] ss:$12 sps:$4 sm:$0xff]  }
 0x987   : > { %5386 = vmatprep.subr.bf16.mxu1 %v8868_v10 }
 0x98a   : > { %5387 = vmatpush1.bf16.msra.mxu1 %v8866_v26 }
 0x98b   : > { %5388 = vmatprep.subr.bf16.mxu1 %v8871_v39 }
 0x98e   : > { %5389 = vmatpush2.bf16.msra.mxu1 %v8869_v31 }
 0x98f   : > { %5390 = vmatprep.subr.bf16.mxu1 %v8874_v29 }
 0x992   : > { %5391 = vmatpush2.bf16.msra.mxu1 %v8872_v12 }
 0x993   : > { %5392 = vmatprep.subr.bf16.mxu1 %v8877_v13 }
 0x996   : > { %5393 = vmatpush2.bf16.msra.mxu1 %v8875_v14 }
 0x997   : > { %5394 = vmatprep.subr.bf16.mxu1 %v8880_v15 }
 0x99a   : > { %5395 = vmatpush2.bf16.msra.mxu1 %v8878_v16  ;;  %v8906_v16 = vld [vmem:[%s11046_s5 + $0x650] ss:$12 sps:$4 sm:$0xff]  }
 0x99b   : > { %5396 = vmatprep.subr.bf16.mxu1 %v8886_v19  ;;  %v8907_v19 = vld [vmem:[%s11046_s5 + $0x6f8] ss:$12 sps:$4 sm:$0xff]  }
 0x99e   : > { %5397 = vmatpush2.bf16.msra.mxu1 %v8884_v24  ;;  %v8909_v24 = vld [vmem:[%s11046_s5 + $0x6e0] ss:$12 sps:$4 sm:$0xff]  }
 0x99f   : > { %5398 = vmatprep.subr.bf16.mxu1 %v8892_v25  ;;  %v8912_v25 = vld [vmem:[%s11046_s5 + $0x608] ss:$12 sps:$4 sm:$0xff]  }
 0x9a2   : > { %5399 = vmatpush2.bf16.msra.mxu1 %v8890_v28  ;;  %v8913_v28 = vld [vmem:[%s11046_s5 + $0x6b0] ss:$12 sps:$4 sm:$0xff]  }
 0x9a3   : > { %5400 = vmatprep.subr.bf16.mxu1 %v8898_v43  ;;  %v8916_v43 = vld [vmem:[%s11046_s5 + $0x5d8] ss:$12 sps:$4 sm:$0xff]  }
 0x9a6   : > { %5401 = vmatpush2.bf16.msra.mxu1 %v8896_v1  ;;  %v8917_v1 = vld [vmem:[%s11046_s5 + $0x680] ss:$12 sps:$4 sm:$0xff]  }
 0x9a7   : > { %5402 = vmatprep.subr.bf16.mxu1 %v8904_v62  ;;  %v8920_v62 = vld [vmem:[%s11046_s5 + $0x5a8] ss:$12 sps:$4 sm:$0xff]  }
 0x9aa   : > { %5403 = vmatpush2.bf16.msra.mxu1 %v8902_v46  ;;  %v8921_v46 = vld [vmem:[%s11046_s5 + $0x770] ss:$12 sps:$4 sm:$0xff]  }
 0x9c6   : > { %v4730_v63 = vpop.f32.mrf.mxu1 }
 0x9c8   : > { %v4732_v2 = vpop.f32.mrf.mxu1 }
 0x9ca   : > { %v4734_v35 = vpop.f32.mrf.mxu1 }
 0x9cc   : > { %v4736_v52 = vpop.f32.mrf.mxu1 }
 0x9ce   : > { %v4915_v48 = vpop.f32.mrf.mxu1 }
 0x9d0   : > { %v4917_v51 = vpop.f32.mrf.mxu1 }
 0x9d2   : > { %v4919_v4 = vpop.f32.mrf.mxu1 }
 0x9d3   : > { %v10701_v6 = vpack.c.bf16 %v4919_v4, %v4915_v48 }
 0x9d4   : > { %v4921_v41 = vpop.f32.mrf.mxu1 }
 0x9d5   : > { %v4966_v7 = vpack.c.bf16 %v4921_v41, %v4917_v51  ;;  %v10795_v51 = vld [vmem:[%s11047_s6] sm:$0x7] }
 0x9d7   : > { %5404 = vmatprep.mubr.bf16.mxu1 %v4966_v7 }
 0x9d8   : > { %5405 = vmatmul.mubr.bf16.vlgmr.msra.gmra.mxu1 %v10701_v6 }
 0x9d9   : > { %5628 = vmatprep.mubr.bf16.mxu1 %v8993_v34 }
 0xa00   : > { %v4773_v44 = vpop.f32.mrf.mxu0 }
 0xa01   : > { %v4774_v30 = vadd.f32 %v4773_v44, %v4730_v63  ;;  %v8923_v63 = vld [vmem:[%s11046_s5 + $0x740] ss:$12 sps:$4 sm:$0xff]   ;;  %v5551_v44 = vrot.slane %v10795_v51, %v2808_v40 }
 0xa02   : > { %v4775_v47 = vpop.f32.mrf.mxu0 }
 0xa03   : > { %v10706_v9 = vadd.f32 %v4774_v30, %v10479_v61  ;;  %v4776_v55 = vadd.f32 %v4775_v47, %v4732_v2  ;;  %v8924_v2 = vld [vmem:[%s11046_s5 + $0x728] ss:$12 sps:$4 sm:$0xff]  }
 0xa04   : > { %v4777_v53 = vpop.f32.mrf.mxu0 }
 0xa05   : > { %v10709_v38 = vadd.f32 %v4776_v55, %v10481_v60  ;;  %v4778_v0 = vadd.f32 %v4777_v53, %v4734_v35 }
 0xa06   : > { %v4779_v57 = vpop.f32.mrf.mxu0 }
 0xa07   : > { %v10712_v50 = vadd.f32 %v4778_v0, %v10483_v8  ;;  %v4780_v27 = vadd.f32 %v4779_v57, %v4736_v52  ;;  %v5555_v0 = vrot.slane %v10795_v51, %v2812_v56 }
 0xa09   : > { %v10715_v59 = vadd.f32 %v4780_v27, %v10488_v11 }
 0xa20   : > { %v7866_v54 = vpop.f32.mrf.mxu0 }
 0xa22   : > { %v7867_v58 = vpop.f32.mrf.mxu0 }
 0xa23   : > { %v7868_v5 = vadd.f32 %v7867_v58, %v7866_v54 }
 0xa24   : > { %v7869_v10 = vpop.f32.mrf.mxu0 }
 0xa26   : > { %v7870_v61 = vpop.f32.mrf.mxu0 }
 0xa27   : > { %v7871_v26 = vadd.f32 %v7870_v61, %v7869_v10 }
 0xa30   : > { %v4857_v39 = vpop.f32.mrf.mxu0 }
 0xa31   : > { %v4858_v31 = vadd.f32 %v7868_v5, %v4857_v39 }
 0xa32   : > { %v8302_v29 = vpop.f32.mrf.mxu0 }
 0xa33   : > { %v10718_v60 = vadd.f32 %v4858_v31, %v10505_v21 }
 0xa34   : > { %v4860_v12 = vpop.f32.mrf.mxu0 }
 0xa35   : > { %v4861_v13 = vadd.f32 %v7871_v26, %v4860_v12 }
 0xa36   : > { %v8303_v8 = vpop.f32.mrf.mxu0 }
 0xa37   : > { %v10721_v14 = vadd.f32 %v4861_v13, %v10507_v3  ;;  %v8908_v3 = vld [vmem:[%s11046_s5 + $0x638] ss:$12 sps:$4 sm:$0xff]  }
 0xa38   : > { %v4958_v11 = vpop.f32.mrf.mxu0 }
 0xa3a   : > { %v8310_v15 = vpop.f32.mrf.mxu0 }
 0xa3b   : > { %v8925_v15 = vld [vmem:[%s11049_s8 + $0x108] sm:$0xff]  }
 0xa3c   : > { %v4961_v17 = vpop.f32.mrf.mxu0 }
 0xa3d   : > { %v4967_v18 = vpack.c.bf16 %v4961_v17, %v4958_v11  ;;  %v7521_v17 = vld [vmem:[%s11048_s7 + $0x1] sm:$0x1] }
 0xa3e   : > { %v8311_v21 = vpop.f32.mrf.mxu0 }
 0xa3f   : > { %7517 = vmatmul.mubr.msk.bf16.vlgmr.msra.gmra.mxu0 %vm3531_vm4, %v4967_v18  ;;  %v8929_v21 = vld [vmem:[%s11049_s8 + $0xf8] sm:$0xff]  }
 0xa40   : > { %7881 = vmatpush3.bf16.msra.mxu0 %v8906_v16  ;;  %5490 = vmatprep.mubr.bf16.mxu0 %v4966_v7  ;;  %v8926_v16 = vld [vmem:[%s11049_s8 + $0xc8] sm:$0xff]  }
 0xa41   : > { %7882 = vmatprep.subr.bf16.mxu0 %v8907_v19  ;;  %v8928_v19 = vld [vmem:[%s11049_s8 + $0xc0] sm:$0xff]  }
 0xa44   : > { %7883 = vmatpush3.bf16.msra.mxu0 %v8908_v3 }
 0xa45   : > { %7884 = vmatprep.subr.bf16.mxu0 %v8909_v24  ;;  %v8930_v24 = vld [vmem:[%s11049_s8 + $0xb8] sm:$0xff]  }
 0xa48   : > { %7885 = vmatpush3.bf16.msra.mxu0 %v8910_v22  ;;  %v8931_v22 = vld [vmem:[%s11049_s8 + $0xf0] sm:$0xff]  }
 0xa49   : > { %7886 = vmatprep.subr.bf16.mxu0 %v8911_v23 }
 0xa4c   : > { %7887 = vmatpush3.bf16.msra.mxu0 %v8912_v25  ;;  %v8932_v25 = vld [vmem:[%s11049_s8 + $0xb0] sm:$0xff]  }
 0xa4d   : > { %7888 = vmatprep.subr.bf16.mxu0 %v8913_v28  ;;  %v8933_v28 = vld [vmem:[%s11049_s8 + $0xe8] sm:$0xff]  }
 0xa50   : > { %7889 = vmatpush3.bf16.msra.mxu0 %v8914_v33 }
 0xa51   : > { %7890 = vmatprep.subr.bf16.mxu0 %v8915_v49  ;;  %v8934_v49 = vld [vmem:[%s11049_s8 + $0xa8] sm:$0xff]  }
 0xa54   : > { %7891 = vmatpush3.bf16.msra.mxu0 %v8916_v43 }
 0xa55   : > { %7892 = vmatprep.subr.bf16.mxu0 %v8917_v1 }
 0xa58   : > { %7893 = vmatpush3.bf16.msra.mxu0 %v8918_v42 }
 0xa59   : > { %7894 = vmatprep.subr.bf16.mxu0 %v8919_v37 }
 0xa5c   : > { %7895 = vmatpush3.bf16.msra.mxu0 %v8920_v62 }
 0xa5d   : > { %8312 = vmatprep.subr.bf16.mxu0 %v8994_v45 }
 0xa5f   : > { %5491 = vmatmul.mubr.bf16.vlgmr.msra.gmra.mxu0 %v10701_v6 }
 0xa60   : > { %8313 = vmatpush3.bf16.msra.mxu0 %v8921_v46  ;;  %8320 = vmatprep.mubr.msk.bf16.mxu0 %vm8995_vm3, %v8994_v45 }
 0xa61   : > { %8314 = vmatprep.subr.bf16.mxu0 %v8994_v45 }
 0xa64   : > { %8315 = vmatpush3.bf16.msra.mxu0 %v8922_v20 }
 0xa65   : > { %8316 = vmatprep.subr.bf16.mxu0 %v8994_v45 }
 0xa68   : > { %8317 = vmatpush3.bf16.msra.mxu0 %v8923_v63  ;;  %v5559_v63 = vrot.slane %v10795_v51, %v2816_v36  ;;  %v8936_v36 = vld [vmem:[%s11049_s8 + $0xa0] sm:$0xff]   ;;  %v8939_v51 = vld [vmem:[%s11049_s8 + $0xd0] sm:$0xff]  }
 0xa69   : > { %8318 = vmatprep.subr.bf16.mxu0 %v8994_v45 }
 0xa6c   : > { %8319 = vmatpush3.bf16.msra.mxu0 %v8924_v2 }
 0xa6d   : > { %8324 = vmatprep.subr.bf16.mxu0 %v8994_v45 }
 0xa6f   : > { %8321 = vmatmul.mubr.msk.bf16.vlgmr.msra.gmra.mxu0 %vm3531_vm4, %v4967_v18  ;;  %v8927_v18 = vld [vmem:[%s11049_s8 + $0x100] sm:$0xff]  }
 0xa70   : > { %8326 = vmatprep.mubr.msk.bf16.mxu0 %vm8995_vm3, %v8994_v45 }
 0xa98   : > { %v5406_v35 = vpop.f32.mrf.mxu1 }
 0xa9a   : > { %v5408_v52 = vpop.f32.mrf.mxu1 }
 0xa9c   : > { %v5410_v4 = vpop.f32.mrf.mxu1 }
 0xa9e   : > { %v5412_v55 = vpop.f32.mrf.mxu1 }
 0xaff   : > { %v5449_v48 = vpop.f32.mrf.mxu0 }
 0xb00   : > { %v5450_v6 = vadd.f32 %v5449_v48, %v5406_v35 }
 0xb01   : > { %v5451_v41 = vpop.f32.mrf.mxu0 }
 0xb02   : > { %v5540_v7 = vadd.f32 %v5450_v6, %v10706_v9  ;;  %v5452_v30 = vadd.f32 %v5451_v41, %v5408_v52 }
 0xb03   : > { %v5453_v47 = vpop.f32.mrf.mxu0 }
 0xb04   : > { %v5541_v53 = vadd.f32 %v5452_v30, %v10709_v38  ;;  %v5454_v57 = vadd.f32 %v5453_v47, %v5410_v4  ;;  %v5563_v54 = vadd.f32 %v5551_v44, %v5540_v7  ;;  %v8996_v38 = vmov 65535   ;;  %v8940_v47 = vld [vmem:[%s11049_s8 + $0x90] sm:$0xff]  }
 0xb05   : > { %v5455_v27 = vpop.f32.mrf.mxu0  ;;  %v5585_v31 = vsel %vm5583_vm5, 4294967295, %v8996_v38  ;;  %v8942_v38 = vld [vmem:[%s11049_s8 + $0x80] sm:$0xff]  }
 0xb06   : > { %v5543_v58 = vadd.f32 %v5454_v57, %v10712_v50  ;;  %v5456_v5 = vadd.f32 %v5455_v27, %v5412_v55  ;;  %v5564_v9 = vadd.f32 %v5555_v0, %v5541_v53  ;;  %v5569_v61 = vmax.f32 %v5563_v54, 0.0  ;;  %v8943_v55 = vld [vmem:[%s11049_s8 + $0x118] sm:$0xff]   ;;  %v8944_v53 = vld [vmem:[%s11049_s8 + $0x110] sm:$0xff]  }
 0xb07   : > { %v5586_v8 = vsel %vm5584_vm6, %v5585_v31, 0 }
 0xb08   : > { %v5566_v10 = vadd.f32 %v5551_v44, %v5543_v58  ;;  %v5544_v40 = vadd.f32 %v5456_v5, %v10715_v59  ;;  %v5570_v29 = vmax.f32 %v5564_v9, 0.0  ;;  %v5578_v59 = vld [vmem:[%s11048_s7] sm:$0x1] }
 0xb0a   : > { %v5572_v26 = vmax.f32 %v5566_v10, 0.0  ;;  %v5567_v39 = vadd.f32 %v5555_v0, %v5544_v40  ;;  %v8945_v0 = vld [vmem:[%s11049_s8 + $0x78] sm:$0xff]  }
 0xb0c   : > { %v5575_v12 = vpack.c.bf16 %v5572_v26, %v5569_v61  ;;  %v5573_v56 = vmax.f32 %v5567_v39, 0.0  ;;  %v8941_v61 = vld [vmem:[%s11049_s8 + $0x88] sm:$0xff]  }
 0xb0e   : > { %v5576_v13 = vpack.c.bf16 %v5573_v56, %v5570_v29  ;;  %v10809_v50 = vand.u32 %v5586_v8, %v5575_v12 }
 0xb10   : > { %v10807_v11 = vand.u32 %v5586_v8, %v5576_v13 }
 0xb12   : > { %5610 = vmatprep.subr.bf16.mxu1 %v10807_v11 }
 0xb13   : > { %5611 = vmatpush1.bf16.msra.mxu1 %v10809_v50 }
 0xb14   : > { %5735 = vmatprep.subr.bf16.mxu1 %v10807_v11 }
 0xb16   : > { %7519 = vmatmul.mubr.msk.bf16.vlgmr.msra.gmra.mxu1 %vm5579_vm7, %v5578_v59 }
 0xb17   : > { %5736 = vmatpush1.bf16.msra.mxu1 %v10809_v50  ;;  %5753 = vmatprep.mubr.bf16.mxu1 %v8993_v34 }
 0xb18   : > { %7911 = vmatprep.subr.bf16.mxu1 %v8925_v15  ;;  %v8946_v15 = vld [vmem:[%s11049_s8 + $0x38] sm:$0xff]  }
 0xb1e   : > { %7522 = vmatmul.mubr.msk.bf16.vlgmr.msra.gmra.mxu1 %vm5579_vm7, %v7521_v17 }
 0xb1f   : > { %7912 = vmatpush3.bf16.msra.mxu1 %v8926_v16  ;;  %v7896_v3 = vpop.f32.mrf.mxu0  ;;  %v8947_v16 = vld [vmem:[%s11049_s8 + $0x70] sm:$0xff]  }
 0xb20   : > { %7913 = vmatprep.subr.bf16.mxu1 %v8927_v18  ;;  %v8948_v18 = vld [vmem:[%s11049_s8 + $0x30] sm:$0xff]  }
 0xb21   : > { %v7897_v23 = vpop.f32.mrf.mxu0 }
 0xb22   : > { %v7898_v1 = vadd.f32 %v7897_v23, %v7896_v3  ;;  %v8950_v3 = vld [vmem:[%s11049_s8 + $0x28] sm:$0xff]   ;;  %v8953_v23 = vld [vmem:[%s11049_s8 + $0x58] sm:$0xff]  }
 0xb23   : > { %7914 = vmatpush3.bf16.msra.mxu1 %v8928_v19  ;;  %v7899_v33 = vpop.f32.mrf.mxu0  ;;  %v8949_v19 = vld [vmem:[%s11049_s8 + $0x68] sm:$0xff]  }
 0xb24   : > { %7915 = vmatprep.subr.bf16.mxu1 %v8929_v21 }
 0xb25   : > { %v7900_v43 = vpop.f32.mrf.mxu0 }
 0xb26   : > { %v7901_v46 = vadd.f32 %v7900_v43, %v7899_v33  ;;  %v8956_v33 = vld [vmem:[%s11049_s8 + $0x10] sm:$0xff]   ;;  %v8958_v43 = vld [vmem:[%s11049_s8 + $0x8] sm:$0xff]  }
 0xb27   : > { %7916 = vmatpush3.bf16.msra.mxu1 %v8930_v24  ;;  %v8951_v24 = vld [vmem:[%s11049_s8 + $0x60] sm:$0xff]  }
 0xb28   : > { %7917 = vmatprep.subr.bf16.mxu1 %v8931_v22  ;;  %v8952_v22 = vld [vmem:[%s11049_s8 + $0x20] sm:$0xff]  }
 0xb2b   : > { %7918 = vmatpush3.bf16.msra.mxu1 %v8932_v25  ;;  %v8954_v25 = vld [vmem:[%s11049_s8 + $0x18] sm:$0xff]  }
 0xb2c   : > { %7919 = vmatprep.subr.bf16.mxu1 %v8933_v28  ;;  %v8955_v28 = vld [vmem:[%s11049_s8 + $0x50] sm:$0xff]  }
 0xb2f   : > { %v5533_v42 = vpop.f32.mrf.mxu0  ;;  %7920 = vmatpush3.bf16.msra.mxu1 %v8934_v49  ;;  %v8957_v49 = vld [vmem:[%s11049_s8 + $0x48] sm:$0xff]  }
 0xb30   : > { %v5534_v37 = vadd.f32 %v7898_v1, %v5533_v42  ;;  %7921 = vmatprep.subr.bf16.mxu1 %v8935_v32  ;;  %v8959_v1 = vld [vmem:[%s11049_s8 + $0x40] sm:$0xff]  }
 0xb31   : > { %v8322_v62 = vpop.f32.mrf.mxu0  ;;  %v8960_v42 = vld [vmem:[%s11049_s8] sm:$0xff]  }
 0xb32   : > { %v5542_v20 = vadd.f32 %v5534_v37, %v10718_v60  ;;  %v8937_v60 = vld [vmem:[%s11049_s8 + $0xd8] sm:$0xff]   ;;  %v8975_v32 = vld [vmem:[%s11049_s8 + $0x160] sm:$0xff]  }
 0xb33   : > { %v5536_v2 = vpop.f32.mrf.mxu0  ;;  %7922 = vmatpush3.bf16.msra.mxu1 %v8936_v36  ;;  %v8961_v62 = vld [vmem:[%s11049_s8 + $0x198] sm:$0xff]   ;;  %v8976_v36 = vld [vmem:[%s11049_s8 + $0x120] sm:$0xff]  }
 0xb34   : > { %v5537_v35 = vadd.f32 %v7901_v46, %v5536_v2  ;;  %v5565_v48 = vadd.f32 %v5559_v63, %v5542_v20  ;;  %7923 = vmatprep.subr.bf16.mxu1 %v8937_v60  ;;  %v8962_v46 = vld [vmem:[%s11049_s8 + $0x158] sm:$0xff]   ;;  %v8963_v20 = vld [vmem:[%s11049_s8 + $0x190] sm:$0xff]   ;;  %v8965_v2 = vld [vmem:[%s11049_s8 + $0x188] sm:$0xff]  }
 0xb35   : > { %v8323_v52 = vpop.f32.mrf.mxu0  ;;  %v8977_v60 = vld [vmem:[%s11049_s8 + $0x1a8] sm:$0xff]  }
 0xb36   : > { %v5545_v4 = vadd.f32 %v5537_v35, %v10721_v14  ;;  %v5571_v41 = vmax.f32 %v5565_v48, 0.0  ;;  %v8938_v14 = vld [vmem:[%s11049_s8 + $0x98] sm:$0xff]   ;;  %v8966_v35 = vld [vmem:[%s11049_s8 + $0x148] sm:$0xff]   ;;  %v8967_v52 = vld [vmem:[%s11049_s8 + $0x180] sm:$0xff]  }
 0xb37   : > { %7924 = vmatpush3.bf16.msra.mxu1 %v8938_v14  ;;  %v8968_v48 = vld [vmem:[%s11049_s8 + $0x140] sm:$0xff]  }
 0xb38   : > { %v5568_v6 = vadd.f32 %v5559_v63, %v5545_v4  ;;  %7925 = vmatprep.subr.bf16.mxu1 %v8939_v51  ;;  %v8964_v63 = vld [vmem:[%s11049_s8 + $0x150] sm:$0xff]   ;;  %v8969_v4 = vld [vmem:[%s11049_s8 + $0x178] sm:$0xff]   ;;  %v8978_v14 = vld [vmem:[%s11049_s8 + $0x1a0] sm:$0xff]  }
 0xb3a   : > { %v5574_v7 = vmax.f32 %v5568_v6, 0.0  ;;  %v8970_v6 = vld [vmem:[%s11049_s8 + $0x138] sm:$0xff]  }
 0xb3b   : > { %7926 = vmatpush3.bf16.msra.mxu1 %v8940_v47 }
 0xb3c   : > { %v5577_v44 = vpack.c.bf16 %v5574_v7, %v5571_v41  ;;  %8344 = vmatprep.subr.bf16.mxu1 %v8994_v45  ;;  %v8971_v41 = vld [vmem:[%s11049_s8 + $0x170] sm:$0xff]  }
 0xb3d   : > { %v8972_v7 = vld [vmem:[%s11049_s8 + $0x130] sm:$0xff]  }
 0xb3e   : > { %v10859_v30 = vand.u32 %v5586_v8, %v5577_v44  ;;  %v8973_v44 = vld [vmem:[%s11049_s8 + $0x168] sm:$0xff]  }
 0xb40   : > { %8325 = vmatpush3.bf16.msra.mxu0 %v10859_v30 }
 0xb41   : > { %8330 = vmatprep.subr.bf16.mxu0 %v8994_v45 }
 0xb43   : > { %8327 = vmatmul.mubr.msk.bf16.vlgmr.msra.gmra.mxu0 %vm5579_vm7, %v5578_v59 }
 0xb44   : > { %8331 = vmatpush3.bf16.msra.mxu0 %v10859_v30  ;;  %8332 = vmatprep.mubr.msk.bf16.mxu0 %vm8995_vm3, %v8994_v45 }
 0xb45   : > { %8336 = vmatprep.subr.bf16.mxu0 %v8994_v45 }
 0xb4b   : > { %8333 = vmatmul.mubr.msk.bf16.vlgmr.msra.gmra.mxu0 %vm5579_vm7, %v7521_v17 }
 0xb4c   : > { %8340 = vmatprep.mubr.msk.bf16.mxu0 %vm8995_vm3, %v8994_v45  ;;  %8337 = vmatpush3.bf16.msra.mxu0 %v8943_v55 }
 0xb4d   : > { %8338 = vmatprep.subr.bf16.mxu0 %v8994_v45 }
 0xb50   : > { %8339 = vmatpush3.bf16.msra.mxu0 %v8944_v53 }
 0xb51   : > { %7936 = vmatprep.subr.bf16.mxu0 %v8945_v0 }
 0xbd6   : > { %v10900_v57 = vpop.f32.mrf.mxu1 }
 0xbd7   : > { %v5677_v37 = vpack.c.bf16 %v10900_v57, %v10900_v57 }
 0xbd8   : > { %v5632_v27 = vpop.f32.mrf.mxu1 }
 0xbd9   : > { %v5678_v8 = vpack.c.bf16 %v5632_v27, %v5632_v27 }
 0xbda   : > { %v5634_v54 = vpop.f32.mrf.mxu1 }
 0xbdc   : > { %v5635_v58 = vpop.f32.mrf.mxu1 }
 0xbde   : > { %v5755_v5 = vpop.f32.mrf.mxu1 }
 0xbdf   : > { %v5802_v9 = vpack.c.bf16 %v5755_v5, %v5755_v5 }
 0xbe0   : > { %v5757_v10 = vpop.f32.mrf.mxu1 }
 0xbe1   : > { %v5803_v40 = vpack.c.bf16 %v5757_v10, %v5757_v10 }
 0xbe2   : > { %v5759_v26 = vpop.f32.mrf.mxu1 }
 0xbe3   : > { %5986 = vmatprep.mubr.bf16.mxu1 %v5803_v40 }
 0xbe4   : > { %5987 = vmatmul.mubr.bf16.vlgmr.msra.gmra.mxu1 %v5802_v9  ;;  %v5760_v39 = vpop.f32.mrf.mxu1 }
 0xbe5   : > { %8345 = vmatpush3.bf16.msra.mxu1 %v8941_v61  ;;  %8348 = vmatprep.mubr.msk.bf16.mxu1 %vm8995_vm3, %v8994_v45 }
 0xbe6   : > { %8346 = vmatprep.subr.bf16.mxu1 %v8994_v45 }
 0xbe9   : > { %8347 = vmatpush3.bf16.msra.mxu1 %v8942_v38 }
 0xbea   : > { %6244 = vmatprep.subr.bf16.mxu1 %v10807_v11  ;;  %v7598_v11 = vld [vmem:[%s11048_s7 + $0x2] sm:$0x1] }
 0xc03   : > { %v5671_v31 = vpop.f32.mrf.mxu0 }
 0xc04   : > { %v5679_v29 = vpack.c.bf16 %v5671_v31, %v5671_v31 }
 0xc05   : > { %v8328_v12 = vpop.f32.mrf.mxu0 }
 0xc06   : > { %8349 = vmatmul.mubr.msk.bf16.vlgmr.msra.gmra.mxu1 %vm5950_vm8, %v5679_v29 }
 0xc07   : > { %6245 = vmatpush1.bf16.msra.mxu1 %v10809_v50  ;;  %v5674_v56 = vpop.f32.mrf.mxu0  ;;  %6262 = vmatprep.mubr.bf16.mxu1 %v8993_v34 }
 0xc08   : > { %7963 = vmatprep.subr.bf16.mxu1 %v8961_v62 }
 0xc09   : > { %v8329_v13 = vpop.f32.mrf.mxu0 }
 0xc0b   : > { %v5796_v59 = vpop.f32.mrf.mxu0 }
 0xc0c   : > { %v5804_v17 = vpack.c.bf16 %v5796_v59, %v5796_v59 }
 0xc0d   : > { %v8334_v50 = vpop.f32.mrf.mxu0 }
 0xc0e   : > { %8341 = vmatmul.mubr.msk.bf16.vlgmr.msra.gmra.mxu0 %vm5950_vm8, %v5804_v17  ;;  %7599 = vmatmul.mubr.msk.bf16.vlgmr.msra.gmra.mxu1 %vm5579_vm7, %v7598_v11 }
 0xc0f   : > { %7937 = vmatpush3.bf16.msra.mxu0 %v8946_v15  ;;  %v5799_v34 = vpop.f32.mrf.mxu0  ;;  %6177 = vmatprep.mubr.bf16.mxu0 %v5678_v8 }
 0xc10   : > { %7938 = vmatprep.subr.bf16.mxu0 %v8947_v16  ;;  %7964 = vmatpush3.bf16.msra.mxu1 %v8962_v46 }
 0xc11   : > { %v8335_v21 = vpop.f32.mrf.mxu0  ;;  %7965 = vmatprep.subr.bf16.mxu1 %v8963_v20 }
 0xc13   : > { %7939 = vmatpush3.bf16.msra.mxu0 %v8948_v18 }
 0xc14   : > { %7940 = vmatprep.subr.bf16.mxu0 %v8949_v19  ;;  %7966 = vmatpush3.bf16.msra.mxu1 %v8964_v63 }
 0xc15   : > { %7967 = vmatprep.subr.bf16.mxu1 %v8965_v2 }
 0xc17   : > { %7941 = vmatpush3.bf16.msra.mxu0 %v8950_v3 }
 0xc18   : > { %7942 = vmatprep.subr.bf16.mxu0 %v8951_v24  ;;  %7968 = vmatpush3.bf16.msra.mxu1 %v8966_v35 }
 0xc19   : > { %7969 = vmatprep.subr.bf16.mxu1 %v8967_v52 }
 0xc1b   : > { %7943 = vmatpush3.bf16.msra.mxu0 %v8952_v22 }
 0xc1c   : > { %7944 = vmatprep.subr.bf16.mxu0 %v8953_v23  ;;  %7970 = vmatpush3.bf16.msra.mxu1 %v8968_v48 }
 0xc1d   : > { %7971 = vmatprep.subr.bf16.mxu1 %v8969_v4 }
 0xc1f   : > { %7945 = vmatpush3.bf16.msra.mxu0 %v8954_v25 }
 0xc20   : > { %7946 = vmatprep.subr.bf16.mxu0 %v8955_v28  ;;  %7972 = vmatpush3.bf16.msra.mxu1 %v8970_v6  ;;  %v7656_v28 = vld [vmem:[%s11050_s9] ss:$0 sm:$0xff] }
 0xc21   : > { %7973 = vmatprep.subr.bf16.mxu1 %v8971_v41 }
 0xc23   : > { %7947 = vmatpush3.bf16.msra.mxu0 %v8956_v33 }
 0xc24   : > { %7948 = vmatprep.subr.bf16.mxu0 %v8957_v49  ;;  %7974 = vmatpush3.bf16.msra.mxu1 %v8972_v7 }
 0xc25   : > { %7975 = vmatprep.subr.bf16.mxu1 %v8973_v44 }
 0xc27   : > { %7949 = vmatpush3.bf16.msra.mxu0 %v8958_v43 }
 0xc28   : > { %7950 = vmatprep.subr.bf16.mxu0 %v8959_v1 }
 0xc2b   : > { %7951 = vmatpush3.bf16.msra.mxu0 %v8960_v42 }
 0xc2c   : > { %8352 = vmatprep.subr.bf16.mxu0 %v8994_v45 }
 0xc2e   : > { %6178 = vmatmul.mubr.bf16.vlgmr.msra.gmra.mxu0 %v5677_v37 }
 0xc2f   : > { %8353 = vmatpush3.bf16.msra.mxu0 %v10859_v30  ;;  %8354 = vmatprep.mubr.msk.bf16.mxu0 %vm8995_vm3, %v8994_v45  ;;  %v8974_v30 = vld [vmem:[%s11049_s8 + $0x128] sm:$0xff]  }
 0xc30   : > { %8358 = vmatprep.subr.bf16.mxu0 %v8994_v45  ;;  %7976 = vmatpush3.bf16.msra.mxu1 %v8974_v30 }
 0xc31   : > { %7977 = vmatprep.subr.bf16.mxu1 %v8975_v32 }
 0xc34   : > { %7978 = vmatpush3.bf16.msra.mxu1 %v8976_v36 }
 0xc36   : > { %8355 = vmatmul.mubr.msk.bf16.vlgmr.msra.gmra.mxu0 %vm5579_vm7, %v7598_v11 }
 0xc37   : > { %8362 = vmatprep.mubr.msk.bf16.mxu0 %vm8995_vm3, %v8994_v45  ;;  %8359 = vmatpush3.bf16.msra.mxu0 %v8977_v60 }
 0xc38   : > { %8360 = vmatprep.subr.bf16.mxu0 %v8994_v45 }
 0xc3b   : > { %8361 = vmatpush3.bf16.msra.mxu0 %v8978_v14 }
 0xca4   : > { %v7927_v51 = vpop.f32.mrf.mxu1 }
 0xca6   : > { %v7928_v47 = vpop.f32.mrf.mxu1 }
 0xca7   : > { %v7929_v55 = vadd.f32 %v7928_v47, %v7927_v51 }
 0xca8   : > { %v7930_v53 = vpop.f32.mrf.mxu1 }
 0xcaa   : > { %v7931_v0 = vpop.f32.mrf.mxu1 }
 0xcc6   : > { %v6219_v57 = vpop.f32.mrf.mxu1 }
 0xcc8   : > { %v8350_v27 = vpop.f32.mrf.mxu1 }
 0xcca   : > { %v6222_v54 = vpop.f32.mrf.mxu1 }
 0xccc   : > { %v8351_v58 = vpop.f32.mrf.mxu1 }
 0xcce   : > { %v6028_v5 = vpop.f32.mrf.mxu0  ;;  %v6264_v9 = vpop.f32.mrf.mxu1 }
 0xccf   : > { %v6029_v10 = vadd.f32 %v7929_v55, %v6028_v5  ;;  %v6311_v61 = vpack.c.bf16 %v6264_v9, %v6264_v9 }
 0xcd0   : > { %v8342_v40 = vpop.f32.mrf.mxu0  ;;  %v6266_v45 = vpop.f32.mrf.mxu1 }
 0xcd1   : > { %v6312_v26 = vpack.c.bf16 %v6266_v45, %v6266_v45 }
 0xcd2   : > { %v6031_v39 = vpop.f32.mrf.mxu0  ;;  %v6268_v38 = vpop.f32.mrf.mxu1 }
 0xcd3   : > { %6494 = vmatprep.mubr.bf16.mxu1 %v6312_v26 }
 0xcd4   : > { %v8343_v31 = vpop.f32.mrf.mxu0  ;;  %6495 = vmatmul.mubr.bf16.vlgmr.msra.gmra.mxu1 %v6311_v61  ;;  %v6269_v29 = vpop.f32.mrf.mxu1 }
 0xcee   : > { %v7952_v12 = vpop.f32.mrf.mxu0 }
 0xcf0   : > { %v7953_v56 = vpop.f32.mrf.mxu0 }
 0xcf1   : > { %v7954_v13 = vadd.f32 %v7953_v56, %v7952_v12 }
 0xcf2   : > { %v7955_v8 = vpop.f32.mrf.mxu0 }
 0xcf3   : > { %v6180_v59 = vadd.f32 %v7954_v13, %v6029_v10 }
 0xcf4   : > { %v7956_v15 = vpop.f32.mrf.mxu0 }
 0xcf5   : > { %v6220_v11 = vadd.f32 %v6219_v57, %v6180_v59 }
 0xcf6   : > { %v6305_v17 = vpop.f32.mrf.mxu0 }
 0xcf7   : > { %v6313_v16 = vpack.c.bf16 %v6305_v17, %v6305_v17 }
 0xcf8   : > { %v8356_v50 = vpop.f32.mrf.mxu0 }
 0xcf9   : > { %8363 = vmatmul.mubr.msk.bf16.vlgmr.msra.gmra.mxu0 %vm5950_vm8, %v6313_v16 }
 0xcfa   : > { %v6308_v34 = vpop.f32.mrf.mxu0 }
 0xcfc   : > { %v8357_v18 = vpop.f32.mrf.mxu0 }
 0xd94   : > { %v7979_v19 = vpop.f32.mrf.mxu1 }
 0xd96   : > { %v7980_v21 = vpop.f32.mrf.mxu1 }
 0xd97   : > { %v7981_v22 = vadd.f32 %v7980_v21, %v7979_v19 }
 0xd98   : > { %v7982_v3 = vpop.f32.mrf.mxu1 }
 0xd9a   : > { %v7983_v24 = vpop.f32.mrf.mxu1 }
 0xdb9   : > { %v6536_v23 = vpop.f32.mrf.mxu0 }
 0xdba   : > { %v6537_v25 = vadd.f32 %v7981_v22, %v6536_v23 }
 0xdbb   : > { %v8364_v33 = vpop.f32.mrf.mxu0 }
 0xdbc   : > { %v6542_v49 = vadd.f32 %v6537_v25, %v6220_v11 }
 0xdbd   : > { %v6539_v43 = vpop.f32.mrf.mxu0 }
 0xdbe   : > { %v6550_v1 = vadd.f32 %v7656_v28, %v6542_v49 }
 0xdbf   : > { %v8365_v42 = vpop.f32.mrf.mxu0 }
 0xdc0   : > { %6551 = vst [vmem:[%s357_s19] sm:$0x3] %v6550_v1 }
 0xdc1 PF: > { %s20_s13 = sadd.s32 1, %s8991_s13  }
 0xdc2   : > { %p17_p4 = scmp.ge.s32.totalorder %s20_s13, 4  }
 0xdc4   :  { %19 = sbr.rel (!%p17_p4) target bundleno = 1 (0x1), region = 114 }

</bundles_post_ra>
